<compile_context>
chip_gen: v7x
topology: tpu7x:2x2x1
jax: 0.10.0
libtpu: 0.0.40
codegen_flags: <defaults>
</compile_context>

<pallas_src>
import jax
import jax.numpy as jnp
from jax.experimental import pallas as pl
from jax.experimental.pallas import tpu as pltpu

K_CLASSES = 2          # PointNetCls(k=2)
CLASS_PAD = 128        # lane-dense padded class dim for the output
POINT_TILE = 256       # points per grid step (sublane-aligned)


def pointnet_kernel(x_ref,
                    w1_ref, b1_ref, w2_ref, b2_ref, w3_ref, b3_ref,
                    fw1_ref, fb1_ref, fw2_ref, fb2_ref, fw3_ref, fb3_ref,
                    out_ref, maxf_ref):
    k = pl.program_id(1)
    nk = pl.num_programs(1)

    @pl.when(k == 0)
    def _init():
        maxf_ref[...] = jnp.full(maxf_ref.shape, -jnp.inf, dtype=maxf_ref.dtype)

    x = x_ref[0]                                        # (TN, 3) f32

    # conv1 + bn1 + relu: Cin=3 contraction as three VPU broadcast FMAs
    w1 = w1_ref[...]                                    # (3, 64) f32
    h = (x[:, 0:1] * w1[0:1, :]
         + x[:, 1:2] * w1[1:2, :]
         + x[:, 2:3] * w1[2:3, :]
         + b1_ref[...])
    h = jnp.maximum(h, 0.0)

    # conv2 + bn2 + relu (bf16 operands, f32 accumulation on the MXU)
    h = jnp.dot(h.astype(jnp.bfloat16), w2_ref[...],
                preferred_element_type=jnp.float32) + b2_ref[...]
    h = jnp.maximum(h, 0.0)

    # conv3 + bn3 (bias added once in the head; it commutes with the point max)
    h = jnp.dot(h.astype(jnp.bfloat16), w3_ref[...],
                preferred_element_type=jnp.float32)     # (TN, 1024) f32

    # fold this tile into the running per-channel max (padded rows are duplicates
    # of a real point, so the max is exact without masking)
    maxf_ref[...] = jnp.maximum(maxf_ref[...], jnp.max(h, axis=0, keepdims=True))

    # classifier head + log_softmax: only on the final point tile (all f32, M=1)
    @pl.when(k == nk - 1)
    def _head():
        feat = maxf_ref[...] + b3_ref[...]                               # (1, 1024)
        z = jnp.dot(feat, fw1_ref[...],
                    preferred_element_type=jnp.float32) + fb1_ref[...]   # fc1 + bn1
        z = jnp.maximum(z, 0.0)
        z = jnp.dot(z, fw2_ref[...],
                    preferred_element_type=jnp.float32) + fb2_ref[...]   # fc2 + (dropout) + bn2
        z = jnp.maximum(z, 0.0)
        logits = jnp.dot(z, fw3_ref[...],
                         preferred_element_type=jnp.float32) + fb3_ref[...]  # (1, 128)
        # log_softmax; padded class columns carry a -1e30 bias -> exp() == 0
        m = jnp.max(logits, axis=1, keepdims=True)
        s = logits - m
        lse = jnp.log(jnp.sum(jnp.exp(s), axis=1, keepdims=True))
        out_ref[0] = s - lse


def pointnet_cls(x_ncw, params, *, tn=POINT_TILE):
    """x_ncw: (B, 3, N) float32 — PyTorch Conv1d NCW layout. Returns (B, k) log-probs."""
    B, _, N = x_ncw.shape
    x = jnp.transpose(x_ncw, (0, 2, 1)).astype(jnp.float32)              # (B, N, 3)
    n_pad = pl.cdiv(N, tn) * tn
    if n_pad != N:
        # edge-pad: duplicated last point leaves the per-channel max unchanged (exact)
        x = jnp.pad(x, ((0, 0), (0, n_pad - N), (0, 0)), mode="edge")
    nk = n_pad // tn

    # bulk matmul operands -> bf16 (f32 accumulation in-kernel); everything else f32
    w1 = params["w1"].astype(jnp.float32)                                # VPU path
    w2 = params["w2"].astype(jnp.bfloat16)
    w3 = params["w3"].astype(jnp.bfloat16)
    fw1 = params["fw1"].astype(jnp.float32)
    fw2 = params["fw2"].astype(jnp.float32)
    k_cls = params["fw3"].shape[1]
    # lane-dense class padding: zero weights + -1e30 bias so pads vanish in softmax
    fw3 = jnp.pad(params["fw3"], ((0, 0), (0, CLASS_PAD - k_cls))).astype(jnp.float32)
    fb3 = jnp.pad(params["fb3"], ((0, 0), (0, CLASS_PAD - k_cls)),
                  constant_values=-1e30).astype(jnp.float32)

    weights = (w1, params["b1"], w2, params["b2"], w3, params["b3"],
               fw1, params["fb1"], fw2, params["fb2"], fw3, fb3)

    const = lambda b, k: (0, 0)           # weights DMA'd once, resident across the grid
    w_specs = [pl.BlockSpec(w.shape, const) for w in weights]

    out = pl.pallas_call(
        pointnet_kernel,
        out_shape=jax.ShapeDtypeStruct((B, 1, CLASS_PAD), jnp.float32),
        grid_spec=pltpu.PrefetchScalarGridSpec(
            num_scalar_prefetch=0,
            grid=(B, nk),
            in_specs=[pl.BlockSpec((1, tn, 3), lambda b, k: (b, k, 0))] + w_specs,
            out_specs=pl.BlockSpec((1, 1, CLASS_PAD), lambda b, k: (b, 0, 0)),
            scratch_shapes=[pltpu.VMEM((1, 1024), jnp.float32)],
        ),
        compiler_params=pltpu.CompilerParams(
            dimension_semantics=("parallel", "arbitrary"),
            vmem_limit_bytes=64 * 1024 * 1024,
        ),
    )(x, *weights)

    return out[:, 0, :k_cls]


# ----------------------------- pure-JAX f32 reference -----------------------------
def pointnet_ref(x_ncw, params):
    x = jnp.transpose(x_ncw, (0, 2, 1)).astype(jnp.float32)
    h = jnp.maximum(x @ params["w1"] + params["b1"], 0.0)
    h = jnp.maximum(h @ params["w2"] + params["b2"], 0.0)
    h = h @ params["w3"] + params["b3"]
    feat = jnp.max(h, axis=1)
    z = jnp.maximum(feat @ params["fw1"] + params["fb1"], 0.0)
    z = jnp.maximum(z @ params["fw2"] + params["fb2"], 0.0)
    logits = z @ params["fw3"] + params["fb3"]
    return jax.nn.log_softmax(logits, axis=1)


# ----------------------- deterministic parameter construction -----------------------
def _bn_stats(key, c):
    k1, k2, k3, k4 = jax.random.split(key, 4)
    gamma = 1.0 + 0.1 * jax.random.normal(k1, (c,), jnp.float32)
    beta = 0.05 * jax.random.normal(k2, (c,), jnp.float32)
    mean = 0.02 * jax.random.normal(k3, (c,), jnp.float32)
    var = 1.0 + 0.1 * jnp.abs(jax.random.normal(k4, (c,), jnp.float32))
    return gamma, beta, mean, var


def _fold_bn(w, b, gamma, beta, mean, var, eps=1e-5):
    """Fold eval-mode BatchNorm1d into the preceding linear layer (exact)."""
    scale = gamma / jnp.sqrt(var + eps)
    w_f = w * scale[None, :]
    b_f = b * scale + beta - mean * scale
    return w_f, b_f


def init_params(key):
    ks = jax.random.split(key, 16)

    def lin(kw, kb, cin, cout, scale=0.1):
        w = scale * jax.random.normal(kw, (cin, cout), jnp.float32)
        b = scale * jax.random.normal(kb, (cout,), jnp.float32)
        return w, b

    # PointNetfeat conv weights (Conv1d kernel_size=1 -> (cin, cout) matmul weights)
    w1, b1 = lin(ks[0], ks[1], 3, 64)
    w2, b2 = lin(ks[2], ks[3], 64, 128)
    w3, b3 = lin(ks[4], ks[5], 128, 1024)
    w1, b1 = _fold_bn(w1, b1, *_bn_stats(ks[6], 64))
    w2, b2 = _fold_bn(w2, b2, *_bn_stats(ks[7], 128))
    w3, b3 = _fold_bn(w3, b3, *_bn_stats(ks[8], 1024))

    # Classifier fc layers
    fw1, fb1 = lin(ks[9], ks[10], 1024, 512, scale=0.05)
    fw2, fb2 = lin(ks[11], ks[12], 512, 256, scale=0.05)
    fw3, fb3 = lin(ks[13], ks[14], 256, K_CLASSES, scale=0.05)
    fw1, fb1 = _fold_bn(fw1, fb1, *_bn_stats(ks[15], 512))
    fw2, fb2 = _fold_bn(fw2, fb2, *_bn_stats(jax.random.fold_in(ks[15], 1), 256))

    # biases as (1, C) rows so they broadcast cleanly inside the kernel
    return dict(
        w1=w1, b1=b1.reshape(1, -1), w2=w2, b2=b2.reshape(1, -1),
        w3=w3, b3=b3.reshape(1, -1),
        fw1=fw1, fb1=fb1.reshape(1, -1), fw2=fw2, fb2=fb2.reshape(1, -1),
        fw3=fw3, fb3=fb3.reshape(1, -1),
    )


if __name__ == "__main__":
    key = jax.random.PRNGKey(0)
    pkey, xkey = jax.random.split(key)
    params = init_params(pkey)

    # batch=2, 200 points (not a tile multiple -> exercises edge padding)
    B, N = 2, 200
    x = jax.random.normal(xkey, (B, 3, N), dtype=jnp.float32)   # PyTorch NCW layout

    log_probs = jax.jit(pointnet_cls)(x, params)
    jax.block_until_ready(log_probs)

    assert log_probs.shape == (B, K_CLASSES)
    assert bool(jnp.all(jnp.isfinite(log_probs)))
    # rows of log_softmax must (log-)sum to ~1
    assert bool(jnp.allclose(jnp.sum(jnp.exp(log_probs), axis=1), 1.0, atol=1e-5))

    # bf16 MXU operands (f32 accumulation) vs. the f32 reference -> loose tolerance
    ref = pointnet_ref(x, params)
    assert bool(jnp.allclose(log_probs, ref, atol=2e-1)), (log_probs, ref)

    print("KERNEL_OK")
</pallas_src>

<mosaic_0001>
module attributes {stable_mosaic.version = 11 : i64} {
  func.func @pointnet_kernel(%arg0: i32, %arg1: i32, %arg2: memref<1x256x3xf32, #tpu.memory_space<vmem>>, %arg3: memref<3x64xf32, #tpu.memory_space<vmem>>, %arg4: memref<1x64xf32, #tpu.memory_space<vmem>>, %arg5: memref<64x128xbf16, #tpu.memory_space<vmem>>, %arg6: memref<1x128xf32, #tpu.memory_space<vmem>>, %arg7: memref<128x1024xbf16, #tpu.memory_space<vmem>>, %arg8: memref<1x1024xf32, #tpu.memory_space<vmem>>, %arg9: memref<1024x512xf32, #tpu.memory_space<vmem>>, %arg10: memref<1x512xf32, #tpu.memory_space<vmem>>, %arg11: memref<512x256xf32, #tpu.memory_space<vmem>>, %arg12: memref<1x256xf32, #tpu.memory_space<vmem>>, %arg13: memref<256x128xf32, #tpu.memory_space<vmem>>, %arg14: memref<1x128xf32, #tpu.memory_space<vmem>>, %arg15: memref<1x1x128xf32, #tpu.memory_space<vmem>>, %arg16: memref<1x1024xf32, #tpu.memory_space<vmem>>) attributes {dimension_semantics = [#tpu.dimension_semantics<parallel>, #tpu.dimension_semantics<arbitrary>], iteration_bounds = array<i64: 2, 1>, scalar_prefetch = 0 : i64, scratch_operands = 1 : i64, tpu.core_type = #tpu.core_type<tc>, window_params = [{transform_indices = @transform_0, window_bounds = array<i64: 1, 256, 3>}, {pipeline_mode = #tpu.pipeline_mode<synchronous>, transform_indices = @transform_1, window_bounds = array<i64: 3, 64>}, {pipeline_mode = #tpu.pipeline_mode<synchronous>, transform_indices = @transform_2, window_bounds = array<i64: 1, 64>}, {pipeline_mode = #tpu.pipeline_mode<synchronous>, transform_indices = @transform_3, window_bounds = array<i64: 64, 128>}, {pipeline_mode = #tpu.pipeline_mode<synchronous>, transform_indices = @transform_4, window_bounds = array<i64: 1, 128>}, {pipeline_mode = #tpu.pipeline_mode<synchronous>, transform_indices = @transform_5, window_bounds = array<i64: 128, 1024>}, {pipeline_mode = #tpu.pipeline_mode<synchronous>, transform_indices = @transform_6, window_bounds = array<i64: 1, 1024>}, {pipeline_mode = #tpu.pipeline_mode<synchronous>, transform_indices = @transform_7, window_bounds = array<i64: 1024, 512>}, {pipeline_mode = #tpu.pipeline_mode<synchronous>, transform_indices = @transform_8, window_bounds = array<i64: 1, 512>}, {pipeline_mode = #tpu.pipeline_mode<synchronous>, transform_indices = @transform_9, window_bounds = array<i64: 512, 256>}, {pipeline_mode = #tpu.pipeline_mode<synchronous>, transform_indices = @transform_10, window_bounds = array<i64: 1, 256>}, {pipeline_mode = #tpu.pipeline_mode<synchronous>, transform_indices = @transform_11, window_bounds = array<i64: 256, 128>}, {pipeline_mode = #tpu.pipeline_mode<synchronous>, transform_indices = @transform_12, window_bounds = array<i64: 1, 128>}, {transform_indices = @transform_13, window_bounds = array<i64: 1, 1, 128>}]} {
    %c0_i32 = arith.constant 0 : i32
    %0 = arith.cmpi eq, %arg1, %c0_i32 : i32
    %1 = arith.extui %0 : i1 to i32
    %c0_i32_0 = arith.constant 0 : i32
    %2 = arith.cmpi ne, %1, %c0_i32_0 : i32
    scf.if %2 {
      %cst_23 = arith.constant 0xFF800000 : f32
      %47 = vector.broadcast %cst_23 : f32 to vector<1x1024xf32>
      %c0_24 = arith.constant 0 : index
      %c0_25 = arith.constant 0 : index
      %48 = vector.load %arg16[%c0_24, %c0_25] : memref<1x1024xf32, #tpu.memory_space<vmem>>, vector<1x1024xf32>
      tpu.vector_store %arg16[%c0_24, %c0_25], %47 {strides = array<i32>} : memref<1x1024xf32, #tpu.memory_space<vmem>>, vector<1x1024xf32>,
    } else {
    }
    %c0 = arith.constant 0 : index
    %c0_1 = arith.constant 0 : index
    %c0_2 = arith.constant 0 : index
    %3 = vector.load %arg2[%c0, %c0_1, %c0_2] : memref<1x256x3xf32, #tpu.memory_space<vmem>>, vector<1x256x3xf32>
    %4 = vector.shape_cast %3 : vector<1x256x3xf32> to vector<256x3xf32>
    %c0_3 = arith.constant 0 : index
    %c0_4 = arith.constant 0 : index
    %5 = vector.load %arg3[%c0_3, %c0_4] : memref<3x64xf32, #tpu.memory_space<vmem>>, vector<3x64xf32>
    %6 = vector.extract_strided_slice %4 {offsets = [0, 0], sizes = [256, 1], strides = [1, 1]} : vector<256x3xf32> to vector<256x1xf32>
    %7 = vector.extract_strided_slice %5 {offsets = [0, 0], sizes = [1, 64], strides = [1, 1]} : vector<3x64xf32> to vector<1x64xf32>
    %8 = vector.broadcast %6 : vector<256x1xf32> to vector<256x64xf32>
    %9 = vector.broadcast %7 : vector<1x64xf32> to vector<256x64xf32>
    %10 = arith.mulf %8, %9 : vector<256x64xf32>
    %11 = vector.extract_strided_slice %4 {offsets = [0, 1], sizes = [256, 1], strides = [1, 1]} : vector<256x3xf32> to vector<256x1xf32>
    %12 = vector.extract_strided_slice %5 {offsets = [1, 0], sizes = [1, 64], strides = [1, 1]} : vector<3x64xf32> to vector<1x64xf32>
    %13 = vector.broadcast %11 : vector<256x1xf32> to vector<256x64xf32>
    %14 = vector.broadcast %12 : vector<1x64xf32> to vector<256x64xf32>
    %15 = arith.mulf %13, %14 : vector<256x64xf32>
    %16 = arith.addf %10, %15 : vector<256x64xf32>
    %17 = vector.extract_strided_slice %4 {offsets = [0, 2], sizes = [256, 1], strides = [1, 1]} : vector<256x3xf32> to vector<256x1xf32>
    %18 = vector.extract_strided_slice %5 {offsets = [2, 0], sizes = [1, 64], strides = [1, 1]} : vector<3x64xf32> to vector<1x64xf32>
    %19 = vector.broadcast %17 : vector<256x1xf32> to vector<256x64xf32>
    %20 = vector.broadcast %18 : vector<1x64xf32> to vector<256x64xf32>
    %21 = arith.mulf %19, %20 : vector<256x64xf32>
    %22 = arith.addf %16, %21 : vector<256x64xf32>
    %c0_5 = arith.constant 0 : index
    %c0_6 = arith.constant 0 : index
    %23 = vector.load %arg4[%c0_5, %c0_6] : memref<1x64xf32, #tpu.memory_space<vmem>>, vector<1x64xf32>
    %24 = vector.broadcast %23 : vector<1x64xf32> to vector<256x64xf32>
    %25 = arith.addf %22, %24 : vector<256x64xf32>
    %cst = arith.constant 0.000000e+00 : f32
    %26 = vector.broadcast %cst : f32 to vector<256x64xf32>
    %27 = arith.maximumf %25, %26 : vector<256x64xf32>
    %28 = arith.truncf %27 : vector<256x64xf32> to vector<256x64xbf16>
    %c0_7 = arith.constant 0 : index
    %c0_8 = arith.constant 0 : index
    %29 = vector.load %arg5[%c0_7, %c0_8] : memref<64x128xbf16, #tpu.memory_space<vmem>>, vector<64x128xbf16>
    %cst_9 = arith.constant dense<0.000000e+00> : vector<256x128xf32>
    %30 = tpu.matmul %28, %29, %cst_9 {dimension_numbers = #tpu.dot_dimension_numbers<[1], [0], [0], [1], [0, 0, 1, 1], [], []>} : vector<256x64xbf16>, vector<64x128xbf16>, vector<256x128xf32> -> vector<256x128xf32>
    %c0_10 = arith.constant 0 : index
    %c0_11 = arith.constant 0 : index
    %31 = vector.load %arg6[%c0_10, %c0_11] : memref<1x128xf32, #tpu.memory_space<vmem>>, vector<1x128xf32>
    %32 = vector.broadcast %31 : vector<1x128xf32> to vector<256x128xf32>
    %33 = arith.addf %30, %32 : vector<256x128xf32>
    %cst_12 = arith.constant 0.000000e+00 : f32
    %34 = vector.broadcast %cst_12 : f32 to vector<256x128xf32>
    %35 = arith.maximumf %33, %34 : vector<256x128xf32>
    %36 = arith.truncf %35 : vector<256x128xf32> to vector<256x128xbf16>
    %c0_13 = arith.constant 0 : index
    %c0_14 = arith.constant 0 : index
    %37 = vector.load %arg7[%c0_13, %c0_14] : memref<128x1024xbf16, #tpu.memory_space<vmem>>, vector<128x1024xbf16>
    %cst_15 = arith.constant dense<0.000000e+00> : vector<256x1024xf32>
    %38 = tpu.matmul %36, %37, %cst_15 {dimension_numbers = #tpu.dot_dimension_numbers<[1], [0], [0], [1], [0, 0, 1, 1], [], []>} : vector<256x128xbf16>, vector<128x1024xbf16>, vector<256x1024xf32> -> vector<256x1024xf32>
    %c0_16 = arith.constant 0 : index
    %c0_17 = arith.constant 0 : index
    %39 = vector.load %arg16[%c0_16, %c0_17] : memref<1x1024xf32, #tpu.memory_space<vmem>>, vector<1x1024xf32>
    %cst_18 = arith.constant dense<0xFF800000> : vector<1024xf32>
    %40 = vector.multi_reduction <maximumf>, %38, %cst_18 [0] : vector<256x1024xf32> to vector<1024xf32>
    %41 = vector.shape_cast %40 : vector<1024xf32> to vector<1x1024xf32>
    %42 = arith.maximumf %39, %41 : vector<1x1024xf32>
    %c0_19 = arith.constant 0 : index
    %c0_20 = arith.constant 0 : index
    %43 = vector.load %arg16[%c0_19, %c0_20] : memref<1x1024xf32, #tpu.memory_space<vmem>>, vector<1x1024xf32>
    tpu.vector_store %arg16[%c0_19, %c0_20], %42 {strides = array<i32>} : memref<1x1024xf32, #tpu.memory_space<vmem>>, vector<1x1024xf32>,
    %c0_i32_21 = arith.constant 0 : i32
    %44 = arith.cmpi eq, %arg1, %c0_i32_21 : i32
    %45 = arith.extui %44 : i1 to i32
    %c0_i32_22 = arith.constant 0 : i32
    %46 = arith.cmpi ne, %45, %c0_i32_22 : i32
    scf.if %46 {
      %c0_23 = arith.constant 0 : index
      %c0_24 = arith.constant 0 : index
      %47 = vector.load %arg16[%c0_23, %c0_24] : memref<1x1024xf32, #tpu.memory_space<vmem>>, vector<1x1024xf32>
      %c0_25 = arith.constant 0 : index
      %c0_26 = arith.constant 0 : index
      %48 = vector.load %arg8[%c0_25, %c0_26] : memref<1x1024xf32, #tpu.memory_space<vmem>>, vector<1x1024xf32>
      %49 = arith.addf %47, %48 : vector<1x1024xf32>
      %c0_27 = arith.constant 0 : index
      %c0_28 = arith.constant 0 : index
      %50 = vector.load %arg9[%c0_27, %c0_28] : memref<1024x512xf32, #tpu.memory_space<vmem>>, vector<1024x512xf32>
      %cst_29 = arith.constant dense<0.000000e+00> : vector<1x512xf32>
      %51 = tpu.matmul %49, %50, %cst_29 {dimension_numbers = #tpu.dot_dimension_numbers<[1], [0], [0], [1], [0, 0, 1, 1], [], []>} : vector<1x1024xf32>, vector<1024x512xf32>, vector<1x512xf32> -> vector<1x512xf32>
      %c0_30 = arith.constant 0 : index
      %c0_31 = arith.constant 0 : index
      %52 = vector.load %arg10[%c0_30, %c0_31] : memref<1x512xf32, #tpu.memory_space<vmem>>, vector<1x512xf32>
      %53 = arith.addf %51, %52 : vector<1x512xf32>
      %cst_32 = arith.constant 0.000000e+00 : f32
      %54 = vector.broadcast %cst_32 : f32 to vector<1x512xf32>
      %55 = arith.maximumf %53, %54 : vector<1x512xf32>
      %c0_33 = arith.constant 0 : index
      %c0_34 = arith.constant 0 : index
      %56 = vector.load %arg11[%c0_33, %c0_34] : memref<512x256xf32, #tpu.memory_space<vmem>>, vector<512x256xf32>
      %cst_35 = arith.constant dense<0.000000e+00> : vector<1x256xf32>
      %57 = tpu.matmul %55, %56, %cst_35 {dimension_numbers = #tpu.dot_dimension_numbers<[1], [0], [0], [1], [0, 0, 1, 1], [], []>} : vector<1x512xf32>, vector<512x256xf32>, vector<1x256xf32> -> vector<1x256xf32>
      %c0_36 = arith.constant 0 : index
      %c0_37 = arith.constant 0 : index
      %58 = vector.load %arg12[%c0_36, %c0_37] : memref<1x256xf32, #tpu.memory_space<vmem>>, vector<1x256xf32>
      %59 = arith.addf %57, %58 : vector<1x256xf32>
      %cst_38 = arith.constant 0.000000e+00 : f32
      %60 = vector.broadcast %cst_38 : f32 to vector<1x256xf32>
      %61 = arith.maximumf %59, %60 : vector<1x256xf32>
      %c0_39 = arith.constant 0 : index
      %c0_40 = arith.constant 0 : index
      %62 = vector.load %arg13[%c0_39, %c0_40] : memref<256x128xf32, #tpu.memory_space<vmem>>, vector<256x128xf32>
      %cst_41 = arith.constant dense<0.000000e+00> : vector<1x128xf32>
      %63 = tpu.matmul %61, %62, %cst_41 {dimension_numbers = #tpu.dot_dimension_numbers<[1], [0], [0], [1], [0, 0, 1, 1], [], []>} : vector<1x256xf32>, vector<256x128xf32>, vector<1x128xf32> -> vector<1x128xf32>
      %c0_42 = arith.constant 0 : index
      %c0_43 = arith.constant 0 : index
      %64 = vector.load %arg14[%c0_42, %c0_43] : memref<1x128xf32, #tpu.memory_space<vmem>>, vector<1x128xf32>
      %65 = arith.addf %63, %64 : vector<1x128xf32>
      %cst_44 = arith.constant dense<0xFF800000> : vector<1xf32>
      %66 = vector.multi_reduction <maximumf>, %65, %cst_44 [1] : vector<1x128xf32> to vector<1xf32>
      %67 = vector.shape_cast %66 : vector<1xf32> to vector<1x1xf32>
      %68 = vector.broadcast %67 : vector<1x1xf32> to vector<1x128xf32>
      %69 = arith.subf %65, %68 : vector<1x128xf32>
      %70 = math.exp %69 : vector<1x128xf32>
      %cst_45 = arith.constant dense<0.000000e+00> : vector<1xf32>
      %71 = vector.multi_reduction <add>, %70, %cst_45 [1] : vector<1x128xf32> to vector<1xf32>
      %72 = vector.shape_cast %71 : vector<1xf32> to vector<1x1xf32>
      %73 = math.log %72 : vector<1x1xf32>
      %74 = vector.broadcast %73 : vector<1x1xf32> to vector<1x128xf32>
      %75 = arith.subf %69, %74 : vector<1x128xf32>
      %c0_46 = arith.constant 0 : index
      %c0_47 = arith.constant 0 : index
      %c0_48 = arith.constant 0 : index
      %76 = vector.load %arg15[%c0_46, %c0_47, %c0_48] : memref<1x1x128xf32, #tpu.memory_space<vmem>>, vector<1x1x128xf32>
      %77 = vector.shape_cast %76 : vector<1x1x128xf32> to vector<1x128xf32>
      %78 = vector.shape_cast %75 : vector<1x128xf32> to vector<1x1x128xf32>
      tpu.vector_store %arg15[%c0_46, %c0_47, %c0_48], %78 {strides = array<i32>} : memref<1x1x128xf32, #tpu.memory_space<vmem>>, vector<1x1x128xf32>,
    } else {
    }
    return
  }
  func.func @transform_0(%arg0: i32, %arg1: i32) -> (i32, i32, i32) {
    %c0_i32 = arith.constant 0 : i32
    %c0_i32_0 = arith.constant 0 : i32
    return %arg0, %arg1, %c0_i32 : i32, i32, i32
  }
  func.func @transform_1(%arg0: i32, %arg1: i32) -> (i32, i32) {
    %c0_i32 = arith.constant 0 : i32
    %c0_i32_0 = arith.constant 0 : i32
    %c0_i32_1 = arith.constant 0 : i32
    return %c0_i32, %c0_i32_0 : i32, i32
  }
  func.func @transform_2(%arg0: i32, %arg1: i32) -> (i32, i32) {
    %c0_i32 = arith.constant 0 : i32
    %c0_i32_0 = arith.constant 0 : i32
    %c0_i32_1 = arith.constant 0 : i32
    return %c0_i32, %c0_i32_0 : i32, i32
  }
  func.func @transform_3(%arg0: i32, %arg1: i32) -> (i32, i32) {
    %c0_i32 = arith.constant 0 : i32
    %c0_i32_0 = arith.constant 0 : i32
    %c0_i32_1 = arith.constant 0 : i32
    return %c0_i32, %c0_i32_0 : i32, i32
  }
  func.func @transform_4(%arg0: i32, %arg1: i32) -> (i32, i32) {
    %c0_i32 = arith.constant 0 : i32
    %c0_i32_0 = arith.constant 0 : i32
    %c0_i32_1 = arith.constant 0 : i32
    return %c0_i32, %c0_i32_0 : i32, i32
  }
  func.func @transform_5(%arg0: i32, %arg1: i32) -> (i32, i32) {
    %c0_i32 = arith.constant 0 : i32
    %c0_i32_0 = arith.constant 0 : i32
    %c0_i32_1 = arith.constant 0 : i32
    return %c0_i32, %c0_i32_0 : i32, i32
  }
  func.func @transform_6(%arg0: i32, %arg1: i32) -> (i32, i32) {
    %c0_i32 = arith.constant 0 : i32
    %c0_i32_0 = arith.constant 0 : i32
    %c0_i32_1 = arith.constant 0 : i32
    return %c0_i32, %c0_i32_0 : i32, i32
  }
  func.func @transform_7(%arg0: i32, %arg1: i32) -> (i32, i32) {
    %c0_i32 = arith.constant 0 : i32
    %c0_i32_0 = arith.constant 0 : i32
    %c0_i32_1 = arith.constant 0 : i32
    return %c0_i32, %c0_i32_0 : i32, i32
  }
  func.func @transform_8(%arg0: i32, %arg1: i32) -> (i32, i32) {
    %c0_i32 = arith.constant 0 : i32
    %c0_i32_0 = arith.constant 0 : i32
    %c0_i32_1 = arith.constant 0 : i32
    return %c0_i32, %c0_i32_0 : i32, i32
  }
  func.func @transform_9(%arg0: i32, %arg1: i32) -> (i32, i32) {
    %c0_i32 = arith.constant 0 : i32
    %c0_i32_0 = arith.constant 0 : i32
    %c0_i32_1 = arith.constant 0 : i32
    return %c0_i32, %c0_i32_0 : i32, i32
  }
  func.func @transform_10(%arg0: i32, %arg1: i32) -> (i32, i32) {
    %c0_i32 = arith.constant 0 : i32
    %c0_i32_0 = arith.constant 0 : i32
    %c0_i32_1 = arith.constant 0 : i32
    return %c0_i32, %c0_i32_0 : i32, i32
  }
  func.func @transform_11(%arg0: i32, %arg1: i32) -> (i32, i32) {
    %c0_i32 = arith.constant 0 : i32
    %c0_i32_0 = arith.constant 0 : i32
    %c0_i32_1 = arith.constant 0 : i32
    return %c0_i32, %c0_i32_0 : i32, i32
  }
  func.func @transform_12(%arg0: i32, %arg1: i32) -> (i32, i32) {
    %c0_i32 = arith.constant 0 : i32
    %c0_i32_0 = arith.constant 0 : i32
    %c0_i32_1 = arith.constant 0 : i32
    return %c0_i32, %c0_i32_0 : i32, i32
  }
  func.func @transform_13(%arg0: i32, %arg1: i32) -> (i32, i32, i32) {
    %c0_i32 = arith.constant 0 : i32
    %c0_i32_0 = arith.constant 0 : i32
    %c0_i32_1 = arith.constant 0 : i32
    return %arg0, %c0_i32, %c0_i32_0 : i32, i32, i32
  }
}

</mosaic_0001>

<bundles_post_ra>
// kernel: pointnet_cls.1
= control target key start
LH: loop header
LB: loop body
LE: loop exit
PB: predicated region body
PF: predicated region fallthrough
CT: control target
= control target key end

     0   :  { %s7762_s0 = inlined_call_operand.hbm [shape: f32[2,256,3], index: 0, kind: input, shape index: {}]   ;;  %s7763_s1 = inlined_call_operand.hbm [shape: f32[3,64], index: 1, kind: input, shape index: {}]   ;;  %s7764_s2 = inlined_call_operand.hbm [shape: f32[1,64], index: 2, kind: input, shape index: {}]   ;;  %s7765_s3 = inlined_call_operand.hbm [shape: bf16[64,128], index: 3, kind: input, shape index: {}]   ;;  %s7766_s4 = inlined_call_operand.hbm [shape: f32[1,128], index: 4, kind: input, shape index: {}]   ;;  %s7767_s5 = inlined_call_operand.hbm [shape: bf16[128,1024], index: 5, kind: input, shape index: {}]   ;;  %s7768_s6 = inlined_call_operand.hbm [shape: f32[1,1024], index: 6, kind: input, shape index: {}]   ;;  %s7769_s7 = inlined_call_operand.hbm [shape: f32[1024,512], index: 7, kind: input, shape index: {}]   ;;  %s7770_s8 = inlined_call_operand.hbm [shape: f32[1,512], index: 8, kind: input, shape index: {}]   ;;  %s7771_s9 = inlined_call_operand.hbm [shape: f32[512,256], index: 9, kind: input, shape index: {}]   ;;  %s7772_s10 = inlined_call_operand.hbm [shape: f32[1,256], index: 10, kind: input, shape index: {}]   ;;  %s7773_s11 = inlined_call_operand.hbm [shape: f32[256,128], index: 11, kind: input, shape index: {}]   ;;  %s7774_s12 = inlined_call_operand.hbm [shape: f32[1,128], index: 12, kind: input, shape index: {}]   ;;  %s7775_s13 = inlined_call_operand.hbm [shape: f32[2,1,128], index: 13, kind: output, shape index: {}]  }
   0x1   :  { %7788 = sst [smem:[#allocation38_spill]] %s7762_s0 }
   0x2   :  { %7789 = sst [smem:[#allocation39_spill]] %s7763_s1 }
   0x3   :  { %7790 = sst [smem:[#allocation40_spill]] %s7765_s3 }
   0x4   :  { %7791 = sst [smem:[#allocation41_spill]] %s7775_s13 }
   0x5   :  { %18 = vsyncpa [#allocation4], 0 }
   0x6   :  { %20 = vsyncpa [#allocation4 + $0x1], 0 }
   0x7   :  { %21 = vsyncpa [#allocation7], 0 }
   0x8   :  { %22 = vsyncpa [#allocation10], 0 }
   0x9   :  { %23 = vsyncpa [#allocation13], 0 }
   0xa   :  { %24 = vsyncpa [#allocation16], 0 }
   0xb   :  { %25 = vsyncpa [#allocation19], 0 }
   0xc   :  { %26 = vsyncpa [#allocation22], 0 }
   0xd   :  { %27 = vsyncpa [#allocation5], 0 }
   0xe   :  { %29 = vsyncpa [#allocation5 + $0x1], 0  ;;  %s6647_s25 = smov 0   ;;  %s6649_s26 = smov 0  }
   0xf   :  { %s6651_s27 = smov 0   ;;  %s6653_s28 = smov 0  }
  0x10   :  { %s6655_s29 = smov 0   ;;  %s6657_s30 = smov 0  }
  0x11 LB: > { %7792 = sst [smem:[#allocation33_spill]] %s6529_s25  ;;  %s7776_s14 = sadd.s32 4294967295, %s6549_s30   ;;  %s6549_s30 = sphi %s6657_s30, %s35_s30   ;;  %s6545_s29 = sphi %s6655_s29, %s7830_s29   ;;  %s6541_s28 = sphi %s6653_s28, %s7829_s28   ;;  %s6537_s27 = sphi %s6651_s27, %s7828_s27   ;;  %s6533_s26 = sphi %s6649_s26, %s7827_s26   ;;  %s6529_s25 = sphi %s6647_s25, %s7826_s25  }
  0x12   : > { %7793 = sst [smem:[#allocation34_spill]] %s6533_s26  ;;  %p4919_p0 = scmp.ge.s32.totalorder %s6549_s30, 1 }
  0x13   : > { %7794 = sst [smem:[#allocation35_spill]] %s6541_s28  ;;  %p6681_p1 = scmp.eq.s32.totalorder %s7776_s14, 0 }
  0x14   : > { %p358_p2 = scmp.lt.s32.totalorder %s6549_s30, 3  ;;  %s6551_s17 = smov [#allocation6]  }
  0x15   : > { %s7795_s15 = scalar_select %p6681_p1, 1, 0 }
  0x16   : > { %p6686_p3 = pnand %p4919_p0, %p358_p2  ;;  %s371_s18 = sshll.u32 %s6551_s17, 4  ;;  %s372_s18 = int_to_ptr.vmem [resolvable:$true] %s371_s18 }
  0x17   : > { %7796 = sst [smem:[#allocation36_spill]] %s7795_s15  ;;  %s6552_s19 = smov [#allocation9]  }
  0x18   : > { %s7797_s16 = scalar_select %p6686_p3, 1, 0 }
  0x19   : > { %p5879_p5 = pneg %p6686_p3  ;;  %s392_s20 = sshll.u32 %s6552_s19, 4  ;;  %s6699_s20 = int_to_ptr.vmem [resolvable:$true] %s392_s20 }
  0x1a   : > { %7798 = sst [smem:[#allocation37_spill]] %s7797_s16  ;;  %s6553_s22 = smov [#allocation12]  }
  0x1b   : > { %p6695_p6 = pnand %p5879_p5, %p6681_p1  ;;  %s6701_s23 = sshll.u32 %s6553_s22, 4  ;;  %s417_s23 = int_to_ptr.vmem [resolvable:$true] %s6701_s23 }
  0x1c   : > { %s7800_s1 = sld [smem:[#allocation39_spill]] }
  0x1d   : > { %p6711_p8 = pneg %p6695_p6 }
  0x22   : > { %s6077_s17 = scalar_lea.hbm %s7800_s1, 64 }
  0x23   : > { %p6078_p7 = scmp.ne.s32.totalorder %s7800_s1, %s6077_s17  ;;  %p6084_p11 = scmp.lt.u32.totalorder %s6077_s17, %s7800_s1 }
  0x25   : > { %p6080_p9 = pnand %p6711_p8, %p6078_p7 }
  0x27   : > { %p6081_p10 = pneg %p6080_p9 }
  0x29   : > { %p6086_p12 = pnand %p6084_p11, %p6081_p10 }
  0x2b   : > { %6089 = shalt.err (!%p6086_p12)
}
  0x2c   : > { %s6090_s14 = scalar_lea.vmem %s372_s18, 64  ;;  %p6098_p5 = scmp.lt.s32.totalorder %s372_s18, %s372_s18 }
  0x2d   : > { %p6091_p13 = scmp.ne.s32.totalorder %s372_s18, %s6090_s14  ;;  %p6099_p4 = scmp.lt.s32.totalorder %s6090_s14, %s6090_s14 }
  0x2f   : > { %p6093_p0 = pnand %p6091_p13, %p6711_p8  ;;  %p6100_p3 = por %p6099_p4, %p6098_p5 }
  0x31   : > { %p6094_p2 = pneg %p6093_p0 }
  0x33   : > { %p6101_p1 = pnand %p6100_p3, %p6094_p2 }
  0x35   : > { %6104 = shalt.err (!%p6101_p1)
}
  0x36   : > { %5882 = dma.hbm_to_vmem [thread:$0]  (!%p6695_p6), %s7800_s1, 64, %s372_s18, [#allocation7]  }
  0x37   : > { %s7802_s3 = sld [smem:[#allocation40_spill]] }
  0x3d   : > { %s6105_s17 = scalar_lea.hbm %s7802_s3, 512 }
  0x3e   : > { %p6106_p7 = scmp.ne.s32.totalorder %s7802_s3, %s6105_s17  ;;  %p6112_p1 = scmp.lt.u32.totalorder %s6105_s17, %s7802_s3 }
  0x40   : > { %p6108_p9 = pnand %p6106_p7, %p6711_p8 }
  0x42   : > { %p6109_p4 = pneg %p6108_p9 }
  0x44   : > { %p6114_p3 = pnand %p6112_p1, %p6109_p4 }
  0x46   : > { %6117 = shalt.err (!%p6114_p3)
}
  0x47   : > { %s6118_s18 = scalar_lea.vmem %s6699_s20, 512  ;;  %p6126_p13 = scmp.lt.s32.totalorder %s6699_s20, %s6699_s20 }
  0x48   : > { %p6119_p10 = scmp.ne.s32.totalorder %s6699_s20, %s6118_s18  ;;  %p6127_p0 = scmp.lt.s32.totalorder %s6118_s18, %s6118_s18 }
  0x4a   : > { %p6121_p11 = pnand %p6119_p10, %p6711_p8  ;;  %p6128_p2 = por %p6127_p0, %p6126_p13 }
  0x4c   : > { %p6122_p12 = pneg %p6121_p11 }
  0x4e   : > { %p6129_p5 = pnand %p6128_p2, %p6122_p12 }
  0x50   : > { %6132 = shalt.err (!%p6129_p5)
}
  0x51   : > { %s6554_s0 = smov 64   ;;  %s6555_s15 = smov 4  }
  0x52   : > { %5888 = dma.hbm_to_vmem [thread:$0]  (!%p6695_p6), %s7802_s3, 512, %s6699_s20, [#allocation10], %s6554_s0, %s6554_s0, %s6555_s15  }
  0x53   : > { %s6133_s17 = scalar_lea.hbm %s7767_s5, 8192 }
  0x54   : > { %p6134_p7 = scmp.ne.s32.totalorder %s7767_s5, %s6133_s17  ;;  %p6140_p1 = scmp.lt.u32.totalorder %s6133_s17, %s7767_s5 }
  0x56   : > { %p6136_p9 = pnand %p6134_p7, %p6711_p8 }
  0x58   : > { %p6137_p4 = pneg %p6136_p9 }
  0x5a   : > { %p6142_p3 = pnand %p6140_p1, %p6137_p4 }
  0x5c   : > { %6145 = shalt.err (!%p6142_p3)
}
  0x5d   : > { %s6146_s13 = scalar_lea.vmem %s417_s23, 8192  ;;  %p6154_p13 = scmp.lt.s32.totalorder %s417_s23, %s417_s23 }
  0x5e   : > { %p6147_p10 = scmp.ne.s32.totalorder %s417_s23, %s6146_s13  ;;  %p6155_p0 = scmp.lt.s32.totalorder %s6146_s13, %s6146_s13 }
  0x60   : > { %p6149_p11 = pnand %p6147_p10, %p6711_p8  ;;  %p6156_p2 = por %p6155_p0, %p6154_p13 }
  0x62   : > { %p6150_p12 = pneg %p6149_p11 }
  0x64   : > { %p6157_p5 = pnand %p6156_p2, %p6150_p12 }
  0x66   : > { %6160 = shalt.err (!%p6157_p5)
}
  0x67   : > { %s6556_s20 = smov 512   ;;  %s6557_s0 = smov 32  }
  0x68   : > { %5894 = dma.hbm_to_vmem [thread:$0]  (!%p6695_p6), %s7767_s5, 8192, %s417_s23, [#allocation13], %s6556_s20, %s6556_s20, %s6557_s0  }
  0x69   : > { %s6558_s28 = smov [#allocation15]   ;;  %s6559_s24 = smov [#allocation18]  }
  0x6a   : > { %s440_s16 = sshll.u32 %s6558_s28, 4  ;;  %s464_s17 = sshll.u32 %s6559_s24, 4  ;;  %s441_s16 = int_to_ptr.vmem [resolvable:$true] %s440_s16  ;;  %s465_s17 = int_to_ptr.vmem [resolvable:$true] %s464_s17 }
  0x6b   : > { %s6161_s18 = scalar_lea.hbm %s7769_s7, 65536 }
  0x6c   : > { %p6162_p7 = scmp.ne.s32.totalorder %s7769_s7, %s6161_s18  ;;  %p6168_p1 = scmp.lt.u32.totalorder %s6161_s18, %s7769_s7 }
  0x6e   : > { %p6164_p9 = pnand %p6162_p7, %p6711_p8 }
  0x70   : > { %p6165_p4 = pneg %p6164_p9 }
  0x72   : > { %p6170_p3 = pnand %p6168_p1, %p6165_p4 }
  0x74   : > { %6173 = shalt.err (!%p6170_p3)
}
  0x75   : > { %s6174_s23 = scalar_lea.vmem %s441_s16, 65536  ;;  %p6182_p13 = scmp.lt.s32.totalorder %s441_s16, %s441_s16 }
  0x76   : > { %p6175_p10 = scmp.ne.s32.totalorder %s441_s16, %s6174_s23  ;;  %p6183_p0 = scmp.lt.s32.totalorder %s6174_s23, %s6174_s23 }
  0x78   : > { %p6177_p11 = pnand %p6175_p10, %p6711_p8  ;;  %p6184_p2 = por %p6183_p0, %p6182_p13 }
  0x7a   : > { %p6178_p12 = pneg %p6177_p11 }
  0x7c   : > { %p6185_p5 = pnand %p6184_p2, %p6178_p12 }
  0x7e   : > { %6188 = shalt.err (!%p6185_p5)
}
  0x7f   : > { %5900 = dma.hbm_to_vmem [thread:$0]  (!%p6695_p6), %s7769_s7, 65536, %s441_s16, [#allocation16], %s6556_s20, %s6556_s20, %s6557_s0  }
  0x80   : > { %s6189_s15 = scalar_lea.hbm %s7771_s9, 16384 }
  0x81   : > { %p6190_p7 = scmp.ne.s32.totalorder %s7771_s9, %s6189_s15  ;;  %p6196_p1 = scmp.lt.u32.totalorder %s6189_s15, %s7771_s9 }
  0x83   : > { %p6192_p9 = pnand %p6190_p7, %p6711_p8 }
  0x85   : > { %p6193_p4 = pneg %p6192_p9 }
  0x87   : > { %p6198_p3 = pnand %p6196_p1, %p6193_p4 }
  0x89   : > { %6201 = shalt.err (!%p6198_p3)
}
  0x8a   : > { %s6202_s18 = scalar_lea.vmem %s465_s17, 16384  ;;  %p6210_p13 = scmp.lt.s32.totalorder %s465_s17, %s465_s17 }
  0x8b   : > { %p6203_p10 = scmp.ne.s32.totalorder %s465_s17, %s6202_s18  ;;  %p6211_p0 = scmp.lt.s32.totalorder %s6202_s18, %s6202_s18 }
  0x8d   : > { %p6205_p11 = pnand %p6203_p10, %p6711_p8  ;;  %p6212_p2 = por %p6211_p0, %p6210_p13 }
  0x8f   : > { %p6206_p12 = pneg %p6205_p11 }
  0x91   : > { %p6213_p5 = pnand %p6212_p2, %p6206_p12 }
  0x93   : > { %6216 = shalt.err (!%p6213_p5)
}
  0x94   : > { %s6560_s20 = smov 256   ;;  %s6561_s0 = smov 16  }
  0x95   : > { %5906 = dma.hbm_to_vmem [thread:$0]  (!%p6695_p6), %s7771_s9, 16384, %s465_s17, [#allocation19], %s6560_s20, %s6560_s20, %s6561_s0  }
  0x96   : > { %s6562_s23 = smov [#allocation21]   ;;  %s6217_s26 = scalar_lea.hbm %s7773_s11, 4096 }
  0x97   : > { %s488_s3 = sshll.u32 %s6562_s23, 4  ;;  %p6218_p7 = scmp.ne.s32.totalorder %s7773_s11, %s6217_s26  ;;  %s489_s3 = int_to_ptr.vmem [resolvable:$true] %s488_s3 }
  0x98   : > { %p6224_p1 = scmp.lt.u32.totalorder %s6217_s26, %s7773_s11 }
  0x99   : > { %p6220_p9 = pnand %p6218_p7, %p6711_p8 }
  0x9b   : > { %p6221_p4 = pneg %p6220_p9 }
  0x9d   : > { %p6226_p3 = pnand %p6224_p1, %p6221_p4 }
  0x9f   : > { %6229 = shalt.err (!%p6226_p3)
}
  0xa0   : > { %s6230_s17 = scalar_lea.vmem %s489_s3, 4096  ;;  %p6238_p13 = scmp.lt.s32.totalorder %s489_s3, %s489_s3 }
  0xa1   : > { %p6231_p10 = scmp.ne.s32.totalorder %s489_s3, %s6230_s17  ;;  %p6239_p0 = scmp.lt.s32.totalorder %s6230_s17, %s6230_s17 }
  0xa3   : > { %p6233_p11 = pnand %p6231_p10, %p6711_p8  ;;  %p6240_p2 = por %p6239_p0, %p6238_p13 }
  0xa5   : > { %p6234_p12 = pneg %p6233_p11 }
  0xa7   : > { %p6241_p5 = pnand %p6240_p2, %p6234_p12 }
  0xa9   : > { %6244 = shalt.err (!%p6241_p5)
}
  0xaa   : > { %s7786_s14 = smov 128   ;;  %s6564_s18 = smov 8  }
  0xab   : > { %5912 = dma.hbm_to_vmem [thread:$0]  (!%p6695_p6), %s7773_s11, 4096, %s489_s3, [#allocation22], %s7786_s14, %s7786_s14, %s6564_s18  }
  0xac   : > { %s6565_s16 = smov [#allocation8]   ;;  %s6566_s23 = smov [#allocation11]  }
  0xad   : > { %s382_s13 = sshll.u32 %s6565_s16, 4  ;;  %s406_s1 = sshll.u32 %s6566_s23, 4  ;;  %s383_s13 = int_to_ptr.vmem [resolvable:$true] %s382_s13  ;;  %s6826_s1 = int_to_ptr.vmem [resolvable:$true] %s406_s1 }
  0xae   : > { %s6245_s15 = scalar_lea.hbm %s7764_s2, 16 }
  0xaf   : > { %p6246_p7 = scmp.ne.s32.totalorder %s7764_s2, %s6245_s15  ;;  %p6252_p1 = scmp.lt.u32.totalorder %s6245_s15, %s7764_s2 }
  0xb1   : > { %p6248_p9 = pnand %p6246_p7, %p6711_p8 }
  0xb3   : > { %p6249_p4 = pneg %p6248_p9 }
  0xb5   : > { %p6254_p3 = pnand %p6252_p1, %p6249_p4 }
  0xb7   : > { %6257 = shalt.err (!%p6254_p3)
}
  0xb8   : > { %s6258_s17 = scalar_lea.vmem %s383_s13, 16  ;;  %s6265_s20 = scalar_lea.vmem %s383_s13, 32 }
  0xb9   : > { %p6259_p10 = scmp.ne.s32.totalorder %s383_s13, %s6258_s17  ;;  %p6266_p13 = scmp.lt.s32.totalorder %s383_s13, %s383_s13 }
  0xba   : > { %p6267_p0 = scmp.lt.s32.totalorder %s6265_s20, %s6258_s17 }
  0xbb   : > { %p6261_p11 = pnand %p6259_p10, %p6711_p8 }
  0xbc   : > { %p6268_p2 = por %p6267_p0, %p6266_p13 }
  0xbd   : > { %p6262_p12 = pneg %p6261_p11 }
  0xbf   : > { %p6269_p5 = pnand %p6268_p2, %p6262_p12 }
  0xc1   : > { %6272 = shalt.err (!%p6269_p5)
}
  0xc2   : > { %5885 = dma.hbm_to_vmem [thread:$0]  (!%p6695_p6), %s7764_s2, 16, %s383_s13, [#allocation7]  }
  0xc3   : > { %s6273_s26 = scalar_lea.hbm %s7766_s4, 16 }
  0xc4   : > { %p6274_p7 = scmp.ne.s32.totalorder %s7766_s4, %s6273_s26  ;;  %p6280_p1 = scmp.lt.u32.totalorder %s6273_s26, %s7766_s4 }
  0xc6   : > { %p6276_p9 = pnand %p6274_p7, %p6711_p8 }
  0xc8   : > { %p6277_p4 = pneg %p6276_p9 }
  0xca   : > { %p6282_p3 = pnand %p6280_p1, %p6277_p4 }
  0xcc   : > { %6285 = shalt.err (!%p6282_p3)
}
  0xcd   : > { %s6286_s13 = scalar_lea.vmem %s6826_s1, 16  ;;  %s6293_s3 = scalar_lea.vmem %s6826_s1, 32 }
  0xce   : > { %p6287_p10 = scmp.ne.s32.totalorder %s6826_s1, %s6286_s13  ;;  %p6294_p13 = scmp.lt.s32.totalorder %s6826_s1, %s6826_s1 }
  0xcf   : > { %p6295_p0 = scmp.lt.s32.totalorder %s6293_s3, %s6286_s13 }
  0xd0   : > { %p6289_p11 = pnand %p6287_p10, %p6711_p8 }
  0xd1   : > { %p6296_p2 = por %p6295_p0, %p6294_p13 }
  0xd2   : > { %p6290_p12 = pneg %p6289_p11 }
  0xd4   : > { %p6297_p5 = pnand %p6296_p2, %p6290_p12 }
  0xd6   : > { %6300 = shalt.err (!%p6297_p5)
}
  0xd7   : > { %5891 = dma.hbm_to_vmem [thread:$0]  (!%p6695_p6), %s7766_s4, 16, %s6826_s1, [#allocation10]  }
  0xd8   : > { %s6567_s0 = smov [#allocation14]   ;;  %s6568_s23 = smov [#allocation17]  }
  0xd9   : > { %s430_s16 = sshll.u32 %s6567_s0, 4  ;;  %s454_s25 = sshll.u32 %s6568_s23, 4  ;;  %s431_s16 = int_to_ptr.vmem [resolvable:$true] %s430_s16  ;;  %s6870_s25 = int_to_ptr.vmem [resolvable:$true] %s454_s25 }
  0xda   : > { %s6301_s28 = scalar_lea.hbm %s7768_s6, 128 }
  0xdb   : > { %p6302_p7 = scmp.ne.s32.totalorder %s7768_s6, %s6301_s28  ;;  %p6308_p1 = scmp.lt.u32.totalorder %s6301_s28, %s7768_s6 }
  0xdd   : > { %p6304_p9 = pnand %p6302_p7, %p6711_p8 }
  0xdf   : > { %p6305_p4 = pneg %p6304_p9 }
  0xe1   : > { %p6310_p3 = pnand %p6308_p1, %p6305_p4 }
  0xe3   : > { %6313 = shalt.err (!%p6310_p3)
}
  0xe4   : > { %s6314_s3 = scalar_lea.vmem %s431_s16, 128  ;;  %p6322_p13 = scmp.lt.s32.totalorder %s431_s16, %s431_s16 }
  0xe5   : > { %p6315_p10 = scmp.ne.s32.totalorder %s431_s16, %s6314_s3  ;;  %p6323_p0 = scmp.lt.s32.totalorder %s6314_s3, %s6314_s3 }
  0xe7   : > { %p6317_p11 = pnand %p6315_p10, %p6711_p8  ;;  %p6324_p2 = por %p6323_p0, %p6322_p13 }
  0xe9   : > { %p6318_p12 = pneg %p6317_p11 }
  0xeb   : > { %p6325_p5 = pnand %p6324_p2, %p6318_p12 }
  0xed   : > { %6328 = shalt.err (!%p6325_p5)
}
  0xee   : > { %5897 = dma.hbm_to_vmem [thread:$0]  (!%p6695_p6), %s7768_s6, 128, %s431_s16, [#allocation13]  }
  0xef   : > { %s6329_s26 = scalar_lea.hbm %s7770_s8, 64 }
  0xf0   : > { %p6330_p7 = scmp.ne.s32.totalorder %s7770_s8, %s6329_s26  ;;  %p6336_p1 = scmp.lt.u32.totalorder %s6329_s26, %s7770_s8 }
  0xf2   : > { %p6332_p9 = pnand %p6330_p7, %p6711_p8 }
  0xf4   : > { %p6333_p4 = pneg %p6332_p9 }
  0xf6   : > { %p6338_p3 = pnand %p6336_p1, %p6333_p4 }
  0xf8   : > { %6341 = shalt.err (!%p6338_p3)
}
  0xf9   : > { %s6342_s16 = scalar_lea.vmem %s6870_s25, 64  ;;  %p6350_p13 = scmp.lt.s32.totalorder %s6870_s25, %s6870_s25 }
  0xfa   : > { %p6343_p10 = scmp.ne.s32.totalorder %s6870_s25, %s6342_s16  ;;  %p6351_p0 = scmp.lt.s32.totalorder %s6342_s16, %s6342_s16 }
  0xfc   : > { %p6345_p11 = pnand %p6343_p10, %p6711_p8  ;;  %p6352_p2 = por %p6351_p0, %p6350_p13 }
  0xfe   : > { %p6346_p12 = pneg %p6345_p11 }
 0x100   : > { %p6353_p5 = pnand %p6352_p2, %p6346_p12 }
 0x102   : > { %6356 = shalt.err (!%p6353_p5)
}
 0x103   : > { %5903 = dma.hbm_to_vmem [thread:$0]  (!%p6695_p6), %s7770_s8, 64, %s6870_s25, [#allocation16]  }
 0x104   : > { %s6569_s3 = smov [#allocation20]   ;;  %s6570_s20 = smov [#allocation23]  }
 0x105   : > { %s478_s17 = sshll.u32 %s6569_s3, 4  ;;  %s502_s0 = sshll.u32 %s6570_s20, 4  ;;  %s479_s17 = int_to_ptr.vmem [resolvable:$true] %s478_s17  ;;  %s6913_s0 = int_to_ptr.vmem [resolvable:$true] %s502_s0 }
 0x106   : > { %s6357_s15 = scalar_lea.hbm %s7772_s10, 32 }
 0x107   : > { %p6358_p7 = scmp.ne.s32.totalorder %s7772_s10, %s6357_s15  ;;  %p6364_p1 = scmp.lt.u32.totalorder %s6357_s15, %s7772_s10 }
 0x109   : > { %p6360_p9 = pnand %p6358_p7, %p6711_p8 }
 0x10b   : > { %p6361_p4 = pneg %p6360_p9 }
 0x10d   : > { %p6366_p3 = pnand %p6364_p1, %p6361_p4 }
 0x10f   : > { %6369 = shalt.err (!%p6366_p3)
}
 0x110   : > { %s6370_s16 = scalar_lea.vmem %s479_s17, 32  ;;  %p6378_p13 = scmp.lt.s32.totalorder %s479_s17, %s479_s17 }
 0x111   : > { %p6371_p10 = scmp.ne.s32.totalorder %s479_s17, %s6370_s16  ;;  %p6379_p0 = scmp.lt.s32.totalorder %s6370_s16, %s6370_s16 }
 0x113   : > { %p6373_p11 = pnand %p6371_p10, %p6711_p8  ;;  %p6380_p2 = por %p6379_p0, %p6378_p13 }
 0x115   : > { %p6374_p12 = pneg %p6373_p11 }
 0x117   : > { %p6381_p5 = pnand %p6380_p2, %p6374_p12 }
 0x119   : > { %6384 = shalt.err (!%p6381_p5)
}
 0x11a   : > { %5909 = dma.hbm_to_vmem [thread:$0]  (!%p6695_p6), %s7772_s10, 32, %s479_s17, [#allocation19]  }
 0x11b   : > { %s6385_s23 = scalar_lea.hbm %s7774_s12, 16 }
 0x11c   : > { %p6386_p7 = scmp.ne.s32.totalorder %s7774_s12, %s6385_s23  ;;  %p6392_p1 = scmp.lt.u32.totalorder %s6385_s23, %s7774_s12 }
 0x11e   : > { %p6388_p9 = pnand %p6386_p7, %p6711_p8 }
 0x120   : > { %p6389_p4 = pneg %p6388_p9 }
 0x122   : > { %p6394_p3 = pnand %p6392_p1, %p6389_p4 }
 0x124   : > { %6397 = shalt.err (!%p6394_p3)
}
 0x125   : > { %s6398_s17 = scalar_lea.vmem %s6913_s0, 16  ;;  %s6405_s22 = scalar_lea.vmem %s6913_s0, 32 }
 0x126   : > { %p6399_p10 = scmp.ne.s32.totalorder %s6913_s0, %s6398_s17  ;;  %p6406_p13 = scmp.lt.s32.totalorder %s6913_s0, %s6913_s0 }
 0x127   : > { %p6407_p0 = scmp.lt.s32.totalorder %s6405_s22, %s6398_s17 }
 0x128   : > { %p6401_p11 = pnand %p6399_p10, %p6711_p8 }
 0x129   : > { %p6408_p2 = por %p6407_p0, %p6406_p13 }
 0x12a   : > { %p6402_p12 = pneg %p6401_p11 }
 0x12c   : > { %p6409_p5 = pnand %p6408_p2, %p6402_p12 }
 0x12e   : > { %6412 = shalt.err (!%p6409_p5)
}
 0x12f   : > { %s7803_s13 = sld [smem:[#allocation34_spill]]  ;;  %s7804_s19 = sld [smem:[#allocation33_spill]] }
 0x130   : > { %s7805_s1 = sld [smem:[#allocation36_spill]]  ;;  %s4918_s3 = sadd.s32 4294967294, %s6549_s30  }
 0x131   : > { %5915 = dma.hbm_to_vmem [thread:$0]  (!%p6695_p6), %s7774_s12, 16, %s6913_s0, [#allocation22]  }
 0x132   : > { %s47_s20 = sadd.s32 1, %s6545_s29  ;;  %s56_s21 = sadd.s32 1, %s6537_s27 }
 0x133   : > { %p49_p8 = scmp.ge.s32.totalorder %s47_s20, 2  ;;  %p64_p9 = scmp.eq.s32.totalorder %s6549_s30, 0 }
 0x134   : > { %s7807_s26 = sadd.s32 4294967295, %s6549_s30   ;;  %p351_p13 = scmp.eq.s32.totalorder %s4918_s3, 1 }
 0x135   : > { %p63_p7 = scmp.ne.s32.totalorder %s6537_s27, %s7803_s13  ;;  %s7832_s20 = smov (%p49_p8, %s47_s20), 0 }
 0x136   : > { %p69_p1 = scmp.ne.s32.totalorder %s7803_s13, %s7804_s19  ;;  %s51_s0 = ssub.s32 %s6545_s29, %s7832_s20 }
 0x137   : > { %p6965_p4 = por %p64_p9, %p63_p7  ;;  %p345_p6 = scmp.eq.s32.totalorder %s7807_s26, 1 }
 0x138   : > { %p54_p3 = scmp.eq.s32.totalorder %s51_s0, 0  ;;  %p7808_p10 = scmp.ne.s32.totalorder %s7805_s1, 0 }
 0x139   : > { %p6981_p12 = por %p345_p6, %p63_p7  ;;  %p6988_p0 = por %p351_p13, %p69_p1 }
 0x13a   : > { %p6977_p11 = por %p7808_p10, %p69_p1  ;;  %p5936_p2 = scmp.lt.s32.totalorder %s6549_s30, 2 }
 0x13b   : > { %s7810_s28 = scalar_select %p6981_p12, 1, 0 }
 0x13c   : > { %s6986_s24 = scalar_select %p54_p3, %s6537_s27, %s56_s21  }
 0x13d   : > { %s7811_s17 = scalar_select %p6988_p0, 1, 0 }
 0x13e   : > { %s513_s22 = sand.u32 1, %s6537_s27   ;;  %s5039_s25 = sshll.u32 %s6545_s29, 12 }
 0x13f   : > { %s4933_s16 = sshll.u32 %s513_s22, 8  ;;  %s7812_s1 = sld [smem:[#allocation38_spill]] }
 0x140   : > { %s517_s3 = scalar_lea.vmem [#allocation3], %s4933_s16  ;;  %p7002_p5 = pnand %p5936_p2, %p6965_p4 }
 0x141   : > { %s526_s21 = sshll.u32 %s517_s3, 4  ;;  %s7008_s14 = scalar_lea.sflag [#allocation4], %s513_s22  ;;  %s7006_s21 = int_to_ptr.vmem [resolvable:$true] %s526_s21 }
 0x142   : > { %p6415_p7 = pneg %p7002_p5 }
 0x145   : > { %s6998_s0 = scalar_lea.hbm %s7812_s1, %s5039_s25  ;;  %s6418_s16 = scalar_lea.hbm %s7812_s1, 8192 }
 0x146   : > { %s6413_s13 = scalar_lea.hbm %s6998_s0, 4096  ;;  %p6419_p4 = scmp.lt.u32.totalorder %s6998_s0, %s7812_s1 }
 0x147   : > { %p6414_p8 = scmp.ne.s32.totalorder %s6998_s0, %s6413_s13  ;;  %p6420_p6 = scmp.lt.u32.totalorder %s6418_s16, %s6413_s13 }
 0x148   : > { %p6422_p10 = scmp.lt.u32.totalorder %s6413_s13, %s6998_s0 }
 0x149   : > { %p6416_p9 = pnand %p6415_p7, %p6414_p8  ;;  %p6421_p3 = por %p6420_p6, %p6419_p4 }
 0x14b   : > { %p6417_p1 = pneg %p6416_p9  ;;  %p6423_p13 = por %p6422_p10, %p6421_p3 }
 0x14d   : > { %p6424_p2 = pnand %p6423_p13, %p6417_p1 }
 0x14f   : > { %6427 = shalt.err (!%p6424_p2)
}
 0x150   : > { %s6428_s22 = scalar_lea.vmem %s7006_s21, 4096  ;;  %s6571_s25 = smov [#allocation3]  }
 0x151   : > { %p6429_p8 = scmp.ne.s32.totalorder %s7006_s21, %s6428_s22  ;;  %s6433_s23 = sshll.u32 %s6571_s25, 4  ;;  %s6434_s23 = int_to_ptr.vmem [resolvable:$false] %s6433_s23 }
 0x152   : > { %s6435_s19 = scalar_lea.vmem %s6434_s23, 8192  ;;  %p6436_p12 = scmp.lt.s32.totalorder %s7006_s21, %s6434_s23 }
 0x153   : > { %p6431_p9 = pnand %p6429_p8, %p6415_p7  ;;  %p6437_p4 = scmp.lt.s32.totalorder %s6435_s19, %s6428_s22 }
 0x155   : > { %p6432_p0 = pneg %p6431_p9  ;;  %p6438_p6 = por %p6437_p4, %p6436_p12 }
 0x157   : > { %p6439_p3 = pnand %p6438_p6, %p6432_p0 }
 0x159   : > { %6442 = shalt.err (!%p6439_p3)
}
 0x15a   : > { %s7814_s13 = smov 128   ;;  %s7815_s16 = sld [smem:[#allocation37_spill]] }
 0x15b   : > { %5919 = dma.hbm_to_vmem [thread:$0]  (!%p7002_p5), %s6998_s0, 4096, %s7006_s21, %s7008_s14, %s7814_s13, %s7814_s13, %s6564_s18  }
 0x160   : > { %p7816_p7 = scmp.ne.s32.totalorder %s7815_s16, 0 }
 0x161   : > { %s7817_s3 = sld [smem:[#allocation34_spill]] (!%p7816_p7) }
 0x162   : > { %538 = sbr.rel (%p7816_p7) target bundleno = 2633 (0xa49), region = 72 }
 0x167   : > { %s7042_s25 = sand.u32 (!%p7816_p7), 1, %s7817_s3  }
 0x168   : > { %s4937_s22 = sshll.u32 (!%p7816_p7), %s7042_s25, 8  ;;  %s541_s23 = scalar_lea.sflag (!%p7816_p7), [#allocation4], %s7042_s25 }
 0x169   : > { %s7046_s19 = scalar_lea.vmem [#allocation3], %s4937_s22 }
 0x16a   : > { %6496 = dma.done.wait (%p6977_p11), %s541_s23, 4096  }
 0x16b   : > { %6498 = vsyncadd (%p6977_p11), %s541_s23, 4294963200  ;;  %s7818_s26 = sld [smem:[#allocation36_spill]] }
 0x171   : > { %p7819_p12 = scmp.ne.s32.totalorder %s7818_s26, 0 }
 0x173   : > { %6500 = dma.done.wait (%p7819_p12), [#allocation7], 80  }
 0x174   : > { %6502 = vsyncadd (%p7819_p12), [#allocation7], 4294967216 }
 0x175   : > { %6504 = dma.done.wait (%p7819_p12), [#allocation10], 528  }
 0x176   : > { %6506 = vsyncadd (%p7819_p12), [#allocation10], 4294966768 }
 0x177   : > { %6508 = dma.done.wait (%p7819_p12), [#allocation13], 8320  }
 0x178   : > { %6510 = vsyncadd (%p7819_p12), [#allocation13], 4294958976 }
 0x179   : > { %6512 = dma.done.wait (%p7819_p12), [#allocation16], 65600  }
 0x17a   : > { %6514 = vsyncadd (%p7819_p12), [#allocation16], 4294901696 }
 0x17b   : > { %6516 = dma.done.wait (%p7819_p12), [#allocation19], 16416  }
 0x17c   : > { %6518 = vsyncadd (%p7819_p12), [#allocation19], 4294950880 }
 0x17d   : > { %6520 = dma.done.wait (%p7819_p12), [#allocation22], 4112  }
 0x17e   : > { %6522 = vsyncadd (%p7819_p12), [#allocation22], 4294963184  ;;  %v6572_v0 = vmov 1   ;;  %v6573_v1 = vmov 0   ;;  %v643_v2 = vld [vmem:[%s7046_s19 + $0x10] sm:$0xff]  ;;  %v641_v3 = vld [vmem:[%s7046_s19] sm:$0xff]  ;;  %v834_v37 = vlaneseq }
 0x17f   : > { %6024 = vset.pattern.permute.xlu0 %v6572_v0  ;;  %6022 = vset.pattern.permute.xlu1 %v6572_v0  ;;  %v642_v4 = vld [vmem:[%s7046_s19 + $0x8] sm:$0xff]  ;;  %v6574_v5 = vmov 2   ;;  %v645_v6 = vld [vmem:[%s7046_s19 + $0x20] sm:$0xff]  ;;  %v644_v7 = vld [vmem:[%s7046_s19 + $0x18] sm:$0xff]  ;;  %vm1388_vm0 = vcmask 523264   ;;  %s7820_s14 = sld [smem:[#allocation35_spill]] }
 0x180   : > { %2062 = vmatprep.mubr.bf16.mxu1 %v6573_v1  ;;  %879 = vperm.xlu0 %6024, %v643_v2   ;;  %v648_v8 = vld [vmem:[%s7046_s19 + $0x38] sm:$0xff]  ;;  %v650_v9 = vld [vmem:[%s7046_s19 + $0x48] sm:$0xff]  ;;  %v651_v15 = vld [vmem:[%s7046_s19 + $0x50] sm:$0xff]  ;;  %v7167_v41 = vshrl.u32 %v834_v37, 7  ;;  %vm4699_vm1 = vcmask 1040384   ;;  %s633_s15 = scalar_lea.vmem [#allocation24], %s7042_s25 }
 0x181   : > { %871 = vperm.xlu1 %6022, %v641_v3   ;;  %v6069_v10 = vld [vmem:[#allocation9] sm:$0xff]   ;;  %v6070_v11 = vld [vmem:[#allocation9 + $0x8] sm:$0xff]   ;;  %v6071_v13 = vld [vmem:[#allocation9 + $0x10] sm:$0xff]   ;;  %s4726_s0 = sshll.u32 %s633_s15, 4  ;;  %s7821_s16 = sld [smem:[#allocation41_spill]]  ;;  %s7715_s0 = int_to_ptr.vmem [resolvable:$true] %s4726_s0 }
 0x182   : > { %5095 = vmatprep.subr.bf16.mxu0 %v6069_v10  ;;  %v646_v12 = vld [vmem:[%s7046_s19 + $0x28] sm:$0xff]  ;;  %v6072_v14 = vld [vmem:[#allocation9 + $0x18] sm:$0xff]   ;;  %v647_v16 = vld [vmem:[%s7046_s19 + $0x30] sm:$0xff]  ;;  %v7177_v45 = vsub.s32 1, %v7167_v41  ;;  %v7181_v47 = vsub.s32 2, %v7167_v41  ;;  %v7184_v48 = vsub.s32 0, %v7167_v41 }
 0x183   : > { %5096 = vmatpush3.bf16.msra.mxu0 %v6069_v10  ;;  %v653_v17 = vld [vmem:[%s7046_s19 + $0x60] sm:$0xff]  ;;  %v7099_v18 = vld [vmem:[%s7046_s19 + $0x88] sm:$0xff]  ;;  %v7104_v19 = vld [vmem:[%s7046_s19 + $0x90] sm:$0xff]  ;;  %s4714_s22 = scalar_lea.sflag [#allocation5], %s7042_s25  ;;  %s6443_s23 = scalar_lea.vmem %s7715_s0, 16 }
 0x184   : > { %6027 = vset.pattern.permute.xlu0 %v6574_v5  ;;  %5097 = vmatprep.subr.bf16.mxu0 %v6070_v11  ;;  %v649_v20 = vld [vmem:[%s7046_s19 + $0x40] sm:$0xff]  ;;  %v654_v21 = vld [vmem:[%s7046_s19 + $0x68] sm:$0xff]  ;;  %v655_v22 = vld [vmem:[%s7046_s19 + $0x70] sm:$0xff]  ;;  %p6444_p11 = scmp.ne.s32.totalorder %s7715_s0, %s6443_s23  ;;  %p7822_p0 = scmp.ne.s32.totalorder %s7810_s28, 0 }
 0x185   : > { %875 = vperm.xlu1 %6022, %v642_v4   ;;  %1071 = vperm.xlu0 %6027, %v642_v4   ;;  %v652_v23 = vld [vmem:[%s7046_s19 + $0x58] sm:$0xff]  ;;  %v7118_v24 = vld [vmem:[%s7046_s19 + $0xa8] sm:$0xff]  ;;  %v7123_v25 = vld [vmem:[%s7046_s19 + $0xb0] sm:$0xff]  ;;  %s5036_s18 = sshll.u32 %s7820_s14, 4 }
 0x186   : > { %v656_v26 = vld [vmem:[%s7046_s19 + $0x78] sm:$0xff]  ;;  %v7132_v27 = vld [vmem:[%s7046_s19 + $0xa0] sm:$0xff]  ;;  %v7141_v29 = vld [vmem:[%s7046_s19 + $0xc8] sm:$0xff]  ;;  %p6445_p5 = pnand %p6444_p11, %p7822_p0 }
 0x187   : > { %5098 = vmatpush3.bf16.msra.mxu0 %v6070_v11  ;;  %v7136_v28 = vld [vmem:[%s7046_s19 + $0xb8] sm:$0xff]  ;;  %v7150_v30 = vld [vmem:[%s7046_s19 + $0xd0] sm:$0xff]  ;;  %v7155_v31 = vld [vmem:[%s7046_s19 + $0xe0] sm:$0xff]  ;;  %s7713_s3 = scalar_lea.hbm %s7821_s16, %s5036_s18 }
 0x188   : > { %5099 = vmatprep.subr.bf16.mxu0 %v6071_v13  ;;  %v657_v36 = vld [vmem:[%s7046_s19 + $0x80] sm:$0xff]  ;;  %v7163_v38 = vld [vmem:[%s7046_s19 + $0xe8] sm:$0xff]  ;;  %v7172_v42 = vld [vmem:[%s7046_s19 + $0xf0] sm:$0xff]  ;;  %p6446_p1 = pneg %p6445_p5 }
 0x189   : > { %6023 = vset.pattern.permute.xlu1 %v6573_v1  ;;  %1083 = vperm.xlu0 %6027, %v645_v6   ;;  %v673_v46 = vld [vmem:[#allocation6] sm:$0x7]  ;;  %v660_v52 = vld [vmem:[%s7046_s19 + $0x98] sm:$0xff] }
 0x18a   : > { %691 = vperm.xlu1 %6023, %v644_v7   ;;  %v7190_v50 = vrot.slane %v673_v46, %v7177_v45  ;;  %v7196_v53 = vrot.slane %v673_v46, %v7181_v47  ;;  %v7199_v54 = vrot.slane %v673_v46, %v7184_v48  ;;  %v7205_v59 = vld [vmem:[%s7046_s19 + $0xf8] sm:$0xff] }
 0x18b   : > { %5100 = vmatpush3.bf16.msra.mxu0 %v6071_v13 }
 0x18c   : > { %5101 = vmatprep.subr.bf16.mxu0 %v6072_v14 }
 0x18d   : > { %1095 = vperm.xlu0 %6027, %v648_v8  }
 0x18e   : > { %6025 = vset.pattern.permute.xlu1 %v6572_v0 }
 0x18f   : > { %883 = vperm.xlu1 %6025, %v644_v7   ;;  %5102 = vmatpush3.bf16.msra.mxu0 %v6072_v14 }
 0x191   : > { %1103 = vperm.xlu0 %6027, %v650_v9  }
 0x193   : > { %6026 = vset.pattern.permute.xlu1 %v6574_v5 }
 0x194   : > { %1067 = vperm.xlu1 %6026, %v641_v3  }
 0x195   : > { %6038 = vset.pattern.permute.xlu0 %v6573_v1 }
 0x196   : > { %676 = vperm.xlu0 %6038, %v641_v3  }
 0x198   : > { %1075 = vperm.xlu1 %6026, %v643_v2  }
 0x19a   : > { %681 = vperm.xlu0 %6038, %v642_v4  }
 0x19c   : > { %1079 = vperm.xlu1 %6026, %v644_v7  }
 0x19e   : > { %686 = vperm.xlu0 %6038, %v643_v2  }
 0x1a0   : > { %6028 = vset.pattern.permute.xlu1 %v6573_v1 }
 0x1a1   : > { %701 = vperm.xlu1 %6028, %v646_v12  }
 0x1a2   : > { %696 = vperm.xlu0 %6038, %v645_v6  }
 0x1a5   : > { %6029 = vset.pattern.permute.xlu1 %v6572_v0 }
 0x1a6   : > { %887 = vperm.xlu1 %6029, %v645_v6   ;;  %721 = vperm.xlu0 %6038, %v650_v9  }
 0x1aa   : > { %6030 = vset.pattern.permute.xlu1 %v6573_v1  ;;  %726 = vperm.xlu0 %6038, %v651_v15  }
 0x1ab   : > { %706 = vperm.xlu1 %6030, %v647_v16  }
 0x1ae   : > { %736 = vperm.xlu0 %6038, %v653_v17  }
 0x1af   : > { %711 = vperm.xlu1 %6030, %v648_v8  }
 0x1b2   : > { %761 = vperm.xlu0 %6038, %v7099_v18  }
 0x1b3   : > { %6031 = vset.pattern.permute.xlu1 %v6572_v0 }
 0x1b4   : > { %899 = vperm.xlu1 %6031, %v648_v8  }
 0x1b6   : > { %766 = vperm.xlu0 %6038, %v7104_v19  }
 0x1b8   : > { %6032 = vset.pattern.permute.xlu1 %v6574_v5 }
 0x1b9   : > { %1087 = vperm.xlu1 %6032, %v646_v12  }
 0x1ba   : > { %6046 = vset.pattern.permute.xlu0 %v6572_v0 }
 0x1bb   : > { %891 = vperm.xlu0 %6046, %v646_v12  }
 0x1bd   : > { %1091 = vperm.xlu1 %6032, %v647_v16  }
 0x1bf   : > { %895 = vperm.xlu0 %6046, %v647_v16  }
 0x1c1   : > { %6033 = vset.pattern.permute.xlu1 %v6573_v1 }
 0x1c2   : > { %716 = vperm.xlu1 %6033, %v649_v20  }
 0x1c3   : > { %911 = vperm.xlu0 %6046, %v651_v15  }
 0x1c6   : > { %6034 = vset.pattern.permute.xlu1 %v6572_v0 }
 0x1c7   : > { %903 = vperm.xlu1 %6034, %v649_v20   ;;  %923 = vperm.xlu0 %6046, %v654_v21  }
 0x1cb   : > { %907 = vperm.xlu1 %6034, %v650_v9   ;;  %927 = vperm.xlu0 %6046, %v655_v22   ;;  %v7215_v9 = vld [vmem:[#allocation8] ss:$0 sm:$0xff] }
 0x1cf   : > { %6035 = vset.pattern.permute.xlu1 %v6573_v1  ;;  %943 = vperm.xlu0 %6046, %v7104_v19  }
 0x1d0   : > { %731 = vperm.xlu1 %6035, %v652_v23  }
 0x1d3   : > { %955 = vperm.xlu0 %6046, %v7118_v24  }
 0x1d4   : > { %6036 = vset.pattern.permute.xlu1 %v6572_v0 }
 0x1d5   : > { %915 = vperm.xlu1 %6036, %v652_v23  }
 0x1d7   : > { %959 = vperm.xlu0 %6046, %v7123_v25  }
 0x1d9   : > { %6037 = vset.pattern.permute.xlu1 %v6574_v5 }
 0x1da   : > { %1099 = vperm.xlu1 %6037, %v649_v20  }
 0x1db   : > { %6053 = vset.pattern.permute.xlu0 %v6574_v5 }
 0x1dc   : > { %1115 = vperm.xlu0 %6053, %v653_v17  }
 0x1de   : > { %1107 = vperm.xlu1 %6037, %v651_v15  }
 0x1e0   : > { %1127 = vperm.xlu0 %6053, %v656_v26  }
 0x1e2   : > { %1111 = vperm.xlu1 %6037, %v652_v23  }
 0x1e4   : > { %1135 = vperm.xlu0 %6053, %v7099_v18  }
 0x1e6   : > { %6039 = vset.pattern.permute.xlu1 %v6573_v1 }
 0x1e7   : > { %741 = vperm.xlu1 %6039, %v654_v21  }
 0x1e8   : > { %1147 = vperm.xlu0 %6053, %v7132_v27  }
 0x1eb   : > { %6040 = vset.pattern.permute.xlu1 %v6572_v0 }
 0x1ec   : > { %919 = vperm.xlu1 %6040, %v653_v17   ;;  %1159 = vperm.xlu0 %6053, %v7136_v28  }
 0x1f0   : > { %6041 = vset.pattern.permute.xlu1 %v6573_v1  ;;  %1167 = vperm.xlu0 %6053, %v7141_v29  }
 0x1f1   : > { %746 = vperm.xlu1 %6041, %v655_v22  }
 0x1f4   : > { %6061 = vset.pattern.permute.xlu0 %v6573_v1 }
 0x1f5   : > { %751 = vperm.xlu1 %6041, %v656_v26   ;;  %776 = vperm.xlu0 %6061, %v7132_v27  }
 0x1f9   : > { %6042 = vset.pattern.permute.xlu1 %v6572_v0  ;;  %801 = vperm.xlu0 %6061, %v7141_v29  }
 0x1fa   : > { %931 = vperm.xlu1 %6042, %v656_v26  }
 0x1fd   : > { %806 = vperm.xlu0 %6061, %v7150_v30  }
 0x1fe   : > { %6043 = vset.pattern.permute.xlu1 %v6574_v5 }
 0x1ff   : > { %1119 = vperm.xlu1 %6043, %v654_v21   ;;  %v880_v33 = vpop.permute.xlu0 %879 }
 0x200   : > { %v872_v32 = vpop.permute.xlu1 %871  ;;  %v1004_v11 = vmul.f32 %v7190_v50, %v880_v33 }
 0x201   : > { %816 = vperm.xlu0 %6061, %v7155_v31   ;;  %v1002_v56 = vmul.f32 %v7190_v50, %v872_v32 }
 0x203   : > { %1123 = vperm.xlu1 %6043, %v655_v22  }
 0x204   : > { %v876_v34 = vpop.permute.xlu1 %875  ;;  %v1072_v35 = vpop.permute.xlu0 %1071 }
 0x205   : > { %6062 = vset.pattern.permute.xlu0 %v6572_v0  ;;  %v1003_v63 = vmul.f32 %v7190_v50, %v876_v34  ;;  %v1199_v3 = vmul.f32 %v7196_v53, %v1072_v35 }
 0x206   : > { %975 = vperm.xlu0 %6062, %v7150_v30  }
 0x207   : > { %6044 = vset.pattern.permute.xlu1 %v6573_v1 }
 0x208   : > { %756 = vperm.xlu1 %6044, %v657_v36   ;;  %v7165_v40 = vpop.permute.xlu0 %1083 }
 0x209   : > { %v692_v39 = vpop.permute.xlu1 %691 }
 0x20a   : > { %987 = vperm.xlu0 %6062, %v7163_v38   ;;  %v841_v4 = vmul.f32 %v7199_v54, %v692_v39 }
 0x20c   : > { %6045 = vset.pattern.permute.xlu1 %v6572_v0  ;;  %v7174_v43 = vpop.permute.xlu0 %1095 }
 0x20d   : > { %935 = vperm.xlu1 %6045, %v657_v36  }
 0x20e   : > { %v884_v44 = vpop.permute.xlu1 %883  ;;  %991 = vperm.xlu0 %6062, %v7172_v42  }
 0x20f   : > { %v1005_v60 = vmul.f32 %v7190_v50, %v884_v44 }
 0x210   : > { %v7187_v49 = vpop.permute.xlu0 %1103 }
 0x211   : > { %939 = vperm.xlu1 %6045, %v7099_v18   ;;  %v1037_v12 = vadd.f32 %v1005_v60, %v841_v4 }
 0x212   : > { %6067 = vset.pattern.permute.xlu0 %v6574_v5 }
 0x213   : > { %v1068_v51 = vpop.permute.xlu1 %1067  ;;  %1179 = vperm.xlu0 %6067, %v7155_v31  }
 0x214   : > { %v1198_v61 = vmul.f32 %v7196_v53, %v1068_v51 }
 0x215   : > { %6047 = vset.pattern.permute.xlu1 %v6573_v1  ;;  %v677_v55 = vpop.permute.xlu0 %676 }
 0x216   : > { %771 = vperm.xlu1 %6047, %v660_v52   ;;  %v838_v57 = vmul.f32 %v7199_v54, %v677_v55 }
 0x217   : > { %v1076_v58 = vpop.permute.xlu1 %1075  ;;  %1191 = vperm.xlu0 %6067, %v7205_v59  }
 0x218   : > { %v1034_v62 = vadd.f32 %v1002_v56, %v838_v57  ;;  %v1200_v21 = vmul.f32 %v7196_v53, %v1076_v58 }
 0x219   : > { %v682_v2 = vpop.permute.xlu0 %681 }
 0x21a   : > { %6048 = vset.pattern.permute.xlu1 %v6572_v0  ;;  %v1230_v6 = vadd.f32 %v1198_v61, %v1034_v62  ;;  %v839_v7 = vmul.f32 %v7199_v54, %v682_v2  ;;  %v1202_v2 = vmul.f32 %v7196_v53, %v7165_v40 }
 0x21b   : > { %947 = vperm.xlu1 %6048, %v660_v52   ;;  %v1080_v8 = vpop.permute.xlu1 %1079 }
 0x21c   : > { %v1201_v10 = vmul.f32 %v7196_v53, %v1080_v8  ;;  %v1035_v13 = vadd.f32 %v1003_v63, %v839_v7  ;;  %v1269_v18 = vadd.f32 %v7215_v9, %v1230_v6  ;;  %v1205_v7 = vmul.f32 %v7196_v53, %v7174_v43 }
 0x21d   : > { %v687_v14 = vpop.permute.xlu0 %686 }
 0x21e   : > { %v1231_v15 = vadd.f32 %v1199_v3, %v1035_v13  ;;  %v1233_v16 = vadd.f32 %v1201_v10, %v1037_v12  ;;  %v840_v17 = vmul.f32 %v7199_v54, %v687_v14  ;;  %v1301_v34 = vmax.f32 %v1269_v18, 0.0 }
 0x21f   : > { %6049 = vset.pattern.permute.xlu1 %v6574_v5 }
 0x220   : > { %1131 = vperm.xlu1 %6049, %v657_v36   ;;  %v702_v20 = vpop.permute.xlu1 %701  ;;  %v1036_v22 = vadd.f32 %v1004_v11, %v840_v17  ;;  %v1270_v23 = vadd.f32 %v7215_v9, %v1231_v15  ;;  %v1272_v32 = vadd.f32 %v7215_v9, %v1233_v16 }
 0x221   : > { %v697_v26 = vpop.permute.xlu0 %696  ;;  %v843_v10 = vmul.f32 %v7199_v54, %v702_v20 }
 0x222   : > { %v1232_v33 = vadd.f32 %v1200_v21, %v1036_v22  ;;  %v1302_v35 = vmax.f32 %v1270_v23, 0.0  ;;  %v1304_v46 = vmax.f32 %v1272_v32, 0.0  ;;  %v842_v61 = vmul.f32 %v7199_v54, %v697_v26 }
 0x224   : > { %1139 = vperm.xlu1 %6049, %v7104_v19   ;;  %v1271_v37 = vadd.f32 %v7215_v9, %v1232_v33  ;;  %v1333_v44 = vpack.c.bf16 %v1302_v35, %v1301_v34 }
 0x225   : > { %v888_v39 = vpop.permute.xlu1 %887  ;;  %v7227_v36 = vpop.permute.xlu0 %721 }
 0x226   : > { %v1303_v51 = vmax.f32 %v1271_v37, 0.0  ;;  %5103 = vmatprep.mubr.msk.bf16.mxu0 %vm1388_vm0, %v1333_v44  ;;  %v1006_v62 = vmul.f32 %v7190_v50, %v888_v39 }
 0x228   : > { %1143 = vperm.xlu1 %6049, %v660_v52   ;;  %v1334_v55 = vpack.c.bf16 %v1304_v46, %v1303_v51  ;;  %v1038_v3 = vadd.f32 %v1006_v62, %v842_v61 }
 0x229   : > { %v7230_v57 = vpop.permute.xlu0 %726 }
 0x22a   : > { %v707_v56 = vpop.permute.xlu1 %706  ;;  %5104 = vmatmul.mubr.msk.bf16.vlgmr.msra.gmra.mrb[0].mxu0 %vm1388_vm0, %v1334_v55  ;;  %v1234_v11 = vadd.f32 %v1202_v2, %v1038_v3 }
 0x22b   : > { %v844_v16 = vmul.f32 %v7199_v54, %v707_v56 }
 0x22c   : > { %6050 = vset.pattern.permute.xlu1 %v6573_v1  ;;  %v1273_v43 = vadd.f32 %v7215_v9, %v1234_v11  ;;  %v668_v11 = vld [vmem:[%s7046_s19 + $0xd8] sm:$0xff] }
 0x22d   : > { %781 = vperm.xlu1 %6050, %v7118_v24   ;;  %v7235_v58 = vpop.permute.xlu0 %736 }
 0x22e   : > { %v712_v19 = vpop.permute.xlu1 %711  ;;  %v1305_v33 = vmax.f32 %v1273_v43, 0.0 }
 0x22f   : > { %v845_v6 = vmul.f32 %v7199_v54, %v712_v19  ;;  %v665_v19 = vld [vmem:[%s7046_s19 + $0xc0] sm:$0xff]  ;;  %s6576_s19 = smov [#allocation24]  }
 0x230   : > { %s6447_s26 = sshll.u32 %s6576_s19, 4  ;;  %s6448_s26 = int_to_ptr.vmem [resolvable:$false] %s6447_s26 }
 0x231   : > { %6051 = vset.pattern.permute.xlu1 %v6572_v0  ;;  %v7239_v60 = vpop.permute.xlu0 %761  ;;  %s6449_s14 = scalar_lea.vmem %s6448_s26, 32  ;;  %p6450_p10 = scmp.lt.s32.totalorder %s7715_s0, %s6448_s26 }
 0x232   : > { %951 = vperm.xlu1 %6051, %v7132_v27   ;;  %p6451_p13 = scmp.lt.s32.totalorder %s6449_s14, %s6443_s23 }
 0x233   : > { %v900_v52 = vpop.permute.xlu1 %899 }
 0x234   : > { %v1009_v4 = vmul.f32 %v7190_v50, %v900_v52  ;;  %p6452_p2 = por %p6451_p13, %p6450_p10 }
 0x235   : > { %v7244_v63 = vpop.permute.xlu0 %766 }
 0x236   : > { %6052 = vset.pattern.permute.xlu1 %v6573_v1  ;;  %v1041_v12 = vadd.f32 %v1009_v4, %v845_v6  ;;  %p6453_p8 = pnand %p6452_p2, %p6446_p1 }
 0x237   : > { %786 = vperm.xlu1 %6052, %v7123_v25  }
 0x238   : > { %v1088_v27 = vpop.permute.xlu1 %1087  ;;  %v1237_v18 = vadd.f32 %v1205_v7, %v1041_v12 }
 0x239   : > { %v1203_v40 = vmul.f32 %v7196_v53, %v1088_v27  ;;  %v848_v27 = vmul.f32 %v7199_v54, %v7230_v57 }
 0x23a   : > { %v892_v8 = vpop.permute.xlu0 %891  ;;  %v1276_v34 = vadd.f32 %v7215_v9, %v1237_v18 }
 0x23b   : > { %791 = vperm.xlu1 %6052, %v7136_v28   ;;  %v1007_v13 = vmul.f32 %v7190_v50, %v892_v8 }
 0x23c   : > { %v1092_v14 = vpop.permute.xlu1 %1091  ;;  %v1308_v46 = vmax.f32 %v1276_v34, 0.0 }
 0x23d   : > { %v1039_v15 = vadd.f32 %v1007_v13, %v843_v10  ;;  %v1204_v26 = vmul.f32 %v7196_v53, %v1092_v14 }
 0x23e   : > { %v896_v17 = vpop.permute.xlu0 %895 }
 0x23f   : > { %6054 = vset.pattern.permute.xlu1 %v6572_v0  ;;  %v1235_v21 = vadd.f32 %v1203_v40, %v1039_v15  ;;  %v1008_v22 = vmul.f32 %v7190_v50, %v896_v17 }
 0x240   : > { %963 = vperm.xlu1 %6054, %v7136_v28  }
 0x241   : > { %v717_v20 = vpop.permute.xlu1 %716  ;;  %v1274_v23 = vadd.f32 %v7215_v9, %v1235_v21  ;;  %v1040_v32 = vadd.f32 %v1008_v22, %v844_v16 }
 0x242   : > { %v912_v62 = vpop.permute.xlu0 %911 }
 0x243   : > { %v1306_v35 = vmax.f32 %v1274_v23, 0.0  ;;  %v1236_v37 = vadd.f32 %v1204_v26, %v1040_v32  ;;  %v1012_v7 = vmul.f32 %v7190_v50, %v912_v62 }
 0x244   : > { %6055 = vset.pattern.permute.xlu1 %v6574_v5 }
 0x245   : > { %1151 = vperm.xlu1 %6055, %v7118_v24   ;;  %v1275_v39 = vadd.f32 %v7215_v9, %v1236_v37  ;;  %v1335_v28 = vpack.c.bf16 %v1306_v35, %v1305_v33  ;;  %v847_v24 = vmul.f32 %v7199_v54, %v7227_v36  ;;  %v846_v36 = vmul.f32 %v7199_v54, %v717_v20  ;;  %v1646_v37 = vld [vmem:[#allocation12] sm:$0xff] }
 0x246   : > { %v904_v44 = vpop.permute.xlu1 %903  ;;  %v7285_v8 = vpop.permute.xlu0 %923 }
 0x247   : > { %v1307_v51 = vmax.f32 %v1275_v39, 0.0  ;;  %5107 = vmatprep.mubr.msk.bf16.mxu0 %vm1388_vm0, %v1335_v28  ;;  %v1010_v4 = vmul.f32 %v7190_v50, %v904_v44  ;;  %v1650_v39 = vld [vmem:[#allocation12 + $0x20] sm:$0xff] }
 0x249   : > { %1155 = vperm.xlu1 %6055, %v7123_v25   ;;  %v1336_v56 = vpack.c.bf16 %v1308_v46, %v1307_v51  ;;  %v1207_v25 = vmul.f32 %v7196_v53, %v7187_v49  ;;  %v1042_v12 = vadd.f32 %v1010_v4, %v846_v36  ;;  %v4973_v46 = vcombine.high %v1646_v37, %v1650_v39  ;;  %v1666_v4 = vld [vmem:[#allocation12 + $0xa0] sm:$0xff] }
 0x24a   : > { %v908_v55 = vpop.permute.xlu1 %907  ;;  %v7293_v16 = vpop.permute.xlu0 %927  ;;  %v4972_v51 = vcombine.low %v1646_v37, %v1650_v39 }
 0x24b   : > { %5108 = vmatmul.mubr.msk.bf16.gmra.mrb[4].mxu0 %vm1388_vm0, %v1336_v56  ;;  %v1011_v61 = vmul.f32 %v7190_v50, %v908_v55  ;;  %2030 = vmatprep.subr.bf16.mxu1 %v4973_v46  ;;  %v1694_v46 = vld [vmem:[#allocation12 + $0x180] sm:$0xff] }
 0x24c   : > { %2031 = vmatpush1.bf16.msra.mxu1 %v4972_v51  ;;  %v1698_v51 = vld [vmem:[#allocation12 + $0x1a0] sm:$0xff] }
 0x24d   : > { %6056 = vset.pattern.permute.xlu1 %v6573_v1  ;;  %v1043_v2 = vadd.f32 %v1011_v61, %v847_v24  ;;  %v1658_v24 = vld [vmem:[#allocation12 + $0x60] sm:$0xff] }
 0x24e   : > { %796 = vperm.xlu1 %6056, %v665_v19   ;;  %v7300_v34 = vpop.permute.xlu0 %943 }
 0x24f   : > { %v732_v52 = vpop.permute.xlu1 %731  ;;  %v1239_v6 = vadd.f32 %v1207_v25, %v1043_v2 }
 0x250   : > { %v849_v18 = vmul.f32 %v7199_v54, %v732_v52  ;;  %v1654_v52 = vld [vmem:[#allocation12 + $0x40] sm:$0xff] }
 0x251   : > { %v1278_v13 = vadd.f32 %v7215_v9, %v1239_v6  ;;  %v4981_v25 = vcombine.high %v1654_v52, %v1658_v24 }
 0x252   : > { %6057 = vset.pattern.permute.xlu1 %v6572_v0  ;;  %v7305_v62 = vpop.permute.xlu0 %955 }
 0x253   : > { %967 = vperm.xlu1 %6057, %v665_v19   ;;  %v1310_v43 = vmax.f32 %v1278_v13, 0.0  ;;  %2032 = vmatprep.subr.bf16.mxu1 %v4981_v25 }
 0x254   : > { %v916_v3 = vpop.permute.xlu1 %915 }
 0x255   : > { %v1013_v40 = vmul.f32 %v7190_v50, %v916_v3  ;;  %v4980_v3 = vcombine.low %v1654_v52, %v1658_v24  ;;  %v1647_v52 = vld [vmem:[#allocation12 + $0x8] sm:$0xff] }
 0x256   : > { %v7309_v6 = vpop.permute.xlu0 %959  ;;  %v1651_v24 = vld [vmem:[#allocation12 + $0x28] sm:$0xff] }
 0x257   : > { %971 = vperm.xlu1 %6057, %v7141_v29   ;;  %v1044_v29 = vadd.f32 %v1012_v7, %v848_v27  ;;  %v1045_v23 = vadd.f32 %v1013_v40, %v849_v18  ;;  %2033 = vmatpush1.bf16.msra.mxu1 %v4980_v3  ;;  %v4975_v3 = vcombine.high %v1647_v52, %v1651_v24 }
 0x259   : > { %v1100_v10 = vpop.permute.xlu1 %1099  ;;  %2223 = vmatprep.subr.bf16.mxu0 %v4975_v3 }
 0x25a   : > { %v1206_v49 = vmul.f32 %v7196_v53, %v1100_v10  ;;  %v1670_v10 = vld [vmem:[#allocation12 + $0xc0] sm:$0xff] }
 0x25b   : > { %6058 = vset.pattern.permute.xlu1 %v6573_v1  ;;  %v1116_v40 = vpop.permute.xlu0 %1115 }
 0x25c   : > { %v1238_v14 = vadd.f32 %v1206_v49, %v1042_v12  ;;  %811 = vperm.xlu1 %6058, %v668_v11   ;;  %v1674_v12 = vld [vmem:[#allocation12 + $0xe0] sm:$0xff]  ;;  %v1210_v18 = vmul.f32 %v7196_v53, %v1116_v40 }
 0x25d   : > { %v1108_v57 = vpop.permute.xlu1 %1107  ;;  %v4996_v49 = vcombine.low %v1670_v10, %v1674_v12 }
 0x25e   : > { %v1277_v15 = vadd.f32 %v7215_v9, %v1238_v14  ;;  %v1208_v17 = vmul.f32 %v7196_v53, %v1108_v57  ;;  %v1678_v14 = vld [vmem:[#allocation12 + $0x100] sm:$0xff] }
 0x25f   : > { %v1682_v57 = vld [vmem:[#allocation12 + $0x120] sm:$0xff] }
 0x260   : > { %v1309_v21 = vmax.f32 %v1277_v15, 0.0  ;;  %v1240_v22 = vadd.f32 %v1208_v17, %v1044_v29  ;;  %6059 = vset.pattern.permute.xlu1 %v6572_v0  ;;  %v5005_v15 = vcombine.high %v1678_v14, %v1682_v57  ;;  %v5004_v17 = vcombine.low %v1678_v14, %v1682_v57 }
 0x261   : > { %979 = vperm.xlu1 %6059, %v668_v11   ;;  %v1112_v20 = vpop.permute.xlu1 %1111 }
 0x262   : > { %v1337_v26 = vpack.c.bf16 %v1310_v43, %v1309_v21  ;;  %v1209_v32 = vmul.f32 %v7196_v53, %v1112_v20  ;;  %v1279_v33 = vadd.f32 %v7215_v9, %v1240_v22  ;;  %v1686_v22 = vld [vmem:[#allocation12 + $0x140] sm:$0xff] }
 0x264   : > { %v1241_v35 = vadd.f32 %v1209_v32, %v1045_v23  ;;  %5111 = vmatprep.mubr.msk.bf16.mxu0 %vm1388_vm0, %v1337_v26  ;;  %v1311_v55 = vmax.f32 %v1279_v33, 0.0  ;;  %v1128_v23 = vpop.permute.xlu0 %1127  ;;  %v1015_v32 = vmul.f32 %v7190_v50, %v7285_v8  ;;  %v1016_v8 = vmul.f32 %v7190_v50, %v7293_v16  ;;  %v1702_v16 = vld [vmem:[#allocation12 + $0x1c0] sm:$0xff] }
 0x265   : > { %6060 = vset.pattern.permute.xlu1 %v6574_v5 }
 0x266   : > { %v1280_v44 = vadd.f32 %v7215_v9, %v1241_v35  ;;  %1163 = vperm.xlu1 %6060, %v665_v19   ;;  %v742_v28 = vpop.permute.xlu1 %741  ;;  %v1662_v19 = vld [vmem:[#allocation12 + $0x80] sm:$0xff] }
 0x267   : > { %v4989_v27 = vcombine.high %v1662_v19, %v1666_v4  ;;  %v4988_v36 = vcombine.low %v1662_v19, %v1666_v4  ;;  %v851_v33 = vmul.f32 %v7199_v54, %v742_v28  ;;  %v4974_v19 = vcombine.low %v1647_v52, %v1651_v24 }
 0x268   : > { %v1312_v56 = vmax.f32 %v1280_v44, 0.0  ;;  %v1213_v44 = vmul.f32 %v7196_v53, %v1128_v23  ;;  %v1136_v3 = vpop.permute.xlu0 %1135 }
 0x269   : > { %2034 = vmatprep.subr.bf16.mxu1 %v4989_v27  ;;  %2224 = vmatpush1.bf16.msra.mxu0 %v4974_v19 }
 0x26a   : > { %v1338_v61 = vpack.c.bf16 %v1312_v56, %v1311_v55  ;;  %1171 = vperm.xlu1 %6060, %v7150_v30   ;;  %2035 = vmatpush1.bf16.msra.mxu1 %v4988_v36  ;;  %v4997_v30 = vcombine.high %v1670_v10, %v1674_v12  ;;  %v5021_v56 = vcombine.high %v1694_v46, %v1698_v51 }
 0x26b   : > { %v920_v2 = vpop.permute.xlu1 %919 }
 0x26c   : > { %5112 = vmatmul.mubr.msk.bf16.gmra.mrb[8].mxu0 %vm1388_vm0, %v1338_v61  ;;  %2036 = vmatprep.subr.bf16.mxu1 %v4997_v30  ;;  %v1014_v29 = vmul.f32 %v7190_v50, %v920_v2  ;;  %v1047_v61 = vadd.f32 %v1015_v32, %v851_v33  ;;  %v5020_v2 = vcombine.low %v1694_v46, %v1698_v51  ;;  %v1679_v46 = vld [vmem:[#allocation12 + $0x108] sm:$0xff] }
 0x26d   : > { %v1683_v51 = vld [vmem:[#allocation12 + $0x128] sm:$0xff] }
 0x26e   : > { %1175 = vperm.xlu1 %6060, %v668_v11   ;;  %v850_v11 = vmul.f32 %v7199_v54, %v7235_v58  ;;  %2037 = vmatpush1.bf16.msra.mxu1 %v4996_v49  ;;  %v1690_v58 = vld [vmem:[#allocation12 + $0x160] sm:$0xff]  ;;  %v1655_v49 = vld [vmem:[#allocation12 + $0x48] sm:$0xff] }
 0x26f   : > { %2038 = vmatprep.subr.bf16.mxu1 %v5005_v15  ;;  %v5013_v26 = vcombine.high %v1686_v22, %v1690_v58 }
 0x270   : > { %v747_v7 = vpop.permute.xlu1 %746  ;;  %v1046_v43 = vadd.f32 %v1014_v29, %v850_v11 }
 0x271   : > { %v852_v28 = vmul.f32 %v7199_v54, %v747_v7  ;;  %v1706_v7 = vld [vmem:[#allocation12 + $0x1e0] sm:$0xff] }
 0x272   : > { %6063 = vset.pattern.permute.xlu1 %v6573_v1  ;;  %2039 = vmatpush1.bf16.msra.mxu1 %v5004_v17  ;;  %v1242_v37 = vadd.f32 %v1210_v18, %v1046_v43  ;;  %v5029_v30 = vcombine.high %v1702_v16, %v1706_v7  ;;  %v5028_v14 = vcombine.low %v1702_v16, %v1706_v7 }
 0x273   : > { %821 = vperm.xlu1 %6063, %v7163_v38   ;;  %2040 = vmatprep.subr.bf16.mxu1 %v5013_v26  ;;  %v1048_v10 = vadd.f32 %v1016_v8, %v852_v28  ;;  %v5007_v8 = vcombine.high %v1679_v46, %v1683_v51  ;;  %v1215_v7 = vmul.f32 %v7196_v53, %v1136_v3 }
 0x274   : > { %v752_v13 = vpop.permute.xlu1 %751  ;;  %v1281_v4 = vadd.f32 %v7215_v9, %v1242_v37 }
 0x275   : > { %v853_v35 = vmul.f32 %v7199_v54, %v752_v13  ;;  %v1659_v13 = vld [vmem:[#allocation12 + $0x68] sm:$0xff] }
 0x276   : > { %v4983_v57 = vcombine.high %v1655_v49, %v1659_v13  ;;  %v4982_v40 = vcombine.low %v1655_v49, %v1659_v13  ;;  %v1313_v15 = vmax.f32 %v1281_v4, 0.0 }
 0x277   : > { %6064 = vset.pattern.permute.xlu1 %v6572_v0 }
 0x278   : > { %983 = vperm.xlu1 %6064, %v7155_v31   ;;  %v5012_v31 = vcombine.low %v1686_v22, %v1690_v58  ;;  %2225 = vmatprep.subr.bf16.mxu0 %v4983_v57  ;;  %v1667_v22 = vld [vmem:[#allocation12 + $0xa8] sm:$0xff] }
 0x279   : > { %v932_v21 = vpop.permute.xlu1 %931  ;;  %2226 = vmatpush1.bf16.msra.mxu0 %v4982_v40 }
 0x27a   : > { %v1017_v20 = vmul.f32 %v7190_v50, %v932_v21  ;;  %2041 = vmatpush1.bf16.msra.mxu1 %v5012_v31  ;;  %v1663_v21 = vld [vmem:[#allocation12 + $0x88] sm:$0xff] }
 0x27b   : > { %2042 = vmatprep.subr.bf16.mxu1 %v5021_v56  ;;  %v4991_v26 = vcombine.high %v1663_v21, %v1667_v22  ;;  %v4990_v32 = vcombine.low %v1663_v21, %v1667_v22  ;;  %v1675_v31 = vld [vmem:[#allocation12 + $0xe8] sm:$0xff] }
 0x27c   : > { %6065 = vset.pattern.permute.xlu1 %v6573_v1  ;;  %v1049_v39 = vadd.f32 %v1017_v20, %v853_v35  ;;  %v1691_v56 = vld [vmem:[#allocation12 + $0x168] sm:$0xff] }
 0x27d   : > { %826 = vperm.xlu1 %6065, %v7172_v42   ;;  %2227 = vmatprep.subr.bf16.mxu0 %v4991_v26 }
 0x27e   : > { %v1120_v55 = vpop.permute.xlu1 %1119  ;;  %v1245_v27 = vadd.f32 %v1213_v44, %v1049_v39  ;;  %2043 = vmatpush1.bf16.msra.mxu1 %v5020_v2  ;;  %2228 = vmatpush1.bf16.msra.mxu0 %v4990_v32  ;;  %v1699_v2 = vld [vmem:[#allocation12 + $0x1a8] sm:$0xff] }
 0x27f   : > { %v1211_v25 = vmul.f32 %v7196_v53, %v1120_v55  ;;  %2044 = vmatprep.subr.bf16.mxu1 %v5029_v30  ;;  %v1687_v55 = vld [vmem:[#allocation12 + $0x148] sm:$0xff] }
 0x280   : > { %v1284_v17 = vadd.f32 %v7215_v9, %v1245_v27  ;;  %v5014_v52 = vcombine.low %v1687_v55, %v1691_v56  ;;  %v1703_v27 = vld [vmem:[#allocation12 + $0x1c8] sm:$0xff] }
 0x281   : > { %v1243_v36 = vadd.f32 %v1211_v25, %v1047_v61  ;;  %831 = vperm.xlu1 %6065, %v7205_v59   ;;  %v1695_v25 = vld [vmem:[#allocation12 + $0x188] sm:$0xff] }
 0x282   : > { %v1124_v12 = vpop.permute.xlu1 %1123  ;;  %2045 = vmatpush1.bf16.msra.mxu1 %v5028_v14  ;;  %v1316_v33 = vmax.f32 %v1284_v17, 0.0  ;;  %v5023_v19 = vcombine.high %v1695_v25, %v1699_v2  ;;  %v5022_v4 = vcombine.low %v1695_v25, %v1699_v2  ;;  %v1020_v14 = vmul.f32 %v7190_v50, %v7300_v34  ;;  %v1148_v34 = vpop.permute.xlu0 %1147 }
 0x283   : > { %v1282_v11 = vadd.f32 %v7215_v9, %v1243_v36  ;;  %v1212_v29 = vmul.f32 %v7196_v53, %v1124_v12  ;;  %v1707_v36 = vld [vmem:[#allocation12 + $0x1e8] sm:$0xff] }
 0x284   : > { %v5031_v12 = vcombine.high %v1703_v27, %v1707_v36  ;;  %v5030_v30 = vcombine.low %v1703_v27, %v1707_v36 }
 0x285   : > { %v1314_v43 = vmax.f32 %v1282_v11, 0.0  ;;  %v1244_v18 = vadd.f32 %v1212_v29, %v1048_v10  ;;  %6066 = vset.pattern.permute.xlu1 %v6572_v0  ;;  %v1671_v0 = vld [vmem:[#allocation12 + $0xc8] sm:$0xff] }
 0x286   : > { %995 = vperm.xlu1 %6066, %v7205_v59   ;;  %v4999_v37 = vcombine.high %v1671_v0, %v1675_v31  ;;  %v4998_v44 = vcombine.low %v1671_v0, %v1675_v31 }
 0x287   : > { %v1339_v58 = vpack.c.bf16 %v1314_v43, %v1313_v15  ;;  %v1283_v20 = vadd.f32 %v7215_v9, %v1244_v18  ;;  %v757_v23 = vpop.permute.xlu1 %756 }
 0x288   : > { %2229 = vmatprep.subr.bf16.mxu0 %v4999_v37  ;;  %v854_v13 = vmul.f32 %v7199_v54, %v757_v23 }
 0x289   : > { %v1315_v35 = vmax.f32 %v1283_v20, 0.0  ;;  %5115 = vmatprep.mubr.msk.bf16.mxu0 %vm1388_vm0, %v1339_v58  ;;  %2230 = vmatpush1.bf16.msra.mxu0 %v4998_v44 }
 0x28a   : > { %6068 = vset.pattern.permute.xlu1 %v6574_v5  ;;  %v5006_v5 = vcombine.low %v1679_v46, %v1683_v51  ;;  %2231 = vmatprep.subr.bf16.mxu0 %v5007_v8 }
 0x28b   : > { %v1340_v59 = vpack.c.bf16 %v1316_v33, %v1315_v35  ;;  %1183 = vperm.xlu1 %6068, %v7163_v38   ;;  %v5015_v38 = vcombine.high %v1687_v55, %v1691_v56 }
 0x28c   : > { %v936_v39 = vpop.permute.xlu1 %935 }
 0x28d   : > { %5116 = vmatmul.mubr.msk.bf16.gmra.mrb[12].mxu0 %vm1388_vm0, %v1340_v59  ;;  %v1018_v49 = vmul.f32 %v7190_v50, %v936_v39  ;;  %v1160_v39 = vpop.permute.xlu0 %1159 }
 0x28e   : > { %2232 = vmatpush1.bf16.msra.mxu0 %v5006_v5  ;;  %v1221_v27 = vmul.f32 %v7196_v53, %v1160_v39 }
 0x28f   : > { %1187 = vperm.xlu1 %6068, %v7172_v42   ;;  %2233 = vmatprep.subr.bf16.mxu0 %v5015_v38  ;;  %v855_v42 = vmul.f32 %v7199_v54, %v7239_v60  ;;  %v856_v60 = vmul.f32 %v7199_v54, %v7244_v63  ;;  %v1050_v57 = vadd.f32 %v1018_v49, %v854_v13 }
 0x290   : > { %v940_v28 = vpop.permute.xlu1 %939  ;;  %v1024_v49 = vmul.f32 %v7190_v50, %v7309_v6 }
 0x291   : > { %v1019_v61 = vmul.f32 %v7190_v50, %v940_v28  ;;  %v1052_v18 = vadd.f32 %v1020_v14, %v856_v60  ;;  %v1168_v5 = vpop.permute.xlu0 %1167 }
 0x292   : > { %2234 = vmatpush1.bf16.msra.mxu0 %v5014_v52  ;;  %v1223_v39 = vmul.f32 %v7196_v53, %v1168_v5 }
 0x293   : > { %2235 = vmatprep.subr.bf16.mxu0 %v5023_v19  ;;  %v1051_v16 = vadd.f32 %v1019_v61, %v855_v42  ;;  %v1218_v61 = vmul.f32 %v7196_v53, %v1148_v34 }
 0x295   : > { %v772_v24 = vpop.permute.xlu1 %771  ;;  %v1247_v11 = vadd.f32 %v1215_v7, %v1051_v16  ;;  %v777_v56 = vpop.permute.xlu0 %776 }
 0x296   : > { %2236 = vmatpush1.bf16.msra.mxu0 %v5022_v4  ;;  %v857_v63 = vmul.f32 %v7199_v54, %v772_v24  ;;  %v858_v52 = vmul.f32 %v7199_v54, %v777_v56  ;;  %v1023_v4 = vmul.f32 %v7190_v50, %v7305_v62 }
 0x297   : > { %2237 = vmatprep.subr.bf16.mxu0 %v5031_v12  ;;  %v1286_v15 = vadd.f32 %v7215_v9, %v1247_v11 }
 0x299   : > { %v1318_v20 = vmax.f32 %v1286_v15, 0.0 }
 0x29a   : > { %v948_v10 = vpop.permute.xlu1 %947  ;;  %2238 = vmatpush1.bf16.msra.mxu0 %v5030_v30 }
 0x29b   : > { %v1021_v21 = vmul.f32 %v7190_v50, %v948_v10 }
 0x29d   : > { %v1053_v33 = vadd.f32 %v1021_v21, %v857_v63  ;;  %v802_v63 = vpop.permute.xlu0 %801 }
 0x29f   : > { %v1132_v29 = vpop.permute.xlu1 %1131 }
 0x2a0   : > { %v1214_v40 = vmul.f32 %v7196_v53, %v1132_v29 }
 0x2a2   : > { %v1246_v17 = vadd.f32 %v1214_v40, %v1050_v57 }
 0x2a3   : > { %v1140_v43 = vpop.permute.xlu1 %1139 }
 0x2a4   : > { %v1285_v22 = vadd.f32 %v7215_v9, %v1246_v17  ;;  %v1216_v58 = vmul.f32 %v7196_v53, %v1140_v43 }
 0x2a6   : > { %v1317_v23 = vmax.f32 %v1285_v22, 0.0  ;;  %v1248_v26 = vadd.f32 %v1216_v58, %v1052_v18 }
 0x2a7   : > { %v1144_v32 = vpop.permute.xlu1 %1143 }
 0x2a8   : > { %v1341_v35 = vpack.c.bf16 %v1318_v20, %v1317_v23  ;;  %v1217_v0 = vmul.f32 %v7196_v53, %v1144_v32  ;;  %v1287_v31 = vadd.f32 %v7215_v9, %v1248_v26  ;;  %v807_v26 = vpop.permute.xlu0 %806 }
 0x2aa   : > { %v1249_v59 = vadd.f32 %v1217_v0, %v1053_v33  ;;  %5119 = vmatprep.mubr.msk.bf16.mxu0 %vm1388_vm0, %v1341_v35  ;;  %v1319_v46 = vmax.f32 %v1287_v31, 0.0  ;;  %v863_v35 = vmul.f32 %v7199_v54, %v802_v63 }
 0x2ac   : > { %v1288_v37 = vadd.f32 %v7215_v9, %v1249_v59  ;;  %v782_v44 = vpop.permute.xlu1 %781  ;;  %v817_v33 = vpop.permute.xlu0 %816 }
 0x2ad   : > { %v859_v19 = vmul.f32 %v7199_v54, %v782_v44 }
 0x2ae   : > { %v1320_v51 = vmax.f32 %v1288_v37, 0.0 }
 0x2af   : > { %v1055_v10 = vadd.f32 %v1023_v4, %v859_v19 }
 0x2b0   : > { %v1342_v8 = vpack.c.bf16 %v1320_v51, %v1319_v46  ;;  %v976_v37 = vpop.permute.xlu0 %975 }
 0x2b1   : > { %v952_v28 = vpop.permute.xlu1 %951 }
 0x2b2   : > { %5120 = vmatmul.mubr.msk.bf16.gmra.mrb[16].mxu0 %vm1388_vm0, %v1342_v8  ;;  %v1022_v24 = vmul.f32 %v7190_v50, %v952_v28  ;;  %v864_v8 = vmul.f32 %v7199_v54, %v807_v26  ;;  %v1028_v28 = vmul.f32 %v7190_v50, %v976_v37 }
 0x2b4   : > { %v1054_v25 = vadd.f32 %v1022_v24, %v858_v52 }
 0x2b6   : > { %v787_v55 = vpop.permute.xlu1 %786  ;;  %v1250_v36 = vadd.f32 %v1218_v61, %v1054_v25  ;;  %v1060_v61 = vadd.f32 %v1028_v28, %v864_v8 }
 0x2b7   : > { %v860_v12 = vmul.f32 %v7199_v54, %v787_v55 }
 0x2b8   : > { %v1289_v13 = vadd.f32 %v7215_v9, %v1250_v36 }
 0x2b9   : > { %v1056_v14 = vadd.f32 %v1024_v49, %v860_v12 }
 0x2ba   : > { %v792_v38 = vpop.permute.xlu1 %791  ;;  %v1321_v40 = vmax.f32 %v1289_v13, 0.0 }
 0x2bb   : > { %v861_v42 = vmul.f32 %v7199_v54, %v792_v38 }
 0x2bf   : > { %v964_v2 = vpop.permute.xlu1 %963 }
 0x2c0   : > { %v1025_v3 = vmul.f32 %v7190_v50, %v964_v2 }
 0x2c2   : > { %v1057_v16 = vadd.f32 %v1025_v3, %v861_v42 }
 0x2c4   : > { %v1152_v7 = vpop.permute.xlu1 %1151  ;;  %v1253_v11 = vadd.f32 %v1221_v27, %v1057_v16 }
 0x2c5   : > { %v1219_v30 = vmul.f32 %v7196_v53, %v1152_v7 }
 0x2c6   : > { %v1292_v15 = vadd.f32 %v7215_v9, %v1253_v11 }
 0x2c7   : > { %v1251_v29 = vadd.f32 %v1219_v30, %v1055_v10 }
 0x2c8   : > { %v1156_v60 = vpop.permute.xlu1 %1155  ;;  %v1324_v6 = vmax.f32 %v1292_v15, 0.0  ;;  %v7403_v15 = vld [vmem:[#allocation11] ss:$0 sm:$0xff] }
 0x2c9   : > { %v1290_v62 = vadd.f32 %v7215_v9, %v1251_v29  ;;  %v1220_v57 = vmul.f32 %v7196_v53, %v1156_v60  ;;  %v988_v60 = vpop.permute.xlu0 %987 }
 0x2ca   : > { %v1031_v28 = vmul.f32 %v7190_v50, %v988_v60  ;;  %v1660_v60 = vld [vmem:[#allocation12 + $0x70] sm:$0xff] }
 0x2cb   : > { %v1322_v17 = vmax.f32 %v1290_v62, 0.0  ;;  %v1252_v43 = vadd.f32 %v1220_v57, %v1056_v14 }
 0x2cd   : > { %v1343_v18 = vpack.c.bf16 %v1322_v17, %v1321_v40  ;;  %v1291_v21 = vadd.f32 %v7215_v9, %v1252_v43  ;;  %v797_v22 = vpop.permute.xlu1 %796  ;;  %v992_v57 = vpop.permute.xlu0 %991 }
 0x2ce   : > { %v862_v46 = vmul.f32 %v7199_v54, %v797_v22 }
 0x2cf   : > { %v1323_v58 = vmax.f32 %v1291_v21, 0.0  ;;  %5123 = vmatprep.mubr.msk.bf16.mxu0 %vm1388_vm0, %v1343_v18 }
 0x2d1   : > { %v1344_v20 = vpack.c.bf16 %v1324_v6, %v1323_v58 }
 0x2d2   : > { %v968_v23 = vpop.permute.xlu1 %967 }
 0x2d3   : > { %5124 = vmatmul.mubr.msk.bf16.gmra.mrb[20].mxu0 %vm1388_vm0, %v1344_v20  ;;  %v1026_v44 = vmul.f32 %v7190_v50, %v968_v23  ;;  %v1180_v20 = vpop.permute.xlu0 %1179 }
 0x2d4   : > { %v1226_v37 = vmul.f32 %v7196_v53, %v1180_v20 }
 0x2d5   : > { %v1058_v56 = vadd.f32 %v1026_v44, %v862_v46 }
 0x2d6   : > { %v972_v34 = vpop.permute.xlu1 %971 }
 0x2d7   : > { %v1027_v0 = vmul.f32 %v7190_v50, %v972_v34  ;;  %v866_v34 = vmul.f32 %v7199_v54, %v817_v33  ;;  %v1192_v46 = vpop.permute.xlu0 %1191 }
 0x2d9   : > { %v1059_v31 = vadd.f32 %v1027_v0, %v863_v35 }
 0x2db   : > { %v812_v32 = vpop.permute.xlu1 %811  ;;  %v1255_v51 = vadd.f32 %v1223_v39, %v1059_v31 }
 0x2dc   : > { %v865_v42 = vmul.f32 %v7199_v54, %v812_v32 }
 0x2dd   : > { %v1294_v52 = vadd.f32 %v7215_v9, %v1255_v51 }
 0x2df   : > { %v1326_v19 = vmax.f32 %v1294_v52, 0.0  ;;  %v1652_v52 = vld [vmem:[#allocation12 + $0x30] sm:$0xff] }
 0x2e0   : > { %v980_v59 = vpop.permute.xlu1 %979 }
 0x2e1   : > { %v1029_v5 = vmul.f32 %v7190_v50, %v980_v59 }
 0x2e3   : > { %v1061_v16 = vadd.f32 %v1029_v5, %v865_v42 }
 0x2e5   : > { %v1164_v55 = vpop.permute.xlu1 %1163 }
 0x2e6   : > { %v1222_v38 = vmul.f32 %v7196_v53, %v1164_v55 }
 0x2e8   : > { %v1254_v24 = vadd.f32 %v1222_v38, %v1058_v56  ;;  %v1229_v56 = vmul.f32 %v7196_v53, %v1192_v46  ;;  %v1648_v38 = vld [vmem:[#allocation12 + $0x10] sm:$0xff] }
 0x2e9   : > { %v1172_v25 = vpop.permute.xlu1 %1171  ;;  %v4976_v5 = vcombine.low %v1648_v38, %v1652_v52 }
 0x2ea   : > { %v1293_v2 = vadd.f32 %v7215_v9, %v1254_v24  ;;  %v1224_v3 = vmul.f32 %v7196_v53, %v1172_v25  ;;  %v7422_v24 = vld [vmem:[#allocation12 + $0x18] sm:$0xff] }
 0x2ec   : > { %v1325_v4 = vmax.f32 %v1293_v2, 0.0  ;;  %v1256_v27 = vadd.f32 %v1224_v3, %v1060_v61  ;;  %v4977_v2 = vcombine.high %v1648_v38, %v1652_v52  ;;  %v1653_v3 = vld [vmem:[#allocation12 + $0x38] sm:$0xff] }
 0x2ed   : > { %v1176_v36 = vpop.permute.xlu1 %1175  ;;  %v4979_v42 = vcombine.high %v7422_v24, %v1653_v3 }
 0x2ee   : > { %v1345_v7 = vpack.c.bf16 %v1326_v19, %v1325_v4  ;;  %v1225_v10 = vmul.f32 %v7196_v53, %v1176_v36  ;;  %v1295_v12 = vadd.f32 %v7215_v9, %v1256_v27  ;;  %v1032_v27 = vmul.f32 %v7190_v50, %v992_v57  ;;  %2416 = vmatprep.subr.bf16.mxu1 %v4977_v2  ;;  %v1676_v2 = vld [vmem:[#allocation12 + $0xf0] sm:$0xff] }
 0x2ef   : > { %2609 = vmatprep.subr.bf16.mxu0 %v4979_v42 }
 0x2f0   : > { %v1257_v30 = vadd.f32 %v1225_v10, %v1061_v16  ;;  %5127 = vmatprep.mubr.msk.bf16.mxu0 %vm1388_vm0, %v1345_v7  ;;  %v1327_v11 = vmax.f32 %v1295_v12, 0.0 }
 0x2f2   : > { %v1296_v49 = vadd.f32 %v7215_v9, %v1257_v30  ;;  %v822_v13 = vpop.permute.xlu1 %821 }
 0x2f3   : > { %v867_v55 = vmul.f32 %v7199_v54, %v822_v13 }
 0x2f4   : > { %v1328_v29 = vmax.f32 %v1296_v49, 0.0 }
 0x2f5   : > { %v1063_v4 = vadd.f32 %v1031_v28, %v867_v55 }
 0x2f6   : > { %v1346_v14 = vpack.c.bf16 %v1328_v29, %v1327_v11  ;;  %v1656_v29 = vld [vmem:[#allocation12 + $0x50] sm:$0xff] }
 0x2f7   : > { %v984_v62 = vpop.permute.xlu1 %983 }
 0x2f8   : > { %5128 = vmatmul.mubr.msk.bf16.gmra.mrb[24].mxu0 %vm1388_vm0, %v1346_v14  ;;  %v1030_v58 = vmul.f32 %v7190_v50, %v984_v62 }
 0x2fa   : > { %v1062_v59 = vadd.f32 %v1030_v58, %v866_v34 }
 0x2fc   : > { %v827_v40 = vpop.permute.xlu1 %826  ;;  %v1258_v61 = vadd.f32 %v1226_v37, %v1062_v59 }
 0x2fd   : > { %v5105_v17 = vpop.f32.mrb[0].mxu0  ;;  %v868_v36 = vmul.f32 %v7199_v54, %v827_v40 }
 0x2fe   : > { %v1480_v43 = vadd.f32 %v5105_v17, %v7403_v15  ;;  %v1471_v18 = vpop.f32.mrb[1].mxu0  ;;  %v1297_v7 = vadd.f32 %v7215_v9, %v1258_v61 }
 0x2ff   : > { %v1472_v21 = vadd.f32 %v7403_v15, %v1471_v18  ;;  %v5106_v22 = vpop.f32.mrb[2].mxu0  ;;  %v1064_v49 = vadd.f32 %v1032_v27, %v868_v36 }
 0x300   : > { %v832_v6 = vpop.permute.xlu1 %831  ;;  %v1483_v63 = vadd.f32 %v5106_v22, %v7403_v15  ;;  %v1474_v23 = vpop.f32.mrb[3].mxu0  ;;  %v1600_v32 = vmax.f32 %v1480_v43, 0.0  ;;  %v1329_v14 = vmax.f32 %v1297_v7, 0.0  ;;  %v1664_v22 = vld [vmem:[#allocation12 + $0x90] sm:$0xff] }
 0x301   : > { %v1475_v26 = vadd.f32 %v7403_v15, %v1474_v23  ;;  %v1598_v0 = vmax.f32 %v1472_v21, 0.0  ;;  %v869_v33 = vmul.f32 %v7199_v54, %v832_v6  ;;  %v4985_v54 = vcombine.high %v1656_v29, %v1660_v60  ;;  %v1668_v6 = vld [vmem:[#allocation12 + $0xb0] sm:$0xff]  ;;  %v1661_v23 = vld [vmem:[#allocation12 + $0x78] sm:$0xff] }
 0x302   : > { %v1601_v35 = vmax.f32 %v1483_v63, 0.0  ;;  %v4992_v58 = vcombine.low %v1664_v22, %v1668_v6  ;;  %v4993_v20 = vcombine.high %v1664_v22, %v1668_v6  ;;  %v1657_v63 = vld [vmem:[#allocation12 + $0x58] sm:$0xff]  ;;  %v1684_v7 = vld [vmem:[#allocation12 + $0x130] sm:$0xff] }
 0x303   : > { %v1599_v31 = vmax.f32 %v1475_v26, 0.0  ;;  %v4987_v34 = vcombine.high %v1657_v63, %v1661_v23  ;;  %v1688_v6 = vld [vmem:[#allocation12 + $0x150] sm:$0xff] }
 0x304   : > { %v7412_v39 = vpack.c.bf16 %v1601_v35, %v1600_v32 }
 0x305   : > { %v996_v44 = vpop.permute.xlu1 %995  ;;  %v7414_v51 = vpack.c.bf16 %v1599_v31, %v1598_v0  ;;  %v1665_v0 = vld [vmem:[#allocation12 + $0x98] sm:$0xff] }
 0x306   : > { %v1033_v8 = vmul.f32 %v7190_v50, %v996_v44  ;;  %v4984_v50 = vcombine.low %v1656_v29, %v1660_v60  ;;  %v1669_v31 = vld [vmem:[#allocation12 + $0xb8] sm:$0xff] }
 0x307   : > { %2063 = vmatmul.mubr.bf16.vlgmr.msra.gmra.mrb[0].mxu1 %v7414_v51  ;;  %v4995_v55 = vcombine.high %v1665_v0, %v1669_v31 }
 0x308   : > { %v1065_v25 = vadd.f32 %v1033_v8, %v869_v33  ;;  %2072 = vmatprep.mubr.bf16.mxu1 %v6573_v1  ;;  %2417 = vmatpush1.bf16.msra.mxu1 %v4976_v5  ;;  %v4986_v8 = vcombine.low %v1657_v63, %v1661_v23  ;;  %v1672_v5 = vld [vmem:[#allocation12 + $0xd0] sm:$0xff] }
 0x309   : > { %2418 = vmatprep.subr.bf16.mxu1 %v4985_v54  ;;  %v5001_v42 = vcombine.high %v1672_v5, %v1676_v2 }
 0x30a   : > { %v1184_v19 = vpop.permute.xlu1 %1183  ;;  %v1261_v10 = vadd.f32 %v1229_v56, %v1065_v25  ;;  %v4994_v25 = vcombine.low %v1665_v0, %v1669_v31 }
 0x30b   : > { %v1227_v16 = vmul.f32 %v7196_v53, %v1184_v19  ;;  %v5000_v19 = vcombine.low %v1672_v5, %v1676_v2  ;;  %v1701_v2 = vld [vmem:[#allocation12 + $0x1b8] sm:$0xff] }
 0x30c   : > { %v1300_v62 = vadd.f32 %v7215_v9, %v1261_v10  ;;  %2419 = vmatpush1.bf16.msra.mxu1 %v4984_v50  ;;  %v1681_v10 = vld [vmem:[#allocation12 + $0x118] sm:$0xff] }
 0x30d   : > { %v1259_v12 = vadd.f32 %v1227_v16, %v1063_v4  ;;  %2420 = vmatprep.subr.bf16.mxu1 %v4993_v20  ;;  %v1677_v4 = vld [vmem:[#allocation12 + $0xf8] sm:$0xff]  ;;  %v1680_v16 = vld [vmem:[#allocation12 + $0x110] sm:$0xff] }
 0x30e   : > { %v1188_v30 = vpop.permute.xlu1 %1187  ;;  %v1332_v18 = vmax.f32 %v1300_v62, 0.0  ;;  %v1689_v20 = vld [vmem:[#allocation12 + $0x158] sm:$0xff] }
 0x30f   : > { %v1298_v13 = vadd.f32 %v7215_v9, %v1259_v12  ;;  %v1228_v11 = vmul.f32 %v7196_v53, %v1188_v30  ;;  %2073 = vmatmul.mubr.bf16.gmra.mrb[4].mxu1 %v7412_v39  ;;  %v5008_v12 = vcombine.low %v1680_v16, %v1684_v7  ;;  %v5009_v30 = vcombine.high %v1680_v16, %v1684_v7  ;;  %v1705_v16 = vld [vmem:[#allocation12 + $0x1d8] sm:$0xff] }
 0x310   : > { %2082 = vmatprep.mubr.bf16.mxu1 %v6573_v1  ;;  %2421 = vmatpush1.bf16.msra.mxu1 %v4992_v58  ;;  %v1692_v58 = vld [vmem:[#allocation12 + $0x170] sm:$0xff] }
 0x311   : > { %v1330_v57 = vmax.f32 %v1298_v13, 0.0  ;;  %v1260_v40 = vadd.f32 %v1228_v11, %v1064_v49  ;;  %2422 = vmatprep.subr.bf16.mxu1 %v5001_v42  ;;  %v1685_v49 = vld [vmem:[#allocation12 + $0x138] sm:$0xff]  ;;  %v5016_v63 = vcombine.low %v1688_v6, %v1692_v58  ;;  %v5017_v23 = vcombine.high %v1688_v6, %v1692_v58 }
 0x312   : > { %v5010_v13 = vcombine.low %v1681_v10, %v1685_v49  ;;  %v5011_v11 = vcombine.high %v1681_v10, %v1685_v49 }
 0x313   : > { %v1347_v17 = vpack.c.bf16 %v1330_v57, %v1329_v14  ;;  %v1299_v43 = vadd.f32 %v7215_v9, %v1260_v40  ;;  %v4978_v9 = vcombine.low %v7422_v24, %v1653_v3  ;;  %v1673_v3 = vld [vmem:[#allocation12 + $0xd8] sm:$0xff] }
 0x314   : > { %v5002_v27 = vcombine.low %v1673_v3, %v1677_v4  ;;  %v5003_v36 = vcombine.high %v1673_v3, %v1677_v4  ;;  %2423 = vmatpush1.bf16.msra.mxu1 %v5000_v19 }
 0x315   : > { %v1331_v53 = vmax.f32 %v1299_v43, 0.0  ;;  %5131 = vmatprep.mubr.msk.bf16.mxu0 %vm1388_vm0, %v1347_v17  ;;  %2424 = vmatprep.subr.bf16.mxu1 %v5009_v30 }
 0x317   : > { %v1348_v21 = vpack.c.bf16 %v1332_v18, %v1331_v53 }
 0x318   : > { %2425 = vmatpush1.bf16.msra.mxu1 %v5008_v12  ;;  %v1709_v12 = vld [vmem:[#allocation12 + $0x1f8] sm:$0xff] }
 0x319   : > { %5132 = vmatmul.mubr.msk.bf16.gmra.mrb[28].mxu0 %vm1388_vm0, %v1348_v21  ;;  %2426 = vmatprep.subr.bf16.mxu1 %v5017_v23  ;;  %v5034_v30 = vcombine.low %v1705_v16, %v1709_v12  ;;  %v5035_v49 = vcombine.high %v1705_v16, %v1709_v12 }
 0x31a   : > { %2255 = vmatprep.mubr.bf16.mxu0 %v6573_v1 }
 0x31c   : > { %2427 = vmatpush1.bf16.msra.mxu1 %v5016_v63 }
 0x31e   : > { %v5109_v26 = vpop.f32.mrb[4].mxu0 }
 0x31f   : > { %v1496_v32 = vadd.f32 %v5109_v26, %v7403_v15  ;;  %v1487_v35 = vpop.f32.mrb[5].mxu0 }
 0x320   : > { %v1488_v59 = vadd.f32 %v7403_v15, %v1487_v35  ;;  %v5110_v37 = vpop.f32.mrb[6].mxu0 }
 0x321   : > { %2256 = vmatmul.mubr.bf16.vlgmr.msra.gmra.mrb[32].mxu0 %v7414_v51  ;;  %v1499_v44 = vadd.f32 %v5110_v37, %v7403_v15  ;;  %v1490_v46 = vpop.f32.mrb[7].mxu0  ;;  %v1604_v33 = vmax.f32 %v1496_v32, 0.0 }
 0x322   : > { %2265 = vmatprep.mubr.bf16.mxu0 %v6573_v1  ;;  %2610 = vmatpush1.bf16.msra.mxu0 %v4978_v9  ;;  %v1491_v28 = vadd.f32 %v7403_v15, %v1490_v46  ;;  %v1602_v38 = vmax.f32 %v1488_v59, 0.0  ;;  %v1693_v9 = vld [vmem:[#allocation12 + $0x178] sm:$0xff] }
 0x323   : > { %2611 = vmatprep.subr.bf16.mxu0 %v4987_v34  ;;  %v1605_v56 = vmax.f32 %v1499_v44, 0.0  ;;  %v5018_v26 = vcombine.low %v1689_v20, %v1693_v9  ;;  %v5019_v34 = vcombine.high %v1689_v20, %v1693_v9 }
 0x324   : > { %v1603_v52 = vmax.f32 %v1491_v28, 0.0 }
 0x325   : > { %v7446_v24 = vpack.c.bf16 %v1605_v56, %v1604_v33  ;;  %v1696_v56 = vld [vmem:[#allocation12 + $0x190] sm:$0xff] }
 0x326   : > { %2612 = vmatpush1.bf16.msra.mxu0 %v4986_v8  ;;  %v7448_v61 = vpack.c.bf16 %v1603_v52, %v1602_v38  ;;  %v1700_v38 = vld [vmem:[#allocation12 + $0x1b0] sm:$0xff]  ;;  %v1697_v52 = vld [vmem:[#allocation12 + $0x198] sm:$0xff] }
 0x327   : > { %2613 = vmatprep.subr.bf16.mxu0 %v4995_v55  ;;  %v5025_v5 = vcombine.high %v1696_v56, %v1700_v38  ;;  %v5024_v19 = vcombine.low %v1696_v56, %v1700_v38  ;;  %v5027_v42 = vcombine.high %v1697_v52, %v1701_v2  ;;  %v5026_v4 = vcombine.low %v1697_v52, %v1701_v2 }
 0x328   : > { %2083 = vmatmul.mubr.bf16.gmra.mrb[8].mxu1 %v7448_v61 }
 0x329   : > { %2266 = vmatmul.mubr.bf16.gmra.mrb[36].mxu0 %v7412_v39  ;;  %2092 = vmatprep.mubr.bf16.mxu1 %v6573_v1 }
 0x32a   : > { %2275 = vmatprep.mubr.bf16.mxu0 %v6573_v1  ;;  %2614 = vmatpush1.bf16.msra.mxu0 %v4994_v25 }
 0x32b   : > { %2615 = vmatprep.subr.bf16.mxu0 %v5003_v36  ;;  %2428 = vmatprep.subr.bf16.mxu1 %v5025_v5  ;;  %v1708_v36 = vld [vmem:[#allocation12 + $0x1f0] sm:$0xff] }
 0x32c   : > { %2429 = vmatpush1.bf16.msra.mxu1 %v5024_v19 }
 0x32e   : > { %2616 = vmatpush1.bf16.msra.mxu0 %v5002_v27  ;;  %v1704_v27 = vld [vmem:[#allocation12 + $0x1d0] sm:$0xff] }
 0x32f   : > { %2617 = vmatprep.subr.bf16.mxu0 %v5011_v11  ;;  %v5032_v7 = vcombine.low %v1704_v27, %v1708_v36  ;;  %v5033_v10 = vcombine.high %v1704_v27, %v1708_v36 }
 0x330   : > { %2093 = vmatmul.mubr.bf16.gmra.mrb[12].mxu1 %v7446_v24 }
 0x331   : > { %2276 = vmatmul.mubr.bf16.gmra.mrb[40].mxu0 %v7448_v61  ;;  %2102 = vmatprep.mubr.bf16.mxu1 %v6573_v1 }
 0x332   : > { %2285 = vmatprep.mubr.bf16.mxu0 %v6573_v1  ;;  %2618 = vmatpush1.bf16.msra.mxu0 %v5010_v13 }
 0x333   : > { %2619 = vmatprep.subr.bf16.mxu0 %v5019_v34  ;;  %2430 = vmatprep.subr.bf16.mxu1 %v5033_v10 }
 0x334   : > { %2431 = vmatpush1.bf16.msra.mxu1 %v5032_v7 }
 0x336   : > { %2620 = vmatpush1.bf16.msra.mxu0 %v5018_v26 }
 0x337   : > { %2621 = vmatprep.subr.bf16.mxu0 %v5027_v42 }
 0x339   : > { %2286 = vmatmul.mubr.bf16.gmra.mrb[44].mxu0 %v7446_v24 }
 0x33a   : > { %2295 = vmatprep.mubr.bf16.mxu0 %v6573_v1  ;;  %2622 = vmatpush1.bf16.msra.mxu0 %v5026_v4 }
 0x33b   : > { %2623 = vmatprep.subr.bf16.mxu0 %v5035_v49 }
 0x33e   : > { %2624 = vmatpush1.bf16.msra.mxu0 %v5034_v30 }
 0x33f   : > { %v5113_v29 = vpop.f32.mrb[8].mxu0 }
 0x340   : > { %v1512_v60 = vadd.f32 %v5113_v29, %v7403_v15  ;;  %v1503_v50 = vpop.f32.mrb[9].mxu0 }
 0x341   : > { %v1504_v54 = vadd.f32 %v7403_v15, %v1503_v50  ;;  %v5114_v14 = vpop.f32.mrb[10].mxu0 }
 0x342   : > { %v1515_v62 = vadd.f32 %v5114_v14, %v7403_v15  ;;  %v1506_v57 = vpop.f32.mrb[11].mxu0  ;;  %v1608_v17 = vmax.f32 %v1512_v60, 0.0 }
 0x343   : > { %v1507_v40 = vadd.f32 %v7403_v15, %v1506_v57  ;;  %v1606_v18 = vmax.f32 %v1504_v54, 0.0 }
 0x344   : > { %v1609_v43 = vmax.f32 %v1515_v62, 0.0 }
 0x345   : > { %v1607_v53 = vmax.f32 %v1507_v40, 0.0 }
 0x346   : > { %v7464_v21 = vpack.c.bf16 %v1609_v43, %v1608_v17 }
 0x347   : > { %v7466_v22 = vpack.c.bf16 %v1607_v53, %v1606_v18 }
 0x349   : > { %2103 = vmatmul.mubr.bf16.gmra.mrb[16].mxu1 %v7466_v22  ;;  %2296 = vmatmul.mubr.bf16.gmra.mrb[48].mxu0 %v7466_v22 }
 0x34a   : > { %2112 = vmatprep.mubr.bf16.mxu1 %v6573_v1  ;;  %2305 = vmatprep.mubr.bf16.mxu0 %v6573_v1 }
 0x351   : > { %2113 = vmatmul.mubr.bf16.gmra.mrb[20].mxu1 %v7464_v21  ;;  %2306 = vmatmul.mubr.bf16.gmra.mrb[52].mxu0 %v7464_v21 }
 0x352   : > { %2122 = vmatprep.mubr.bf16.mxu1 %v6573_v1  ;;  %2315 = vmatprep.mubr.bf16.mxu0 %v6573_v1 }
 0x360   : > { %v5117_v32 = vpop.f32.mrb[12].mxu0 }
 0x361   : > { %v1528_v35 = vadd.f32 %v5117_v32, %v7403_v15  ;;  %v1519_v0 = vpop.f32.mrb[13].mxu0 }
 0x362   : > { %v1520_v31 = vadd.f32 %v7403_v15, %v1519_v0  ;;  %v5118_v59 = vpop.f32.mrb[14].mxu0 }
 0x363   : > { %v1531_v37 = vadd.f32 %v5118_v59, %v7403_v15  ;;  %v1522_v44 = vpop.f32.mrb[15].mxu0  ;;  %v1612_v8 = vmax.f32 %v1528_v35, 0.0 }
 0x364   : > { %v1523_v46 = vadd.f32 %v7403_v15, %v1522_v44  ;;  %v1610_v55 = vmax.f32 %v1520_v31, 0.0 }
 0x365   : > { %v1613_v28 = vmax.f32 %v1531_v37, 0.0 }
 0x366   : > { %v1611_v33 = vmax.f32 %v1523_v46, 0.0 }
 0x367   : > { %v7480_v25 = vpack.c.bf16 %v1613_v28, %v1612_v8 }
 0x368   : > { %v7482_v3 = vpack.c.bf16 %v1611_v33, %v1610_v55 }
 0x36a   : > { %2123 = vmatmul.mubr.bf16.gmra.mrb[24].mxu1 %v7482_v3  ;;  %2316 = vmatmul.mubr.bf16.gmra.mrb[56].mxu0 %v7482_v3 }
 0x36b   : > { %2132 = vmatprep.mubr.bf16.mxu1 %v6573_v1  ;;  %2325 = vmatprep.mubr.bf16.mxu0 %v6573_v1 }
 0x372   : > { %2133 = vmatmul.mubr.bf16.gmra.mrb[28].mxu1 %v7480_v25  ;;  %2326 = vmatmul.mubr.bf16.gmra.mrb[60].mxu0 %v7480_v25 }
 0x373   : > { %2142 = vmatprep.mubr.bf16.mxu1 %v6573_v1  ;;  %2335 = vmatprep.mubr.bf16.mxu0 %v6573_v1 }
 0x385   : > { %v5121_v13 = vpop.f32.mrb[16].mxu0 }
 0x386   : > { %v1544_v11 = vadd.f32 %v5121_v13, %v7403_v15  ;;  %v1535_v29 = vpop.f32.mrb[17].mxu0 }
 0x387   : > { %v1536_v60 = vadd.f32 %v7403_v15, %v1535_v29  ;;  %v5122_v50 = vpop.f32.mrb[18].mxu0 }
 0x388   : > { %v1547_v54 = vadd.f32 %v5122_v50, %v7403_v15  ;;  %v1538_v14 = vpop.f32.mrb[19].mxu0  ;;  %v1616_v57 = vmax.f32 %v1544_v11, 0.0 }
 0x389   : > { %v1539_v62 = vadd.f32 %v7403_v15, %v1538_v14  ;;  %v1614_v17 = vmax.f32 %v1536_v60, 0.0 }
 0x38a   : > { %v1617_v40 = vmax.f32 %v1547_v54, 0.0 }
 0x38b   : > { %v1615_v43 = vmax.f32 %v1539_v62, 0.0 }
 0x38c   : > { %v7496_v18 = vpack.c.bf16 %v1617_v40, %v1616_v57 }
 0x38d   : > { %v7498_v53 = vpack.c.bf16 %v1615_v43, %v1614_v17 }
 0x38f   : > { %2143 = vmatmul.mubr.bf16.gmra.mrb[32].mxu1 %v7498_v53  ;;  %2336 = vmatmul.mubr.bf16.gmra.mrb[64].mxu0 %v7498_v53 }
 0x390   : > { %2152 = vmatprep.mubr.bf16.mxu1 %v6573_v1  ;;  %2345 = vmatprep.mubr.bf16.mxu0 %v6573_v1 }
 0x397   : > { %2153 = vmatmul.mubr.bf16.gmra.mrb[36].mxu1 %v7496_v18  ;;  %2346 = vmatmul.mubr.bf16.gmra.mrb[68].mxu0 %v7496_v18 }
 0x398   : > { %2162 = vmatprep.mubr.bf16.mxu1 %v6573_v1  ;;  %2355 = vmatprep.mubr.bf16.mxu0 %v6573_v1 }
 0x3a6   : > { %v5125_v6 = vpop.f32.mrb[20].mxu0 }
 0x3a7   : > { %v1560_v58 = vadd.f32 %v5125_v6, %v7403_v15  ;;  %v1551_v20 = vpop.f32.mrb[21].mxu0 }
 0x3a8   : > { %v1552_v63 = vadd.f32 %v7403_v15, %v1551_v20  ;;  %v5126_v23 = vpop.f32.mrb[22].mxu0 }
 0x3a9   : > { %v1563_v9 = vadd.f32 %v5126_v23, %v7403_v15  ;;  %v1554_v26 = vpop.f32.mrb[23].mxu0  ;;  %v1620_v32 = vmax.f32 %v1560_v58, 0.0 }
 0x3aa   : > { %v1555_v34 = vadd.f32 %v7403_v15, %v1554_v26  ;;  %v1618_v0 = vmax.f32 %v1552_v63, 0.0 }
 0x3ab   : > { %v1621_v35 = vmax.f32 %v1563_v9, 0.0 }
 0x3ac   : > { %v1619_v31 = vmax.f32 %v1555_v34, 0.0 }
 0x3ad   : > { %v7512_v59 = vpack.c.bf16 %v1621_v35, %v1620_v32 }
 0x3ae   : > { %v7514_v37 = vpack.c.bf16 %v1619_v31, %v1618_v0 }
 0x3b0   : > { %2163 = vmatmul.mubr.bf16.gmra.mrb[40].mxu1 %v7514_v37  ;;  %2356 = vmatmul.mubr.bf16.gmra.mrb[72].mxu0 %v7514_v37 }
 0x3b1   : > { %2172 = vmatprep.mubr.bf16.mxu1 %v6573_v1  ;;  %2365 = vmatprep.mubr.bf16.mxu0 %v6573_v1 }
 0x3b8   : > { %2173 = vmatmul.mubr.bf16.gmra.mrb[44].mxu1 %v7512_v59  ;;  %2366 = vmatmul.mubr.bf16.gmra.mrb[76].mxu0 %v7512_v59 }
 0x3b9   : > { %2182 = vmatprep.mubr.bf16.mxu1 %v6573_v1  ;;  %2375 = vmatprep.mubr.bf16.mxu0 %v6573_v1 }
 0x3cb   : > { %v5129_v44 = vpop.f32.mrb[24].mxu0 }
 0x3cc   : > { %v1576_v46 = vadd.f32 %v5129_v44, %v7403_v15  ;;  %v1567_v8 = vpop.f32.mrb[25].mxu0 }
 0x3cd   : > { %v1568_v28 = vadd.f32 %v7403_v15, %v1567_v8  ;;  %v5130_v55 = vpop.f32.mrb[26].mxu0 }
 0x3ce   : > { %v1579_v33 = vadd.f32 %v5130_v55, %v7403_v15  ;;  %v1570_v56 = vpop.f32.mrb[27].mxu0  ;;  %v1624_v52 = vmax.f32 %v1576_v46, 0.0 }
 0x3cf   : > { %v1571_v38 = vadd.f32 %v7403_v15, %v1570_v56  ;;  %v1622_v2 = vmax.f32 %v1568_v28, 0.0 }
 0x3d0   : > { %v1625_v5 = vmax.f32 %v1579_v33, 0.0 }
 0x3d1   : > { %v1623_v19 = vmax.f32 %v1571_v38, 0.0 }
 0x3d2   : > { %v7528_v42 = vpack.c.bf16 %v1625_v5, %v1624_v52 }
 0x3d3   : > { %v7530_v4 = vpack.c.bf16 %v1623_v19, %v1622_v2 }
 0x3d5   : > { %2183 = vmatmul.mubr.bf16.gmra.mrb[48].mxu1 %v7530_v4  ;;  %2376 = vmatmul.mubr.bf16.gmra.mrb[80].mxu0 %v7530_v4 }
 0x3d6   : > { %2192 = vmatprep.mubr.bf16.mxu1 %v6573_v1  ;;  %2385 = vmatprep.mubr.bf16.mxu0 %v6573_v1 }
 0x3da   : > { %v2064_v27 = vpop.f32.mrb[0].mxu1 }
 0x3db   : > { %v2066_v36 = vpop.f32.mrb[1].mxu1 }
 0x3dc   : > { %v2068_v16 = vpop.f32.mrb[2].mxu1 }
 0x3dd   : > { %2193 = vmatmul.mubr.bf16.gmra.mrb[52].mxu1 %v7528_v42  ;;  %2386 = vmatmul.mubr.bf16.gmra.mrb[84].mxu0 %v7528_v42  ;;  %v2803_v7 = vmax.f32 %v2064_v27, %v2068_v16  ;;  %v2070_v10 = vpop.f32.mrb[3].mxu1 }
 0x3de   : > { %2202 = vmatprep.mubr.bf16.mxu1 %v6573_v1  ;;  %2395 = vmatprep.mubr.bf16.mxu0 %v6573_v1  ;;  %v2840_v12 = vmax.f32 %v2066_v36, %v2070_v10 }
 0x3e2   : > { %v2074_v30 = vpop.f32.mrb[4].mxu1 }
 0x3e3   : > { %v2804_v49 = vmax.f32 %v2803_v7, %v2074_v30  ;;  %v2076_v13 = vpop.f32.mrb[5].mxu1 }
 0x3e4   : > { %v2841_v11 = vmax.f32 %v2840_v12, %v2076_v13  ;;  %v2078_v29 = vpop.f32.mrb[6].mxu1 }
 0x3e5   : > { %v2805_v60 = vmax.f32 %v2804_v49, %v2078_v29  ;;  %v2080_v50 = vpop.f32.mrb[7].mxu1 }
 0x3e6   : > { %v2842_v54 = vmax.f32 %v2841_v11, %v2080_v50 }
 0x3ec   : > { %v5133_v14 = vpop.f32.mrb[28].mxu0 }
 0x3ed   : > { %v1592_v62 = vadd.f32 %v5133_v14, %v7403_v15  ;;  %v1583_v57 = vpop.f32.mrb[29].mxu0 }
 0x3ee   : > { %v1584_v40 = vadd.f32 %v7403_v15, %v1583_v57  ;;  %v5134_v17 = vpop.f32.mrb[30].mxu0 }
 0x3ef   : > { %v1595_v43 = vadd.f32 %v5134_v17, %v7403_v15  ;;  %v1586_v6 = vpop.f32.mrb[31].mxu0  ;;  %v1628_v20 = vmax.f32 %v1592_v62, 0.0 }
 0x3f0   : > { %v1587_v58 = vadd.f32 %v7403_v15, %v1586_v6  ;;  %v1626_v23 = vmax.f32 %v1584_v40, 0.0 }
 0x3f1   : > { %v1629_v63 = vmax.f32 %v1595_v43, 0.0 }
 0x3f2   : > { %v1627_v9 = vmax.f32 %v1587_v58, 0.0 }
 0x3f3   : > { %v7544_v26 = vpack.c.bf16 %v1629_v63, %v1628_v20 }
 0x3f4   : > { %v7546_v34 = vpack.c.bf16 %v1627_v9, %v1626_v23  ;;  %v2257_v32 = vpop.f32.mrb[32].mxu0 }
 0x3f5   : > { %v2259_v35 = vpop.f32.mrb[33].mxu0 }
 0x3f6   : > { %2203 = vmatmul.mubr.bf16.gmra.mrb[56].mxu1 %v7546_v34  ;;  %v2261_v0 = vpop.f32.mrb[34].mxu0  ;;  %2396 = vmatmul.mubr.bf16.gmra.mrb[88].mxu0 %v7546_v34 }
 0x3f7   : > { %v2877_v31 = vmax.f32 %v2257_v32, %v2261_v0  ;;  %v2263_v44 = vpop.f32.mrb[35].mxu0  ;;  %2212 = vmatprep.mubr.bf16.mxu1 %v6573_v1  ;;  %2405 = vmatprep.mubr.bf16.mxu0 %v6573_v1 }
 0x3f8   : > { %v2914_v15 = vmax.f32 %v2259_v35, %v2263_v44 }
 0x3fb   : > { %v2084_v46 = vpop.f32.mrb[8].mxu1 }
 0x3fc   : > { %v2267_v8 = vpop.f32.mrb[36].mxu0  ;;  %v2806_v28 = vmax.f32 %v2805_v60, %v2084_v46  ;;  %v2086_v33 = vpop.f32.mrb[9].mxu1 }
 0x3fd   : > { %v2878_v55 = vmax.f32 %v2877_v31, %v2267_v8  ;;  %v2269_v56 = vpop.f32.mrb[37].mxu0  ;;  %v2843_v38 = vmax.f32 %v2842_v54, %v2086_v33  ;;  %v2088_v5 = vpop.f32.mrb[10].mxu1 }
 0x3fe   : > { %v2915_v52 = vmax.f32 %v2914_v15, %v2269_v56  ;;  %2213 = vmatmul.mubr.bf16.gmra.mrb[60].mxu1 %v7544_v26  ;;  %v2271_v2 = vpop.f32.mrb[38].mxu0  ;;  %2406 = vmatmul.mubr.bf16.gmra.mrb[92].mxu0 %v7544_v26  ;;  %v2807_v19 = vmax.f32 %v2806_v28, %v2088_v5  ;;  %v2090_v36 = vpop.f32.mrb[11].mxu1 }
 0x3ff   : > { %v2879_v27 = vmax.f32 %v2878_v55, %v2271_v2  ;;  %v2273_v16 = vpop.f32.mrb[39].mxu0  ;;  %2448 = vmatprep.mubr.bf16.mxu1 %v6573_v1  ;;  %2641 = vmatprep.mubr.bf16.mxu0 %v6573_v1  ;;  %v2844_v7 = vmax.f32 %v2843_v38, %v2090_v36 }
 0x400   : > { %v2916_v10 = vmax.f32 %v2915_v52, %v2273_v16 }
 0x403   : > { %v2094_v12 = vpop.f32.mrb[12].mxu1 }
 0x404   : > { %v2277_v30 = vpop.f32.mrb[40].mxu0  ;;  %v2808_v49 = vmax.f32 %v2807_v19, %v2094_v12  ;;  %v2096_v11 = vpop.f32.mrb[13].mxu1 }
 0x405   : > { %v2880_v13 = vmax.f32 %v2879_v27, %v2277_v30  ;;  %v2279_v29 = vpop.f32.mrb[41].mxu0  ;;  %v2845_v60 = vmax.f32 %v2844_v7, %v2096_v11  ;;  %v2098_v54 = vpop.f32.mrb[14].mxu1 }
 0x406   : > { %v2917_v50 = vmax.f32 %v2916_v10, %v2279_v29  ;;  %v2281_v14 = vpop.f32.mrb[42].mxu0  ;;  %2449 = vmatmul.mubr.bf16.vlgmr.msra.gmra.mrb[64].mxu1 %v7414_v51  ;;  %2642 = vmatmul.mubr.bf16.vlgmr.msra.gmra.mrb[96].mxu0 %v7414_v51  ;;  %v2809_v62 = vmax.f32 %v2808_v49, %v2098_v54  ;;  %v2100_v40 = vpop.f32.mrb[15].mxu1 }
 0x407   : > { %v2881_v57 = vmax.f32 %v2880_v13, %v2281_v14  ;;  %v2283_v17 = vpop.f32.mrb[43].mxu0  ;;  %2458 = vmatprep.mubr.bf16.mxu1 %v6573_v1  ;;  %2651 = vmatprep.mubr.bf16.mxu0 %v6573_v1  ;;  %v2846_v43 = vmax.f32 %v2845_v60, %v2100_v40 }
 0x408   : > { %v2918_v6 = vmax.f32 %v2917_v50, %v2283_v17 }
 0x40c   : > { %v2287_v58 = vpop.f32.mrb[44].mxu0 }
 0x40d   : > { %v2882_v20 = vmax.f32 %v2881_v57, %v2287_v58  ;;  %v2289_v63 = vpop.f32.mrb[45].mxu0 }
 0x40e   : > { %v2919_v23 = vmax.f32 %v2918_v6, %v2289_v63  ;;  %v2291_v9 = vpop.f32.mrb[46].mxu0  ;;  %2459 = vmatmul.mubr.bf16.gmra.mrb[68].mxu1 %v7412_v39  ;;  %2652 = vmatmul.mubr.bf16.gmra.mrb[100].mxu0 %v7412_v39 }
 0x40f   : > { %v2883_v51 = vmax.f32 %v2882_v20, %v2291_v9  ;;  %v2293_v32 = vpop.f32.mrb[47].mxu0  ;;  %2468 = vmatprep.mubr.bf16.mxu1 %v6573_v1  ;;  %2661 = vmatprep.mubr.bf16.mxu0 %v6573_v1 }
 0x410   : > { %v2920_v35 = vmax.f32 %v2919_v23, %v2293_v32 }
 0x416   : > { %2469 = vmatmul.mubr.bf16.gmra.mrb[72].mxu1 %v7448_v61  ;;  %2662 = vmatmul.mubr.bf16.gmra.mrb[104].mxu0 %v7448_v61 }
 0x417   : > { %2478 = vmatprep.mubr.bf16.mxu1 %v6573_v1  ;;  %2671 = vmatprep.mubr.bf16.mxu0 %v6573_v1 }
 0x41c   : > { %v2104_v0 = vpop.f32.mrb[16].mxu1  ;;  %v2297_v31 = vpop.f32.mrb[48].mxu0 }
 0x41d   : > { %v2810_v44 = vmax.f32 %v2809_v62, %v2104_v0  ;;  %v2884_v15 = vmax.f32 %v2883_v51, %v2297_v31  ;;  %v2106_v39 = vpop.f32.mrb[17].mxu1  ;;  %v2299_v46 = vpop.f32.mrb[49].mxu0 }
 0x41e   : > { %v2847_v8 = vmax.f32 %v2846_v43, %v2106_v39  ;;  %v2921_v28 = vmax.f32 %v2920_v35, %v2299_v46  ;;  %v2108_v55 = vpop.f32.mrb[18].mxu1  ;;  %v2301_v33 = vpop.f32.mrb[50].mxu0  ;;  %2479 = vmatmul.mubr.bf16.gmra.mrb[76].mxu1 %v7446_v24  ;;  %2672 = vmatmul.mubr.bf16.gmra.mrb[108].mxu0 %v7446_v24 }
 0x41f   : > { %v2811_v56 = vmax.f32 %v2810_v44, %v2108_v55  ;;  %v2885_v61 = vmax.f32 %v2884_v15, %v2301_v33  ;;  %v2110_v38 = vpop.f32.mrb[19].mxu1  ;;  %v2303_v52 = vpop.f32.mrb[51].mxu0  ;;  %2488 = vmatprep.mubr.bf16.mxu1 %v6573_v1  ;;  %2681 = vmatprep.mubr.bf16.mxu0 %v6573_v1 }
 0x420   : > { %v2848_v5 = vmax.f32 %v2847_v8, %v2110_v38  ;;  %v2922_v2 = vmax.f32 %v2921_v28, %v2303_v52 }
 0x424   : > { %v2114_v19 = vpop.f32.mrb[20].mxu1  ;;  %v2307_v27 = vpop.f32.mrb[52].mxu0 }
 0x425   : > { %v2812_v36 = vmax.f32 %v2811_v56, %v2114_v19  ;;  %v2886_v16 = vmax.f32 %v2885_v61, %v2307_v27  ;;  %v2116_v7 = vpop.f32.mrb[21].mxu1  ;;  %v2309_v10 = vpop.f32.mrb[53].mxu0 }
 0x426   : > { %v2849_v12 = vmax.f32 %v2848_v5, %v2116_v7  ;;  %v2923_v30 = vmax.f32 %v2922_v2, %v2309_v10  ;;  %v2118_v49 = vpop.f32.mrb[22].mxu1  ;;  %v2311_v24 = vpop.f32.mrb[54].mxu0  ;;  %2489 = vmatmul.mubr.bf16.gmra.mrb[80].mxu1 %v7466_v22  ;;  %2682 = vmatmul.mubr.bf16.gmra.mrb[112].mxu0 %v7466_v22 }
 0x427   : > { %v2813_v13 = vmax.f32 %v2812_v36, %v2118_v49  ;;  %v2887_v11 = vmax.f32 %v2886_v16, %v2311_v24  ;;  %v2120_v29 = vpop.f32.mrb[23].mxu1  ;;  %v2313_v60 = vpop.f32.mrb[55].mxu0  ;;  %2498 = vmatprep.mubr.bf16.mxu1 %v6573_v1  ;;  %2691 = vmatprep.mubr.bf16.mxu0 %v6573_v1 }
 0x428   : > { %v2850_v50 = vmax.f32 %v2849_v12, %v2120_v29  ;;  %v2924_v54 = vmax.f32 %v2923_v30, %v2313_v60 }
 0x42e   : > { %2499 = vmatmul.mubr.bf16.gmra.mrb[84].mxu1 %v7464_v21  ;;  %2692 = vmatmul.mubr.bf16.gmra.mrb[116].mxu0 %v7464_v21 }
 0x42f   : > { %2508 = vmatprep.mubr.bf16.mxu1 %v6573_v1  ;;  %2701 = vmatprep.mubr.bf16.mxu0 %v6573_v1 }
 0x436   : > { %2509 = vmatmul.mubr.bf16.gmra.mrb[88].mxu1 %v7482_v3  ;;  %2702 = vmatmul.mubr.bf16.gmra.mrb[120].mxu0 %v7482_v3 }
 0x437   : > { %2518 = vmatprep.mubr.bf16.mxu1 %v6573_v1  ;;  %2711 = vmatprep.mubr.bf16.mxu0 %v6573_v1 }
 0x43d   : > { %v2124_v22 = vpop.f32.mrb[24].mxu1  ;;  %v2317_v14 = vpop.f32.mrb[56].mxu0 }
 0x43e   : > { %v2814_v62 = vmax.f32 %v2813_v13, %v2124_v22  ;;  %v2888_v57 = vmax.f32 %v2887_v11, %v2317_v14  ;;  %v2126_v40 = vpop.f32.mrb[25].mxu1  ;;  %v2319_v17 = vpop.f32.mrb[57].mxu0  ;;  %2519 = vmatmul.mubr.bf16.gmra.mrb[92].mxu1 %v7480_v25  ;;  %2712 = vmatmul.mubr.bf16.gmra.mrb[124].mxu0 %v7480_v25 }
 0x43f   : > { %v2851_v21 = vmax.f32 %v2850_v50, %v2126_v40  ;;  %v2925_v43 = vmax.f32 %v2924_v54, %v2319_v17  ;;  %v2128_v6 = vpop.f32.mrb[26].mxu1  ;;  %v2321_v58 = vpop.f32.mrb[58].mxu0  ;;  %2528 = vmatprep.mubr.bf16.mxu1 %v6573_v1  ;;  %2721 = vmatprep.mubr.bf16.mxu0 %v6573_v1 }
 0x440   : > { %v2815_v3 = vmax.f32 %v2814_v62, %v2128_v6  ;;  %v2889_v20 = vmax.f32 %v2888_v57, %v2321_v58  ;;  %v2130_v63 = vpop.f32.mrb[27].mxu1  ;;  %v2323_v23 = vpop.f32.mrb[59].mxu0  ;;  %v3166_v6 = vld [vmem:[#allocation15 + $0x8] sm:$0xff] }
 0x441   : > { %v2852_v9 = vmax.f32 %v2851_v21, %v2130_v63  ;;  %v2926_v51 = vmax.f32 %v2925_v43, %v2323_v23  ;;  %v3170_v58 = vld [vmem:[#allocation15 + $0x28] sm:$0xff]  ;;  %v3169_v63 = vld [vmem:[#allocation15 + $0x20] sm:$0xff] }
 0x445   : > { %v2134_v32 = vpop.f32.mrb[28].mxu1  ;;  %v2327_v35 = vpop.f32.mrb[60].mxu0 }
 0x446   : > { %v2816_v0 = vmax.f32 %v2815_v3, %v2134_v32  ;;  %v2890_v31 = vmax.f32 %v2889_v20, %v2327_v35  ;;  %v2136_v44 = vpop.f32.mrb[29].mxu1  ;;  %v2329_v25 = vpop.f32.mrb[61].mxu0  ;;  %2529 = vmatmul.mubr.bf16.gmra.mrb[96].mxu1 %v7498_v53  ;;  %2722 = vmatmul.mubr.bf16.gmra.mrb[128].mxu0 %v7498_v53  ;;  %v5135_v3 = vpack.c.bf16 %v3170_v58, %v3166_v6  ;;  %v3165_v20 = vld [vmem:[#allocation15] sm:$0xff] }
 0x447   : > { %v2853_v15 = vmax.f32 %v2852_v9, %v2136_v44  ;;  %v2927_v39 = vmax.f32 %v2926_v51, %v2329_v25  ;;  %v2138_v46 = vpop.f32.mrb[30].mxu1  ;;  %v2331_v8 = vpop.f32.mrb[62].mxu0  ;;  %2538 = vmatprep.mubr.bf16.mxu1 %v6573_v1  ;;  %2731 = vmatprep.mubr.bf16.mxu0 %v6573_v1  ;;  %v5137_v23 = vpack.c.bf16 %v3169_v63, %v3165_v20  ;;  %v3178_v9 = vld [vmem:[#allocation15 + $0x68] sm:$0xff]  ;;  %v3173_v32 = vld [vmem:[#allocation15 + $0x40] sm:$0xff] }
 0x448   : > { %v2817_v28 = vmax.f32 %v2816_v0, %v2138_v46  ;;  %v2891_v55 = vmax.f32 %v2890_v31, %v2331_v8  ;;  %v2140_v33 = vpop.f32.mrb[31].mxu1  ;;  %v2333_v56 = vpop.f32.mrb[63].mxu0  ;;  %5136 = vmatprep.subr.bf16.mxu1 %v5135_v3  ;;  %v3177_v35 = vld [vmem:[#allocation15 + $0x60] sm:$0xff]  ;;  %v3182_v31 = vld [vmem:[#allocation15 + $0x88] sm:$0xff] }
 0x449   : > { %v2854_v61 = vmax.f32 %v2853_v15, %v2140_v33  ;;  %v2928_v38 = vmax.f32 %v2927_v39, %v2333_v56  ;;  %5138 = vmatpush1.bf16.msra.mxu1 %v5137_v23  ;;  %v5141_v0 = vpack.c.bf16 %v3177_v35, %v3173_v32  ;;  %v3186_v44 = vld [vmem:[#allocation15 + $0xa8] sm:$0xff]  ;;  %v3181_v39 = vld [vmem:[#allocation15 + $0x80] sm:$0xff] }
 0x44a   : > { %v5143_v15 = vpack.c.bf16 %v3186_v44, %v3182_v31  ;;  %v3201_v6 = vld [vmem:[#allocation15 + $0x120] sm:$0xff]  ;;  %v3206_v3 = vld [vmem:[#allocation15 + $0x148] sm:$0xff] }
 0x44b   : > { %v3210_v20 = vld [vmem:[#allocation15 + $0x168] sm:$0xff]  ;;  %v3205_v23 = vld [vmem:[#allocation15 + $0x140] sm:$0xff] }
 0x44c   : > { %v5155_v63 = vpack.c.bf16 %v3210_v20, %v3206_v3  ;;  %v3218_v32 = vld [vmem:[#allocation15 + $0x1a8] sm:$0xff]  ;;  %v3217_v31 = vld [vmem:[#allocation15 + $0x1a0] sm:$0xff]  ;;  %v3180_v3 = vld [vmem:[#allocation15 + $0x78] sm:$0xff] }
 0x44e   : > { %2539 = vmatmul.mubr.bf16.gmra.mrb[100].mxu1 %v7496_v18  ;;  %2732 = vmatmul.mubr.bf16.gmra.mrb[132].mxu0 %v7496_v18 }
 0x44f   : > { %2548 = vmatprep.mubr.bf16.mxu1 %v6573_v1  ;;  %2741 = vmatprep.mubr.bf16.mxu0 %v6573_v1 }
 0x456   : > { %2549 = vmatmul.mubr.bf16.gmra.mrb[104].mxu1 %v7514_v37  ;;  %2742 = vmatmul.mubr.bf16.gmra.mrb[136].mxu0 %v7514_v37 }
 0x457   : > { %2558 = vmatprep.mubr.bf16.mxu1 %v6573_v1  ;;  %2751 = vmatprep.mubr.bf16.mxu0 %v6573_v1 }
 0x45e   : > { %2559 = vmatmul.mubr.bf16.gmra.mrb[108].mxu1 %v7512_v59  ;;  %2752 = vmatmul.mubr.bf16.gmra.mrb[140].mxu0 %v7512_v59 }
 0x45f   : > { %2568 = vmatprep.mubr.bf16.mxu1 %v6573_v1  ;;  %2761 = vmatprep.mubr.bf16.mxu0 %v6573_v1 }
 0x462   : > { %v2144_v18 = vpop.f32.mrb[32].mxu1  ;;  %v2337_v53 = vpop.f32.mrb[64].mxu0 }
 0x463   : > { %v2818_v52 = vmax.f32 %v2817_v28, %v2144_v18  ;;  %v2892_v5 = vmax.f32 %v2891_v55, %v2337_v53  ;;  %v2146_v2 = vpop.f32.mrb[33].mxu1  ;;  %v2339_v19 = vpop.f32.mrb[65].mxu0 }
 0x464   : > { %v2855_v27 = vmax.f32 %v2854_v61, %v2146_v2  ;;  %v2929_v37 = vmax.f32 %v2928_v38, %v2339_v19  ;;  %v2148_v36 = vpop.f32.mrb[34].mxu1  ;;  %v2341_v16 = vpop.f32.mrb[66].mxu0 }
 0x465   : > { %v2819_v7 = vmax.f32 %v2818_v52, %v2148_v36  ;;  %v2893_v10 = vmax.f32 %v2892_v5, %v2341_v16  ;;  %v2150_v12 = vpop.f32.mrb[35].mxu1  ;;  %v2343_v30 = vpop.f32.mrb[67].mxu0 }
 0x466   : > { %v2856_v49 = vmax.f32 %v2855_v27, %v2150_v12  ;;  %v2930_v59 = vmax.f32 %v2929_v37, %v2343_v30  ;;  %2569 = vmatmul.mubr.bf16.gmra.mrb[112].mxu1 %v7530_v4  ;;  %2762 = vmatmul.mubr.bf16.gmra.mrb[144].mxu0 %v7530_v4  ;;  %v3190_v27 = vld [vmem:[#allocation15 + $0xc8] sm:$0xff]  ;;  %v3193_v12 = vld [vmem:[#allocation15 + $0xe0] sm:$0xff] }
 0x467   : > { %2578 = vmatprep.mubr.bf16.mxu1 %v6573_v1  ;;  %2771 = vmatprep.mubr.bf16.mxu0 %v6573_v1  ;;  %v3194_v37 = vld [vmem:[#allocation15 + $0xe8] sm:$0xff] }
 0x46a   : > { %v2154_v24 = vpop.f32.mrb[36].mxu1  ;;  %v2347_v13 = vpop.f32.mrb[68].mxu0 }
 0x46b   : > { %v2820_v11 = vmax.f32 %v2819_v7, %v2154_v24  ;;  %v2894_v29 = vmax.f32 %v2893_v10, %v2347_v13  ;;  %v2156_v60 = vpop.f32.mrb[37].mxu1  ;;  %v2349_v50 = vpop.f32.mrb[69].mxu0  ;;  %v5147_v7 = vpack.c.bf16 %v3194_v37, %v3190_v27  ;;  %v3189_v10 = vld [vmem:[#allocation15 + $0xc0] sm:$0xff] }
 0x46c   : > { %v2857_v54 = vmax.f32 %v2856_v49, %v2156_v60  ;;  %v2931_v22 = vmax.f32 %v2930_v59, %v2349_v50  ;;  %v2158_v14 = vpop.f32.mrb[38].mxu1  ;;  %v2351_v62 = vpop.f32.mrb[70].mxu0  ;;  %v5149_v13 = vpack.c.bf16 %v3193_v12, %v3189_v10  ;;  %v3167_v10 = vld [vmem:[#allocation15 + $0x10] sm:$0xff] }
 0x46d   : > { %v2821_v57 = vmax.f32 %v2820_v11, %v2158_v14  ;;  %v2895_v40 = vmax.f32 %v2894_v29, %v2351_v62  ;;  %v2160_v17 = vpop.f32.mrb[39].mxu1  ;;  %v2353_v21 = vpop.f32.mrb[71].mxu0  ;;  %v3171_v12 = vld [vmem:[#allocation15 + $0x30] sm:$0xff] }
 0x46e   : > { %v2858_v43 = vmax.f32 %v2857_v54, %v2160_v17  ;;  %v2932_v4 = vmax.f32 %v2931_v22, %v2353_v21  ;;  %2579 = vmatmul.mubr.bf16.gmra.mrb[116].mxu1 %v7528_v42  ;;  %2772 = vmatmul.mubr.bf16.gmra.mrb[148].mxu0 %v7528_v42  ;;  %v3174_v42 = vld [vmem:[#allocation15 + $0x48] sm:$0xff] }
 0x46f   : > { %2588 = vmatprep.mubr.bf16.mxu1 %v6573_v1  ;;  %2781 = vmatprep.mubr.bf16.mxu0 %v6573_v1  ;;  %v5139_v51 = vpack.c.bf16 %v3178_v9, %v3174_v42  ;;  %v3198_v17 = vld [vmem:[#allocation15 + $0x108] sm:$0xff]  ;;  %v3209_v42 = vld [vmem:[#allocation15 + $0x160] sm:$0xff] }
 0x470   : > { %v3202_v21 = vld [vmem:[#allocation15 + $0x128] sm:$0xff]  ;;  %v5157_v9 = vpack.c.bf16 %v3209_v42, %v3205_v23 }
 0x471   : > { %5140 = vmatprep.subr.bf16.mxu1 %v5139_v51  ;;  %v3214_v51 = vld [vmem:[#allocation15 + $0x188] sm:$0xff] }
 0x472   : > { %5142 = vmatpush1.bf16.msra.mxu1 %v5141_v0  ;;  %v5159_v35 = vpack.c.bf16 %v3218_v32, %v3214_v51  ;;  %v3213_v0 = vld [vmem:[#allocation15 + $0x180] sm:$0xff]  ;;  %v3179_v51 = vld [vmem:[#allocation15 + $0x70] sm:$0xff] }
 0x473   : > { %5144 = vmatprep.subr.bf16.mxu1 %v5143_v15  ;;  %v5161_v44 = vpack.c.bf16 %v3217_v31, %v3213_v0  ;;  %v3188_v0 = vld [vmem:[#allocation15 + $0xb8] sm:$0xff] }
 0x476   : > { %2589 = vmatmul.mubr.bf16.gmra.mrb[120].mxu1 %v7546_v34  ;;  %2782 = vmatmul.mubr.bf16.gmra.mrb[152].mxu0 %v7546_v34 }
 0x477   : > { %2598 = vmatprep.mubr.bf16.mxu1 %v6573_v1  ;;  %2791 = vmatprep.mubr.bf16.mxu0 %v6573_v1  ;;  %v3185_v1 = vld [vmem:[#allocation15 + $0xa0] sm:$0xff] }
 0x478   : > { %v5145_v33 = vpack.c.bf16 %v3185_v1, %v3181_v39 }
 0x47a   : > { %5146 = vmatpush1.bf16.msra.mxu1 %v5145_v33 }
 0x47b   : > { %5148 = vmatprep.subr.bf16.mxu1 %v5147_v7 }
 0x47e   : > { %2599 = vmatmul.mubr.bf16.gmra.mrb[124].mxu1 %v7544_v26  ;;  %2792 = vmatmul.mubr.bf16.gmra.mrb[156].mxu0 %v7544_v26 }
 0x47f   : > { %5150 = vmatpush1.bf16.msra.mxu1 %v5149_v13 }
 0x483   : > { %v2164_v34 = vpop.f32.mrb[40].mxu1  ;;  %v2357_v25 = vpop.f32.mrb[72].mxu0 }
 0x484   : > { %v2822_v46 = vmax.f32 %v2821_v57, %v2164_v34  ;;  %v2896_v8 = vmax.f32 %v2895_v40, %v2357_v25  ;;  %v2166_v28 = vpop.f32.mrb[41].mxu1  ;;  %v2359_v55 = vpop.f32.mrb[73].mxu0 }
 0x485   : > { %v2859_v56 = vmax.f32 %v2858_v43, %v2166_v28  ;;  %v2933_v61 = vmax.f32 %v2932_v4, %v2359_v55  ;;  %v2168_v38 = vpop.f32.mrb[42].mxu1  ;;  %v2361_v18 = vpop.f32.mrb[74].mxu0  ;;  %v5151_v43 = vpack.c.bf16 %v3202_v21, %v3198_v17  ;;  %v3197_v4 = vld [vmem:[#allocation15 + $0x100] sm:$0xff] }
 0x486   : > { %v2823_v53 = vmax.f32 %v2822_v46, %v2168_v38  ;;  %v2897_v26 = vmax.f32 %v2896_v8, %v2361_v18  ;;  %v2170_v52 = vpop.f32.mrb[43].mxu1  ;;  %v2363_v5 = vpop.f32.mrb[75].mxu0  ;;  %v5153_v58 = vpack.c.bf16 %v3201_v6, %v3197_v4  ;;  %v3229_v6 = vld [vmem:[#allocation15 + $0x200] sm:$0xff] }
 0x487   : > { %v2860_v2 = vmax.f32 %v2859_v56, %v2170_v52  ;;  %v2934_v19 = vmax.f32 %v2933_v61, %v2363_v5  ;;  %5152 = vmatprep.subr.bf16.mxu1 %v5151_v43  ;;  %v3222_v56 = vld [vmem:[#allocation15 + $0x1c8] sm:$0xff]  ;;  %v3221_v5 = vld [vmem:[#allocation15 + $0x1c0] sm:$0xff] }
 0x488   : > { %5154 = vmatpush1.bf16.msra.mxu1 %v5153_v58  ;;  %v3226_v61 = vld [vmem:[#allocation15 + $0x1e8] sm:$0xff]  ;;  %v3233_v58 = vld [vmem:[#allocation15 + $0x220] sm:$0xff] }
 0x489   : > { %5156 = vmatprep.subr.bf16.mxu1 %v5155_v63  ;;  %v5163_v52 = vpack.c.bf16 %v3226_v61, %v3222_v56  ;;  %v5169_v23 = vpack.c.bf16 %v3233_v58, %v3229_v6  ;;  %v3191_v61 = vld [vmem:[#allocation15 + $0xd0] sm:$0xff] }
 0x48a   : > { %v3219_v6 = vld [vmem:[#allocation15 + $0x1b0] sm:$0xff] }
 0x48b   : > { %v2174_v36 = vpop.f32.mrb[44].mxu1  ;;  %v2367_v16 = vpop.f32.mrb[76].mxu0 }
 0x48c   : > { %v2824_v30 = vmax.f32 %v2823_v53, %v2174_v36  ;;  %v2898_v49 = vmax.f32 %v2897_v26, %v2367_v16  ;;  %v2176_v59 = vpop.f32.mrb[45].mxu1  ;;  %v2369_v24 = vpop.f32.mrb[77].mxu0  ;;  %5158 = vmatpush1.bf16.msra.mxu1 %v5157_v9  ;;  %v3168_v36 = vld [vmem:[#allocation15 + $0x18] sm:$0xff]  ;;  %v3175_v9 = vld [vmem:[#allocation15 + $0x50] sm:$0xff] }
 0x48d   : > { %v2861_v11 = vmax.f32 %v2860_v2, %v2176_v59  ;;  %v2935_v29 = vmax.f32 %v2934_v19, %v2369_v24  ;;  %v2178_v60 = vpop.f32.mrb[46].mxu1  ;;  %v2371_v50 = vpop.f32.mrb[78].mxu0  ;;  %5160 = vmatprep.subr.bf16.mxu1 %v5159_v35  ;;  %v3225_v2 = vld [vmem:[#allocation15 + $0x1e0] sm:$0xff]  ;;  %v3172_v16 = vld [vmem:[#allocation15 + $0x38] sm:$0xff]  ;;  %v5393_v59 = vpack.c.bf16 %v3171_v12, %v3167_v10  ;;  %v5397_v32 = vpack.c.bf16 %v3179_v51, %v3175_v9 }
 0x48e   : > { %v2825_v54 = vmax.f32 %v2824_v30, %v2178_v60  ;;  %v2899_v22 = vmax.f32 %v2898_v49, %v2371_v50  ;;  %v2180_v14 = vpop.f32.mrb[47].mxu1  ;;  %v2373_v62 = vpop.f32.mrb[79].mxu0  ;;  %v5165_v37 = vpack.c.bf16 %v3225_v2, %v3221_v5  ;;  %v5391_v7 = vpack.c.bf16 %v3172_v16, %v3168_v36  ;;  %v3184_v35 = vld [vmem:[#allocation15 + $0x98] sm:$0xff]  ;;  %v3199_v5 = vld [vmem:[#allocation15 + $0x110] sm:$0xff]  ;;  %v3249_v10 = vld [vmem:[#allocation15 + $0x2a0] sm:$0xff] }
 0x48f   : > { %v2862_v57 = vmax.f32 %v2861_v11, %v2180_v14  ;;  %v2936_v40 = vmax.f32 %v2935_v29, %v2373_v62  ;;  %v3230_v14 = vld [vmem:[#allocation15 + $0x208] sm:$0xff]  ;;  %v5399_v31 = vpack.c.bf16 %v3188_v0, %v3184_v35  ;;  %v3203_v2 = vld [vmem:[#allocation15 + $0x130] sm:$0xff]  ;;  %v3208_v36 = vld [vmem:[#allocation15 + $0x158] sm:$0xff] }
 0x490   : > { %5162 = vmatpush1.bf16.msra.mxu1 %v5161_v44  ;;  %5392 = vmatprep.subr.bf16.mxu0 %v5391_v7  ;;  %v3234_v62 = vld [vmem:[#allocation15 + $0x228] sm:$0xff]  ;;  %v3183_v44 = vld [vmem:[#allocation15 + $0x90] sm:$0xff]  ;;  %v3245_v7 = vld [vmem:[#allocation15 + $0x280] sm:$0xff] }
 0x491   : > { %5164 = vmatprep.subr.bf16.mxu1 %v5163_v52  ;;  %5394 = vmatpush1.bf16.msra.mxu0 %v5393_v59  ;;  %v5167_v4 = vpack.c.bf16 %v3234_v62, %v3230_v14  ;;  %v3212_v12 = vld [vmem:[#allocation15 + $0x178] sm:$0xff]  ;;  %v3207_v59 = vld [vmem:[#allocation15 + $0x150] sm:$0xff]  ;;  %v3254_v35 = vld [vmem:[#allocation15 + $0x2c8] sm:$0xff] }
 0x492   : > { %v3216_v14 = vld [vmem:[#allocation15 + $0x198] sm:$0xff]  ;;  %v3258_v0 = vld [vmem:[#allocation15 + $0x2e8] sm:$0xff] }
 0x493   : > { %v3220_v62 = vld [vmem:[#allocation15 + $0x1b8] sm:$0xff] }
 0x494   : > { %5166 = vmatpush1.bf16.msra.mxu1 %v5165_v37  ;;  %v3250_v37 = vld [vmem:[#allocation15 + $0x2a8] sm:$0xff] }
 0x495   : > { %5168 = vmatprep.subr.bf16.mxu1 %v5167_v4  ;;  %v3215_v4 = vld [vmem:[#allocation15 + $0x190] sm:$0xff] }
 0x496   : > { %v5417_v58 = vpack.c.bf16 %v3219_v6, %v3215_v4  ;;  %v3239_v4 = vld [vmem:[#allocation15 + $0x250] sm:$0xff] }
 0x497   : > { %v3243_v6 = vld [vmem:[#allocation15 + $0x270] sm:$0xff] }
 0x498   : > { %5170 = vmatpush1.bf16.msra.mxu1 %v5169_v23 }
 0x4a8   : > { %v2184_v34 = vpop.f32.mrb[48].mxu1  ;;  %v2377_v25 = vpop.f32.mrb[80].mxu0 }
 0x4a9   : > { %v2826_v15 = vmax.f32 %v2825_v54, %v2184_v34  ;;  %v2900_v39 = vmax.f32 %v2899_v22, %v2377_v25  ;;  %v2186_v1 = vpop.f32.mrb[49].mxu1  ;;  %v2379_v46 = vpop.f32.mrb[81].mxu0  ;;  %v3187_v34 = vld [vmem:[#allocation15 + $0xb0] sm:$0xff] }
 0x4aa   : > { %v2863_v8 = vmax.f32 %v2862_v57, %v2186_v1  ;;  %v2937_v28 = vmax.f32 %v2936_v40, %v2379_v46  ;;  %v2188_v55 = vpop.f32.mrb[50].mxu1  ;;  %v2381_v33 = vpop.f32.mrb[82].mxu0  ;;  %v3176_v57 = vld [vmem:[#allocation15 + $0x58] sm:$0xff]  ;;  %v5401_v25 = vpack.c.bf16 %v3187_v34, %v3183_v44 }
 0x4ab   : > { %v2827_v38 = vmax.f32 %v2826_v15, %v2188_v55  ;;  %v2901_v18 = vmax.f32 %v2900_v39, %v2381_v33  ;;  %v2190_v53 = vpop.f32.mrb[51].mxu1  ;;  %v2383_v26 = vpop.f32.mrb[83].mxu0  ;;  %v5395_v42 = vpack.c.bf16 %v3180_v3, %v3176_v57  ;;  %v3238_v15 = vld [vmem:[#allocation15 + $0x248] sm:$0xff]  ;;  %v3192_v1 = vld [vmem:[#allocation15 + $0xd8] sm:$0xff]  ;;  %v5415_v57 = vpack.c.bf16 %v3220_v62, %v3216_v14 }
 0x4ac   : > { %v2864_v19 = vmax.f32 %v2863_v8, %v2190_v53  ;;  %v2938_v27 = vmax.f32 %v2937_v28, %v2383_v26  ;;  %v3242_v39 = vld [vmem:[#allocation15 + $0x268] sm:$0xff]  ;;  %v3237_v8 = vld [vmem:[#allocation15 + $0x240] sm:$0xff]  ;;  %v3196_v55 = vld [vmem:[#allocation15 + $0xf8] sm:$0xff] }
 0x4ad   : > { %5396 = vmatprep.subr.bf16.mxu0 %v5395_v42  ;;  %v5171_v46 = vpack.c.bf16 %v3242_v39, %v3238_v15  ;;  %v3241_v28 = vld [vmem:[#allocation15 + $0x260] sm:$0xff]  ;;  %v5403_v56 = vpack.c.bf16 %v3196_v55, %v3192_v1  ;;  %v3200_v53 = vld [vmem:[#allocation15 + $0x118] sm:$0xff] }
 0x4ae   : > { %5398 = vmatpush1.bf16.msra.mxu0 %v5397_v32  ;;  %v5173_v33 = vpack.c.bf16 %v3241_v28, %v3237_v8  ;;  %v3204_v26 = vld [vmem:[#allocation15 + $0x138] sm:$0xff]  ;;  %v3257_v15 = vld [vmem:[#allocation15 + $0x2e0] sm:$0xff]  ;;  %v3223_v28 = vld [vmem:[#allocation15 + $0x1d0] sm:$0xff] }
 0x4af   : > { %5400 = vmatprep.subr.bf16.mxu0 %v5399_v31  ;;  %5172 = vmatprep.subr.bf16.mxu1 %v5171_v46  ;;  %v5407_v52 = vpack.c.bf16 %v3204_v26, %v3200_v53  ;;  %v3224_v31 = vld [vmem:[#allocation15 + $0x1d8] sm:$0xff] }
 0x4b0   : > { %v2194_v30 = vpop.f32.mrb[52].mxu1  ;;  %v2387_v49 = vpop.f32.mrb[84].mxu0  ;;  %5174 = vmatpush1.bf16.msra.mxu1 %v5173_v33  ;;  %v3231_v33 = vld [vmem:[#allocation15 + $0x210] sm:$0xff] }
 0x4b1   : > { %v7618_v24 = vmax.f32 %v2827_v38, %v2194_v30  ;;  %v7620_v13 = vmax.f32 %v2901_v18, %v2387_v49  ;;  %v2196_v11 = vpop.f32.mrb[53].mxu1  ;;  %v2389_v29 = vpop.f32.mrb[85].mxu0  ;;  %v3195_v38 = vld [vmem:[#allocation15 + $0xf0] sm:$0xff]  ;;  %v5177_v30 = vpack.c.bf16 %v3249_v10, %v3245_v7  ;;  %v5411_v49 = vpack.c.bf16 %v3212_v12, %v3208_v36  ;;  %v3261_v12 = vld [vmem:[#allocation15 + $0x300] sm:$0xff] }
 0x4b2   : > { %v7622_v60 = vmax.f32 %v2864_v19, %v2196_v11  ;;  %v7624_v50 = vmax.f32 %v2938_v27, %v2389_v29  ;;  %v7626_v54 = vpop.f32.mrb[54].mxu1  ;;  %v7628_v22 = vpop.f32.mrb[86].mxu0  ;;  %5402 = vmatpush1.bf16.msra.mxu0 %v5401_v25  ;;  %v5405_v18 = vpack.c.bf16 %v3195_v38, %v3191_v61  ;;  %v5409_v19 = vpack.c.bf16 %v3203_v2, %v3199_v5  ;;  %v3246_v27 = vld [vmem:[#allocation15 + $0x288] sm:$0xff]  ;;  %v3211_v11 = vld [vmem:[#allocation15 + $0x170] sm:$0xff] }
 0x4b3   : > { %v2829_v40 = vmax.f32 %v7618_v24, %v7626_v54  ;;  %v2903_v17 = vmax.f32 %v7620_v13, %v7628_v22  ;;  %v7634_v21 = vpop.f32.mrb[55].mxu1  ;;  %v7636_v43 = vpop.f32.mrb[87].mxu0  ;;  %5404 = vmatprep.subr.bf16.mxu0 %v5403_v56  ;;  %v5175_v16 = vpack.c.bf16 %v3250_v37, %v3246_v27  ;;  %v5413_v29 = vpack.c.bf16 %v3211_v11, %v3207_v59  ;;  %v3228_v13 = vld [vmem:[#allocation15 + $0x1f8] sm:$0xff]  ;;  %v3235_v56 = vld [vmem:[#allocation15 + $0x230] sm:$0xff]  ;;  %v3262_v2 = vld [vmem:[#allocation15 + $0x308] sm:$0xff] }
 0x4b4   : > { %v2866_v20 = vmax.f32 %v7622_v60, %v7634_v21  ;;  %v2940_v63 = vmax.f32 %v7624_v50, %v7636_v43  ;;  %v5179_v54 = vpack.c.bf16 %v3258_v0, %v3254_v35  ;;  %v5419_v8 = vpack.c.bf16 %v3228_v13, %v3224_v31  ;;  %v3227_v60 = vld [vmem:[#allocation15 + $0x1f0] sm:$0xff]  ;;  %v3232_v43 = vld [vmem:[#allocation15 + $0x218] sm:$0xff] }
 0x4b5   : > { %5176 = vmatprep.subr.bf16.mxu1 %v5175_v16  ;;  %v5421_v50 = vpack.c.bf16 %v3227_v60, %v3223_v28  ;;  %v5425_v61 = vpack.c.bf16 %v3235_v56, %v3231_v33  ;;  %v3240_v27 = vld [vmem:[#allocation15 + $0x258] sm:$0xff]  ;;  %v6575_v0 = vmov 1966171168   ;;  %v3255_v56 = vld [vmem:[#allocation15 + $0x2d0] sm:$0xff] }
 0x4b6   : > { %5406 = vmatpush1.bf16.msra.mxu0 %v5405_v18  ;;  %5178 = vmatpush1.bf16.msra.mxu1 %v5177_v30  ;;  %v3265_v30 = vld [vmem:[#allocation15 + $0x320] sm:$0xff]  ;;  %v3112_v31 = vunpack.c.l.s4 %v6575_v0  ;;  %v3256_v60 = vld [vmem:[#allocation15 + $0x2d8] sm:$0xff]  ;;  %v3274_v0 = vld [vmem:[#allocation15 + $0x368] sm:$0xff] }
 0x4b7   : > { %5408 = vmatprep.subr.bf16.mxu0 %v5407_v52  ;;  %5180 = vmatprep.subr.bf16.mxu1 %v5179_v54  ;;  %v5185_v62 = vpack.c.bf16 %v3265_v30, %v3261_v12  ;;  %v3268_v12 = vld [vmem:[#allocation15 + $0x338] sm:$0xff] }
 0x4ba   : > { %5410 = vmatpush1.bf16.msra.mxu0 %v5409_v19  ;;  %v3266_v19 = vld [vmem:[#allocation15 + $0x328] sm:$0xff] }
 0x4bb   : > { %5412 = vmatprep.subr.bf16.mxu0 %v5411_v49  ;;  %v5183_v10 = vpack.c.bf16 %v3266_v19, %v3262_v2  ;;  %v3244_v49 = vld [vmem:[#allocation15 + $0x278] sm:$0xff] }
 0x4be   : > { %5414 = vmatpush1.bf16.msra.mxu0 %v5413_v29 }
 0x4bf   : > { %5416 = vmatprep.subr.bf16.mxu0 %v5415_v57  ;;  %v5427_v57 = vpack.c.bf16 %v3244_v49, %v3240_v27 }
 0x4c2   : > { %5418 = vmatpush1.bf16.msra.mxu0 %v5417_v58 }
 0x4c3   : > { %5420 = vmatprep.subr.bf16.mxu0 %v5419_v8 }
 0x4c6   : > { %5422 = vmatpush1.bf16.msra.mxu0 %v5421_v50  ;;  %v3113_v50 = vunpack.c.0.s8 %v3112_v31  ;;  %v3272_v31 = vld [vmem:[#allocation15 + $0x358] sm:$0xff] }
 0x4c9   : > { %v2204_v3 = vpop.f32.mrb[56].mxu1  ;;  %v2397_v23 = vpop.f32.mrb[88].mxu0 }
 0x4ca   : > { %v2830_v42 = vmax.f32 %v2829_v40, %v2204_v3  ;;  %v2904_v9 = vmax.f32 %v2903_v17, %v2397_v23  ;;  %v2206_v51 = vpop.f32.mrb[57].mxu1  ;;  %v2399_v32 = vpop.f32.mrb[89].mxu0  ;;  %v3253_v40 = vld [vmem:[#allocation15 + $0x2c0] sm:$0xff]  ;;  %v5429_v23 = vpack.c.bf16 %v3243_v6, %v3239_v4  ;;  %v7655_v6 = vsub.s32 %v3113_v50, %v7167_v41 }
 0x4cb   : > { %v2867_v44 = vmax.f32 %v2866_v20, %v2206_v51  ;;  %v2941_v34 = vmax.f32 %v2940_v63, %v2399_v32  ;;  %v2208_v25 = vpop.f32.mrb[58].mxu1  ;;  %v2401_v24 = vpop.f32.mrb[90].mxu0  ;;  %v5181_v46 = vpack.c.bf16 %v3257_v15, %v3253_v40  ;;  %v3236_v63 = vld [vmem:[#allocation15 + $0x238] sm:$0xff] }
 0x4cc   : > { %v2831_v22 = vmax.f32 %v2830_v42, %v2208_v25  ;;  %v2905_v17 = vmax.f32 %v2904_v9, %v2401_v24  ;;  %v2210_v39 = vpop.f32.mrb[59].mxu1  ;;  %v2403_v1 = vpop.f32.mrb[91].mxu0  ;;  %v5423_v55 = vpack.c.bf16 %v3236_v63, %v3232_v43  ;;  %v3248_v51 = vld [vmem:[#allocation15 + $0x298] sm:$0xff]  ;;  %v3247_v25 = vld [vmem:[#allocation15 + $0x290] sm:$0xff] }
 0x4cd   : > { %v2868_v21 = vmax.f32 %v2867_v44, %v2210_v39  ;;  %v2942_v20 = vmax.f32 %v2941_v34, %v2403_v1  ;;  %5182 = vmatpush1.bf16.msra.mxu1 %v5181_v46  ;;  %v3252_v32 = vld [vmem:[#allocation15 + $0x2b8] sm:$0xff]  ;;  %v3251_v24 = vld [vmem:[#allocation15 + $0x2b0] sm:$0xff] }
 0x4ce   : > { %5424 = vmatprep.subr.bf16.mxu0 %v5423_v55  ;;  %5184 = vmatprep.subr.bf16.mxu1 %v5183_v10  ;;  %v5431_v34 = vpack.c.bf16 %v3252_v32, %v3248_v51  ;;  %v5433_v15 = vpack.c.bf16 %v3251_v24, %v3247_v25  ;;  %v3264_v10 = vld [vmem:[#allocation15 + $0x318] sm:$0xff] }
 0x4cf   : > { %5426 = vmatpush1.bf16.msra.mxu0 %v5425_v61  ;;  %v3259_v61 = vld [vmem:[#allocation15 + $0x2f0] sm:$0xff] }
 0x4d0   : > { %5428 = vmatprep.subr.bf16.mxu0 %v5427_v57 }
 0x4d1   : > { %v2214_v38 = vpop.f32.mrb[60].mxu1  ;;  %v2407_v18 = vpop.f32.mrb[92].mxu0  ;;  %5186 = vmatpush1.bf16.msra.mxu1 %v5185_v62 }
 0x4d2   : > { %v2832_v53 = vmax.f32 %v2831_v22, %v2214_v38  ;;  %v2906_v26 = vmax.f32 %v2905_v17, %v2407_v18  ;;  %v2216_v52 = vpop.f32.mrb[61].mxu1  ;;  %v2409_v5 = vpop.f32.mrb[93].mxu0 }
 0x4d3   : > { %v2869_v37 = vmax.f32 %v2868_v21, %v2216_v52  ;;  %v2943_v36 = vmax.f32 %v2942_v20, %v2409_v5  ;;  %v2218_v16 = vpop.f32.mrb[62].mxu1  ;;  %v2411_v7 = vpop.f32.mrb[94].mxu0  ;;  %5430 = vmatpush1.bf16.msra.mxu0 %v5429_v23  ;;  %v3260_v21 = vld [vmem:[#allocation15 + $0x2f8] sm:$0xff] }
 0x4d4   : > { %v2833_v59 = vmax.f32 %v2832_v53, %v2218_v16  ;;  %v2907_v11 = vmax.f32 %v2906_v26, %v2411_v7  ;;  %v2220_v29 = vpop.f32.mrb[63].mxu1  ;;  %v2413_v14 = vpop.f32.mrb[95].mxu0  ;;  %5432 = vmatprep.subr.bf16.mxu0 %v5431_v34  ;;  %v5435_v33 = vpack.c.bf16 %v3260_v21, %v3256_v60  ;;  %v5437_v7 = vpack.c.bf16 %v3259_v61, %v3255_v56  ;;  %v3271_v60 = vld [vmem:[#allocation15 + $0x350] sm:$0xff] }
 0x4d5   : > { %v2870_v58 = vmax.f32 %v2869_v37, %v2220_v29  ;;  %v2944_v3 = vmax.f32 %v2943_v36, %v2413_v14  ;;  %v3267_v29 = vld [vmem:[#allocation15 + $0x330] sm:$0xff] }
 0x4d6   : > { %v2834_v42 = vrot.slane %v2833_v59, 4  ;;  %v2908_v9 = vrot.slane %v2907_v11, 4  ;;  %v3275_v21 = vld [vmem:[#allocation15 + $0x370] sm:$0xff] }
 0x4d7   : > { %v2871_v35 = vrot.slane %v2870_v58, 4  ;;  %v2945_v44 = vrot.slane %v2944_v3, 4  ;;  %5434 = vmatpush1.bf16.msra.mxu0 %v5433_v15  ;;  %v3269_v15 = vld [vmem:[#allocation15 + $0x340] sm:$0xff]  ;;  %v5445_v61 = vpack.c.bf16 %v3275_v21, %v3271_v60 }
 0x4d8   : > { %v2835_v54 = vmax.f32 %v2833_v59, %v2834_v42  ;;  %v2909_v40 = vmax.f32 %v2907_v11, %v2908_v9  ;;  %5436 = vmatprep.subr.bf16.mxu0 %v5435_v33  ;;  %v5439_v59 = vpack.c.bf16 %v3268_v12, %v3264_v10  ;;  %v3263_v11 = vld [vmem:[#allocation15 + $0x310] sm:$0xff]  ;;  %v3282_v33 = vld [vmem:[#allocation15 + $0x3a8] sm:$0xff] }
 0x4d9   : > { %v2872_v13 = vmax.f32 %v2870_v58, %v2871_v35  ;;  %v2946_v22 = vmax.f32 %v2944_v3, %v2945_v44  ;;  %v2450_v17 = vpop.f32.mrb[64].mxu1  ;;  %v2643_v39 = vpop.f32.mrb[96].mxu0  ;;  %v5441_v57 = vpack.c.bf16 %v3267_v29, %v3263_v11  ;;  %v3270_v35 = vld [vmem:[#allocation15 + $0x348] sm:$0xff]  ;;  %v3288_v29 = vld [vmem:[#allocation15 + $0x3d8] sm:$0xff] }
 0x4da   : > { %v2836_v1 = vrot.slane %v2835_v54, 2  ;;  %v2910_v46 = vrot.slane %v2909_v40, 2  ;;  %v2452_v8 = vpop.f32.mrb[65].mxu1  ;;  %v2645_v28 = vpop.f32.mrb[97].mxu0  ;;  %v3290_v11 = vld [vmem:[#allocation15 + $0x3e8] sm:$0xff] }
 0x4db   : > { %v2873_v20 = vrot.slane %v2872_v13, 2  ;;  %v2947_v43 = vrot.slane %v2946_v22, 2  ;;  %v2454_v63 = vpop.f32.mrb[66].mxu1  ;;  %v2647_v55 = vpop.f32.mrb[98].mxu0  ;;  %5438 = vmatpush1.bf16.msra.mxu0 %v5437_v7 }
 0x4dc   : > { %v2837_v38 = vmax.f32 %v2835_v54, %v2836_v1  ;;  %v2911_v18 = vmax.f32 %v2909_v40, %v2910_v46  ;;  %v2951_v53 = vmax.f32 %v2450_v17, %v2454_v63  ;;  %v3025_v26 = vmax.f32 %v2643_v39, %v2647_v55  ;;  %v2456_v52 = vpop.f32.mrb[67].mxu1  ;;  %v2649_v5 = vpop.f32.mrb[99].mxu0  ;;  %5440 = vmatprep.subr.bf16.mxu0 %v5439_v59  ;;  %v3278_v55 = vld [vmem:[#allocation15 + $0x388] sm:$0xff] }
 0x4dd   : > { %v2874_v2 = vmax.f32 %v2872_v13, %v2873_v20  ;;  %v2948_v19 = vmax.f32 %v2946_v22, %v2947_v43  ;;  %v2988_v27 = vmax.f32 %v2452_v8, %v2456_v52  ;;  %v3062_v37 = vmax.f32 %v2645_v28, %v2649_v5  ;;  %v3273_v13 = vld [vmem:[#allocation15 + $0x360] sm:$0xff]  ;;  %v3276_v22 = vld [vmem:[#allocation15 + $0x378] sm:$0xff]  ;;  %v3286_v59 = vld [vmem:[#allocation15 + $0x3c8] sm:$0xff] }
 0x4de   : > { %v2838_v36 = vrot.slane %v2837_v38, 1  ;;  %v2912_v16 = vrot.slane %v2911_v18, 1  ;;  %v5187_v8 = vpack.c.bf16 %v3274_v0, %v3270_v35  ;;  %v5189_v28 = vpack.c.bf16 %v3273_v13, %v3269_v15  ;;  %v3281_v52 = vld [vmem:[#allocation15 + $0x3a0] sm:$0xff]  ;;  %v3284_v5 = vld [vmem:[#allocation15 + $0x3b8] sm:$0xff]  ;;  %v3298_v15 = vld [vmem:[#allocation15 + $0x428] sm:$0xff] }
 0x4df   : > { %v2875_v30 = vrot.slane %v2874_v2, 1  ;;  %v2949_v49 = vrot.slane %v2948_v19, 1  ;;  %5442 = vmatpush1.bf16.msra.mxu0 %v5441_v57  ;;  %v5443_v56 = vpack.c.bf16 %v3276_v22, %v3272_v31  ;;  %v3292_v0 = vld [vmem:[#allocation15 + $0x3f8] sm:$0xff]  ;;  %v3287_v31 = vld [vmem:[#allocation15 + $0x3d0] sm:$0xff] }
 0x4e0   : > { %v2839_v14 = vmax.f32 %v2837_v38, %v2838_v36  ;;  %v2913_v62 = vmax.f32 %v2911_v18, %v2912_v16  ;;  %5188 = vmatprep.subr.bf16.mxu1 %v5187_v8  ;;  %v3280_v38 = vld [vmem:[#allocation15 + $0x398] sm:$0xff] }
 0x4e1   : > { %v2876_v4 = vmax.f32 %v2874_v2, %v2875_v30  ;;  %v2950_v58 = vmax.f32 %v2948_v19, %v2949_v49  ;;  %v2460_v3 = vpop.f32.mrb[68].mxu1  ;;  %v2653_v23 = vpop.f32.mrb[100].mxu0  ;;  %5190 = vmatpush1.bf16.msra.mxu1 %v5189_v28  ;;  %5444 = vmatprep.subr.bf16.mxu0 %v5443_v56  ;;  %v5447_v19 = vpack.c.bf16 %v3284_v5, %v3280_v38  ;;  %v3296_v13 = vld [vmem:[#allocation15 + $0x418] sm:$0xff] }
 0x4e2   : > { %v2952_v42 = vmax.f32 %v2951_v53, %v2460_v3  ;;  %v3026_v9 = vmax.f32 %v3025_v26, %v2653_v23  ;;  %v2462_v51 = vpop.f32.mrb[69].mxu1  ;;  %v2655_v32 = vpop.f32.mrb[101].mxu0  ;;  %v5191_v53 = vpack.c.bf16 %v3282_v33, %v3278_v55  ;;  %v3277_v26 = vld [vmem:[#allocation15 + $0x380] sm:$0xff] }
 0x4e3   : > { %v3107_v44 = vcombine.low %v2839_v14, %v2876_v4  ;;  %v3108_v34 = vcombine.low %v2913_v62, %v2950_v58  ;;  %v2989_v25 = vmax.f32 %v2988_v27, %v2462_v51  ;;  %v3063_v24 = vmax.f32 %v3062_v37, %v2655_v32  ;;  %v2464_v54 = vpop.f32.mrb[70].mxu1  ;;  %v2657_v40 = vpop.f32.mrb[102].mxu0  ;;  %v3279_v27 = vld [vmem:[#allocation15 + $0x390] sm:$0xff]  ;;  %5446 = vmatpush1.bf16.msra.mxu0 %v5445_v61  ;;  %v3285_v3 = vld [vmem:[#allocation15 + $0x3c0] sm:$0xff] }
 0x4e4   : > { %v2953_v17 = vmax.f32 %v2952_v42, %v2464_v54  ;;  %v3027_v39 = vmax.f32 %v3026_v9, %v2657_v40  ;;  %v2466_v1 = vpop.f32.mrb[71].mxu1  ;;  %v2659_v46 = vpop.f32.mrb[103].mxu0  ;;  %v5193_v2 = vpack.c.bf16 %v3281_v52, %v3277_v26  ;;  %v3283_v37 = vld [vmem:[#allocation15 + $0x3b0] sm:$0xff]  ;;  %5192 = vmatprep.subr.bf16.mxu1 %v5191_v53  ;;  %5448 = vmatprep.subr.bf16.mxu0 %v5447_v19  ;;  %v3289_v23 = vld [vmem:[#allocation15 + $0x3e0] sm:$0xff]  ;;  %v3294_v40 = vld [vmem:[#allocation15 + $0x408] sm:$0xff] }
 0x4e5   : > { %v7658_v20 = vrot.slane %v3107_v44, %v7655_v6  ;;  %v7661_v50 = vrot.slane %v3108_v34, %v7655_v6  ;;  %v2990_v43 = vmax.f32 %v2989_v25, %v2466_v1  ;;  %v3064_v63 = vmax.f32 %v3063_v24, %v2659_v46  ;;  %v3291_v44 = vld [vmem:[#allocation15 + $0x3f0] sm:$0xff] }
 0x4e6   : > { %v5449_v7 = vpack.c.bf16 %v3283_v37, %v3279_v27  ;;  %5194 = vmatpush1.bf16.msra.mxu1 %v5193_v2  ;;  %v5195_v58 = vpack.c.bf16 %v3290_v11, %v3286_v59  ;;  %v5197_v35 = vpack.c.bf16 %v3289_v23, %v3285_v3  ;;  %v5451_v24 = vpack.c.bf16 %v3292_v0, %v3288_v29 }
 0x4e7   : > { %v3139_v18 = vcombine.low %v7658_v20, %v7661_v50  ;;  %v5453_v54 = vpack.c.bf16 %v3291_v44, %v3287_v31  ;;  %v5199_v22 = vpack.c.bf16 %v3298_v15, %v3294_v40 }
 0x4e8   : > { %5196 = vmatprep.subr.bf16.mxu1 %v5195_v58  ;;  %5450 = vmatpush1.bf16.msra.mxu0 %v5449_v7 }
 0x4e9   : > { %v2470_v36 = vpop.f32.mrb[72].mxu1  ;;  %v2663_v16 = vpop.f32.mrb[104].mxu0  ;;  %5452 = vmatprep.subr.bf16.mxu0 %v5451_v24 }
 0x4ea   : > { %v2954_v10 = vmax.f32 %v2953_v17, %v2470_v36  ;;  %v3028_v12 = vmax.f32 %v3027_v39, %v2663_v16  ;;  %v2472_v30 = vpop.f32.mrb[73].mxu1  ;;  %v2665_v49 = vpop.f32.mrb[105].mxu0  ;;  %5198 = vmatpush1.bf16.msra.mxu1 %v5197_v35  ;;  %v3300_v17 = vld [vmem:[#allocation15 + $0x438] sm:$0xff] }
 0x4eb   : > { %v2991_v14 = vmax.f32 %v2990_v43, %v2472_v30  ;;  %v3065_v62 = vmax.f32 %v3064_v63, %v2665_v49  ;;  %v2474_v57 = vpop.f32.mrb[74].mxu1  ;;  %v2667_v4 = vpop.f32.mrb[106].mxu0  ;;  %v5455_v39 = vpack.c.bf16 %v3300_v17, %v3296_v13  ;;  %5200 = vmatprep.subr.bf16.mxu1 %v5199_v22 }
 0x4ec   : > { %v2955_v42 = vmax.f32 %v2954_v10, %v2474_v57  ;;  %v3029_v9 = vmax.f32 %v3028_v12, %v2667_v4  ;;  %v2476_v51 = vpop.f32.mrb[75].mxu1  ;;  %v2669_v32 = vpop.f32.mrb[107].mxu0  ;;  %5454 = vmatpush1.bf16.msra.mxu0 %v5453_v54 }
 0x4ed   : > { %v2992_v34 = vmax.f32 %v2991_v14, %v2476_v51  ;;  %v3066_v25 = vmax.f32 %v3065_v62, %v2669_v32  ;;  %5456 = vmatprep.subr.bf16.mxu0 %v5455_v39 }
 0x4f1   : > { %v2480_v1 = vpop.f32.mrb[76].mxu1  ;;  %v2673_v46 = vpop.f32.mrb[108].mxu0 }
 0x4f2   : > { %v2956_v8 = vmax.f32 %v2955_v42, %v2480_v1  ;;  %v3030_v28 = vmax.f32 %v3029_v9, %v2673_v46  ;;  %v2482_v60 = vpop.f32.mrb[77].mxu1  ;;  %v2675_v21 = vpop.f32.mrb[109].mxu0 }
 0x4f3   : > { %v2993_v43 = vmax.f32 %v2992_v34, %v2482_v60  ;;  %v3067_v63 = vmax.f32 %v3066_v25, %v2675_v21  ;;  %v2484_v55 = vpop.f32.mrb[78].mxu1  ;;  %v2677_v33 = vpop.f32.mrb[110].mxu0 }
 0x4f4   : > { %v2957_v56 = vmax.f32 %v2956_v8, %v2484_v55  ;;  %v3031_v61 = vmax.f32 %v3030_v28, %v2677_v33  ;;  %v2486_v38 = vpop.f32.mrb[79].mxu1  ;;  %v2679_v53 = vpop.f32.mrb[111].mxu0 }
 0x4f5   : > { %v2994_v26 = vmax.f32 %v2993_v43, %v2486_v38  ;;  %v3068_v52 = vmax.f32 %v3067_v63, %v2679_v53 }
 0x4f9   : > { %v2490_v5 = vpop.f32.mrb[80].mxu1  ;;  %v2683_v2 = vpop.f32.mrb[112].mxu0 }
 0x4fa   : > { %v2958_v19 = vmax.f32 %v2957_v56, %v2490_v5  ;;  %v3032_v27 = vmax.f32 %v3031_v61, %v2683_v2  ;;  %v2492_v37 = vpop.f32.mrb[81].mxu1  ;;  %v2685_v36 = vpop.f32.mrb[113].mxu0 }
 0x4fb   : > { %v2995_v16 = vmax.f32 %v2994_v26, %v2492_v37  ;;  %v3069_v7 = vmax.f32 %v3068_v52, %v2685_v36  ;;  %v2494_v10 = vpop.f32.mrb[82].mxu1  ;;  %v2687_v12 = vpop.f32.mrb[114].mxu0 }
 0x4fc   : > { %v2959_v30 = vmax.f32 %v2958_v19, %v2494_v10  ;;  %v3033_v49 = vmax.f32 %v3032_v27, %v2687_v12  ;;  %v2496_v59 = vpop.f32.mrb[83].mxu1  ;;  %v2689_v11 = vpop.f32.mrb[115].mxu0 }
 0x4fd   : > { %v2996_v29 = vmax.f32 %v2995_v16, %v2496_v59  ;;  %v3070_v14 = vmax.f32 %v3069_v7, %v2689_v11 }
 0x501   : > { %v2500_v62 = vpop.f32.mrb[84].mxu1  ;;  %v2693_v57 = vpop.f32.mrb[116].mxu0 }
 0x502   : > { %v2960_v4 = vmax.f32 %v2959_v30, %v2500_v62  ;;  %v3034_v58 = vmax.f32 %v3033_v49, %v2693_v57  ;;  %v2502_v3 = vpop.f32.mrb[85].mxu1  ;;  %v2695_v23 = vpop.f32.mrb[117].mxu0 }
 0x503   : > { %v2997_v42 = vmax.f32 %v2996_v29, %v2502_v3  ;;  %v3071_v9 = vmax.f32 %v3070_v14, %v2695_v23  ;;  %v2504_v51 = vpop.f32.mrb[86].mxu1  ;;  %v2697_v32 = vpop.f32.mrb[118].mxu0 }
 0x504   : > { %v2961_v35 = vmax.f32 %v2960_v4, %v2504_v51  ;;  %v3035_v0 = vmax.f32 %v3034_v58, %v2697_v32  ;;  %v2506_v31 = vpop.f32.mrb[87].mxu1  ;;  %v2699_v44 = vpop.f32.mrb[119].mxu0 }
 0x505   : > { %v2998_v34 = vmax.f32 %v2997_v42, %v2506_v31  ;;  %v3072_v25 = vmax.f32 %v3071_v9, %v2699_v44 }
 0x509   : > { %v2510_v24 = vpop.f32.mrb[88].mxu1  ;;  %v2703_v54 = vpop.f32.mrb[120].mxu0 }
 0x50a   : > { %v2962_v40 = vmax.f32 %v2961_v35, %v2510_v24  ;;  %v3036_v15 = vmax.f32 %v3035_v0, %v2703_v54  ;;  %v2512_v13 = vpop.f32.mrb[89].mxu1  ;;  %v2705_v22 = vpop.f32.mrb[121].mxu0 }
 0x50b   : > { %v2999_v17 = vmax.f32 %v2998_v34, %v2512_v13  ;;  %v3073_v39 = vmax.f32 %v3072_v25, %v2705_v22  ;;  %v2514_v1 = vpop.f32.mrb[90].mxu1  ;;  %v2707_v46 = vpop.f32.mrb[122].mxu0 }
 0x50c   : > { %v2963_v8 = vmax.f32 %v2962_v40, %v2514_v1  ;;  %v3037_v28 = vmax.f32 %v3036_v15, %v2707_v46  ;;  %v2516_v60 = vpop.f32.mrb[91].mxu1  ;;  %v2709_v21 = vpop.f32.mrb[123].mxu0 }
 0x50d   : > { %v3000_v43 = vmax.f32 %v2999_v17, %v2516_v60  ;;  %v3074_v63 = vmax.f32 %v3073_v39, %v2709_v21 }
 0x511   : > { %v2520_v55 = vpop.f32.mrb[92].mxu1  ;;  %v2713_v33 = vpop.f32.mrb[124].mxu0 }
 0x512   : > { %v2964_v56 = vmax.f32 %v2963_v8, %v2520_v55  ;;  %v3038_v61 = vmax.f32 %v3037_v28, %v2713_v33  ;;  %v2522_v38 = vpop.f32.mrb[93].mxu1  ;;  %v2715_v53 = vpop.f32.mrb[125].mxu0 }
 0x513   : > { %v3001_v26 = vmax.f32 %v3000_v43, %v2522_v38  ;;  %v3075_v52 = vmax.f32 %v3074_v63, %v2715_v53  ;;  %v2524_v5 = vpop.f32.mrb[94].mxu1  ;;  %v2717_v2 = vpop.f32.mrb[126].mxu0 }
 0x514   : > { %v2965_v19 = vmax.f32 %v2964_v56, %v2524_v5  ;;  %v3039_v27 = vmax.f32 %v3038_v61, %v2717_v2  ;;  %v2526_v37 = vpop.f32.mrb[95].mxu1  ;;  %v2719_v36 = vpop.f32.mrb[127].mxu0 }
 0x515   : > { %v3002_v16 = vmax.f32 %v3001_v26, %v2526_v37  ;;  %v3076_v7 = vmax.f32 %v3075_v52, %v2719_v36 }
 0x519   : > { %v2530_v10 = vpop.f32.mrb[96].mxu1  ;;  %v2723_v12 = vpop.f32.mrb[128].mxu0 }
 0x51a   : > { %v2966_v30 = vmax.f32 %v2965_v19, %v2530_v10  ;;  %v3040_v49 = vmax.f32 %v3039_v27, %v2723_v12  ;;  %v2532_v59 = vpop.f32.mrb[97].mxu1  ;;  %v2725_v11 = vpop.f32.mrb[129].mxu0 }
 0x51b   : > { %v3003_v29 = vmax.f32 %v3002_v16, %v2532_v59  ;;  %v3077_v14 = vmax.f32 %v3076_v7, %v2725_v11  ;;  %v2534_v62 = vpop.f32.mrb[98].mxu1  ;;  %v2727_v57 = vpop.f32.mrb[130].mxu0 }
 0x51c   : > { %v2967_v4 = vmax.f32 %v2966_v30, %v2534_v62  ;;  %v3041_v58 = vmax.f32 %v3040_v49, %v2727_v57  ;;  %v2536_v3 = vpop.f32.mrb[99].mxu1  ;;  %v2729_v23 = vpop.f32.mrb[131].mxu0 }
 0x51d   : > { %v3004_v42 = vmax.f32 %v3003_v29, %v2536_v3  ;;  %v3078_v9 = vmax.f32 %v3077_v14, %v2729_v23 }
 0x521   : > { %v2540_v51 = vpop.f32.mrb[100].mxu1  ;;  %v2733_v32 = vpop.f32.mrb[132].mxu0 }
 0x522   : > { %v2968_v35 = vmax.f32 %v2967_v4, %v2540_v51  ;;  %v3042_v0 = vmax.f32 %v3041_v58, %v2733_v32  ;;  %v2542_v31 = vpop.f32.mrb[101].mxu1  ;;  %v2735_v44 = vpop.f32.mrb[133].mxu0 }
 0x523   : > { %v3005_v34 = vmax.f32 %v3004_v42, %v2542_v31  ;;  %v3079_v25 = vmax.f32 %v3078_v9, %v2735_v44  ;;  %v2544_v24 = vpop.f32.mrb[102].mxu1  ;;  %v2737_v54 = vpop.f32.mrb[134].mxu0 }
 0x524   : > { %v2969_v40 = vmax.f32 %v2968_v35, %v2544_v24  ;;  %v3043_v15 = vmax.f32 %v3042_v0, %v2737_v54  ;;  %v2546_v13 = vpop.f32.mrb[103].mxu1  ;;  %v2739_v22 = vpop.f32.mrb[135].mxu0 }
 0x525   : > { %v3006_v17 = vmax.f32 %v3005_v34, %v2546_v13  ;;  %v3080_v39 = vmax.f32 %v3079_v25, %v2739_v22 }
 0x529   : > { %v2550_v1 = vpop.f32.mrb[104].mxu1  ;;  %v2743_v46 = vpop.f32.mrb[136].mxu0 }
 0x52a   : > { %v2970_v8 = vmax.f32 %v2969_v40, %v2550_v1  ;;  %v3044_v28 = vmax.f32 %v3043_v15, %v2743_v46  ;;  %v2552_v60 = vpop.f32.mrb[105].mxu1  ;;  %v2745_v21 = vpop.f32.mrb[137].mxu0 }
 0x52b   : > { %v3007_v43 = vmax.f32 %v3006_v17, %v2552_v60  ;;  %v3081_v63 = vmax.f32 %v3080_v39, %v2745_v21  ;;  %v2554_v55 = vpop.f32.mrb[106].mxu1  ;;  %v2747_v33 = vpop.f32.mrb[138].mxu0 }
 0x52c   : > { %v2971_v56 = vmax.f32 %v2970_v8, %v2554_v55  ;;  %v3045_v61 = vmax.f32 %v3044_v28, %v2747_v33  ;;  %v2556_v38 = vpop.f32.mrb[107].mxu1  ;;  %v2749_v53 = vpop.f32.mrb[139].mxu0 }
 0x52d   : > { %v3008_v26 = vmax.f32 %v3007_v43, %v2556_v38  ;;  %v3082_v52 = vmax.f32 %v3081_v63, %v2749_v53 }
 0x531   : > { %v2560_v5 = vpop.f32.mrb[108].mxu1  ;;  %v2753_v2 = vpop.f32.mrb[140].mxu0 }
 0x532   : > { %v2972_v19 = vmax.f32 %v2971_v56, %v2560_v5  ;;  %v3046_v27 = vmax.f32 %v3045_v61, %v2753_v2  ;;  %v2562_v37 = vpop.f32.mrb[109].mxu1  ;;  %v2755_v36 = vpop.f32.mrb[141].mxu0 }
 0x533   : > { %v3009_v16 = vmax.f32 %v3008_v26, %v2562_v37  ;;  %v3083_v7 = vmax.f32 %v3082_v52, %v2755_v36  ;;  %v2564_v10 = vpop.f32.mrb[110].mxu1  ;;  %v2757_v12 = vpop.f32.mrb[142].mxu0 }
 0x534   : > { %v2973_v30 = vmax.f32 %v2972_v19, %v2564_v10  ;;  %v3047_v49 = vmax.f32 %v3046_v27, %v2757_v12  ;;  %v2566_v59 = vpop.f32.mrb[111].mxu1  ;;  %v2759_v11 = vpop.f32.mrb[143].mxu0 }
 0x535   : > { %v3010_v29 = vmax.f32 %v3009_v16, %v2566_v59  ;;  %v3084_v14 = vmax.f32 %v3083_v7, %v2759_v11 }
 0x539   : > { %v2570_v62 = vpop.f32.mrb[112].mxu1  ;;  %v2763_v57 = vpop.f32.mrb[144].mxu0 }
 0x53a   : > { %v2974_v4 = vmax.f32 %v2973_v30, %v2570_v62  ;;  %v3048_v58 = vmax.f32 %v3047_v49, %v2763_v57  ;;  %v2572_v3 = vpop.f32.mrb[113].mxu1  ;;  %v2765_v23 = vpop.f32.mrb[145].mxu0 }
 0x53b   : > { %v3011_v42 = vmax.f32 %v3010_v29, %v2572_v3  ;;  %v3085_v9 = vmax.f32 %v3084_v14, %v2765_v23  ;;  %v2574_v51 = vpop.f32.mrb[114].mxu1  ;;  %v2767_v32 = vpop.f32.mrb[146].mxu0 }
 0x53c   : > { %v2975_v35 = vmax.f32 %v2974_v4, %v2574_v51  ;;  %v3049_v0 = vmax.f32 %v3048_v58, %v2767_v32  ;;  %v2576_v31 = vpop.f32.mrb[115].mxu1  ;;  %v2769_v44 = vpop.f32.mrb[147].mxu0 }
 0x53d   : > { %v3012_v34 = vmax.f32 %v3011_v42, %v2576_v31  ;;  %v3086_v25 = vmax.f32 %v3085_v9, %v2769_v44 }
 0x541   : > { %v2580_v24 = vpop.f32.mrb[116].mxu1  ;;  %v2773_v54 = vpop.f32.mrb[148].mxu0 }
 0x542   : > { %v2976_v40 = vmax.f32 %v2975_v35, %v2580_v24  ;;  %v3050_v15 = vmax.f32 %v3049_v0, %v2773_v54  ;;  %v2582_v13 = vpop.f32.mrb[117].mxu1  ;;  %v2775_v22 = vpop.f32.mrb[149].mxu0 }
 0x543   : > { %v3013_v17 = vmax.f32 %v3012_v34, %v2582_v13  ;;  %v3087_v39 = vmax.f32 %v3086_v25, %v2775_v22  ;;  %v2584_v1 = vpop.f32.mrb[118].mxu1  ;;  %v2777_v46 = vpop.f32.mrb[150].mxu0 }
 0x544   : > { %v2977_v8 = vmax.f32 %v2976_v40, %v2584_v1  ;;  %v3051_v28 = vmax.f32 %v3050_v15, %v2777_v46  ;;  %v2586_v60 = vpop.f32.mrb[119].mxu1  ;;  %v2779_v21 = vpop.f32.mrb[151].mxu0 }
 0x545   : > { %v3014_v43 = vmax.f32 %v3013_v17, %v2586_v60  ;;  %v3088_v63 = vmax.f32 %v3087_v39, %v2779_v21 }
 0x549   : > { %v2590_v55 = vpop.f32.mrb[120].mxu1  ;;  %v2783_v33 = vpop.f32.mrb[152].mxu0 }
 0x54a   : > { %v2978_v56 = vmax.f32 %v2977_v8, %v2590_v55  ;;  %v3052_v61 = vmax.f32 %v3051_v28, %v2783_v33  ;;  %v2592_v38 = vpop.f32.mrb[121].mxu1  ;;  %v2785_v53 = vpop.f32.mrb[153].mxu0 }
 0x54b   : > { %v3015_v26 = vmax.f32 %v3014_v43, %v2592_v38  ;;  %v3089_v52 = vmax.f32 %v3088_v63, %v2785_v53  ;;  %v2594_v5 = vpop.f32.mrb[122].mxu1  ;;  %v2787_v2 = vpop.f32.mrb[154].mxu0  ;;  %v3147_v53 = vrot.slane %v3139_v18, %v7655_v6 }
 0x54c   : > { %v2979_v19 = vmax.f32 %v2978_v56, %v2594_v5  ;;  %v3053_v27 = vmax.f32 %v3052_v61, %v2787_v2  ;;  %v2596_v37 = vpop.f32.mrb[123].mxu1  ;;  %v2789_v36 = vpop.f32.mrb[155].mxu0  ;;  %v3293_v2 = vld [vmem:[#allocation15 + $0x400] sm:$0xff] }
 0x54d   : > { %v3016_v16 = vmax.f32 %v3015_v26, %v2596_v37  ;;  %v3090_v7 = vmax.f32 %v3089_v52, %v2789_v36  ;;  %v3163_v52 = vld [vmem:[#allocation14] sm:$0xff]  ;;  %v3299_v37 = vld [vmem:[#allocation15 + $0x430] sm:$0xff] }
 0x551   : > { %v2600_v10 = vpop.f32.mrb[124].mxu1  ;;  %v2793_v12 = vpop.f32.mrb[156].mxu0 }
 0x552   : > { %v2980_v30 = vmax.f32 %v2979_v19, %v2600_v10  ;;  %v3054_v49 = vmax.f32 %v3053_v27, %v2793_v12  ;;  %v2602_v59 = vpop.f32.mrb[125].mxu1  ;;  %v2795_v11 = vpop.f32.mrb[157].mxu0  ;;  %v3297_v19 = vld [vmem:[#allocation15 + $0x420] sm:$0xff]  ;;  %v3295_v27 = vld [vmem:[#allocation15 + $0x410] sm:$0xff]  ;;  %v3306_v10 = vld [vmem:[#allocation15 + $0x468] sm:$0xff] }
 0x553   : > { %v3017_v29 = vmax.f32 %v3016_v16, %v2602_v59  ;;  %v3091_v14 = vmax.f32 %v3090_v7, %v2795_v11  ;;  %v2604_v62 = vpop.f32.mrb[126].mxu1  ;;  %v2797_v57 = vpop.f32.mrb[158].mxu0  ;;  %v3302_v16 = vld [vmem:[#allocation15 + $0x448] sm:$0xff]  ;;  %v3693_v7 = vsub.s32 3, %v7167_v41  ;;  %v3304_v12 = vld [vmem:[#allocation15 + $0x458] sm:$0xff]  ;;  %v5201_v50 = vpack.c.bf16 %v3297_v19, %v3293_v2  ;;  %v3305_v59 = vld [vmem:[#allocation15 + $0x460] sm:$0xff] }
 0x554   : > { %v2981_v4 = vmax.f32 %v2980_v30, %v2604_v62  ;;  %v3055_v58 = vmax.f32 %v3054_v49, %v2797_v57  ;;  %v2606_v3 = vpop.f32.mrb[127].mxu1  ;;  %v2799_v23 = vpop.f32.mrb[159].mxu0  ;;  %v3308_v30 = vld [vmem:[#allocation15 + $0x478] sm:$0xff]  ;;  %v5457_v18 = vpack.c.bf16 %v3299_v37, %v3295_v27  ;;  %v3301_v49 = vld [vmem:[#allocation15 + $0x440] sm:$0xff]  ;;  %v3303_v11 = vld [vmem:[#allocation15 + $0x450] sm:$0xff]  ;;  %v5203_v62 = vpack.c.bf16 %v3306_v10, %v3302_v16 }
 0x555   : > { %v3018_v42 = vmax.f32 %v3017_v29, %v2606_v3  ;;  %v3092_v9 = vmax.f32 %v3091_v14, %v2799_v23  ;;  %v3307_v29 = vld [vmem:[#allocation15 + $0x470] sm:$0xff]  ;;  %v3310_v14 = vld [vmem:[#allocation15 + $0x488] sm:$0xff]  ;;  %v5459_v57 = vpack.c.bf16 %v3308_v30, %v3304_v12  ;;  %v3316_v3 = vld [vmem:[#allocation15 + $0x4b8] sm:$0xff] }
 0x556   : > { %v2982_v51 = vrot.slane %v2981_v4, 4  ;;  %v3056_v32 = vrot.slane %v3055_v58, 4  ;;  %v3340_v2 = vld [vmem:[#allocation15 + $0x578] sm:$0xff]  ;;  %v3333_v37 = vld [vmem:[#allocation15 + $0x540] sm:$0xff]  ;;  %v3335_v30 = vld [vmem:[#allocation15 + $0x550] sm:$0xff] }
 0x557   : > { %v3019_v35 = vrot.slane %v3018_v42, 4  ;;  %v3093_v0 = vrot.slane %v3092_v9, 4  ;;  %v3337_v16 = vld [vmem:[#allocation15 + $0x560] sm:$0xff] }
 0x558   : > { %v2983_v31 = vmax.f32 %v2981_v4, %v2982_v51  ;;  %v3057_v44 = vmax.f32 %v3055_v58, %v3056_v32  ;;  %v3314_v4 = vld [vmem:[#allocation15 + $0x4a8] sm:$0xff]  ;;  %v3312_v58 = vld [vmem:[#allocation15 + $0x498] sm:$0xff]  ;;  %v3309_v51 = vld [vmem:[#allocation15 + $0x480] sm:$0xff] }
 0x559   : > { %v3020_v34 = vmax.f32 %v3018_v42, %v3019_v35  ;;  %v3094_v25 = vmax.f32 %v3092_v9, %v3093_v0  ;;  %v5205_v42 = vpack.c.bf16 %v3305_v59, %v3301_v49  ;;  %v5461_v9 = vpack.c.bf16 %v3307_v29, %v3303_v11  ;;  %v3313_v32 = vld [vmem:[#allocation15 + $0x4a0] sm:$0xff]  ;;  %v3348_v49 = vld [vmem:[#allocation15 + $0x5b8] sm:$0xff] }
 0x55a   : > { %v2984_v24 = vrot.slane %v2983_v31, 2  ;;  %v3058_v54 = vrot.slane %v3057_v44, 2  ;;  %v5207_v35 = vpack.c.bf16 %v3314_v4, %v3310_v14  ;;  %v5463_v0 = vpack.c.bf16 %v3316_v3, %v3312_v58  ;;  %v3341_v29 = vld [vmem:[#allocation15 + $0x580] sm:$0xff]  ;;  %v3343_v4 = vld [vmem:[#allocation15 + $0x590] sm:$0xff]  ;;  %v3350_v3 = vld [vmem:[#allocation15 + $0x5c8] sm:$0xff] }
 0x55b   : > { %v3021_v40 = vrot.slane %v3020_v34, 2  ;;  %v3095_v15 = vrot.slane %v3094_v25, 2  ;;  %v5221_v59 = vpack.c.bf16 %v3337_v16, %v3333_v37  ;;  %v3345_v14 = vld [vmem:[#allocation15 + $0x5a0] sm:$0xff]  ;;  %v3347_v58 = vld [vmem:[#allocation15 + $0x5b0] sm:$0xff] }
 0x55c   : > { %v2985_v13 = vmax.f32 %v2983_v31, %v2984_v24  ;;  %v3059_v22 = vmax.f32 %v3057_v44, %v3058_v54  ;;  %v3311_v31 = vld [vmem:[#allocation15 + $0x490] sm:$0xff]  ;;  %v3320_v24 = vld [vmem:[#allocation15 + $0x4d8] sm:$0xff] }
 0x55d   : > { %v3022_v17 = vmax.f32 %v3020_v34, %v3021_v40  ;;  %v3096_v39 = vmax.f32 %v3094_v25, %v3095_v15  ;;  %v3315_v44 = vld [vmem:[#allocation15 + $0x4b0] sm:$0xff]  ;;  %v3318_v34 = vld [vmem:[#allocation15 + $0x4c8] sm:$0xff]  ;;  %v3324_v54 = vld [vmem:[#allocation15 + $0x4f8] sm:$0xff]  ;;  %v5209_v40 = vpack.c.bf16 %v3313_v32, %v3309_v51  ;;  %v5225_v51 = vpack.c.bf16 %v3345_v14, %v3341_v29 }
 0x55e   : > { %v2986_v1 = vrot.slane %v2985_v13, 1  ;;  %v3060_v46 = vrot.slane %v3059_v22, 1  ;;  %v3322_v25 = vld [vmem:[#allocation15 + $0x4e8] sm:$0xff]  ;;  %v5465_v15 = vpack.c.bf16 %v3315_v44, %v3311_v31  ;;  %v5481_v32 = vpack.c.bf16 %v3347_v58, %v3343_v4 }
 0x55f   : > { %v3023_v8 = vrot.slane %v3022_v17, 1  ;;  %v3097_v28 = vrot.slane %v3096_v39, 1 }
 0x560   : > { %v2987_v60 = vmax.f32 %v2985_v13, %v2986_v1  ;;  %v3061_v21 = vmax.f32 %v3059_v22, %v3060_v46  ;;  %v3317_v13 = vld [vmem:[#allocation15 + $0x4c0] sm:$0xff]  ;;  %v3319_v1 = vld [vmem:[#allocation15 + $0x4d0] sm:$0xff] }
 0x561   : > { %v3024_v43 = vmax.f32 %v3022_v17, %v3023_v8  ;;  %v3098_v63 = vmax.f32 %v3096_v39, %v3097_v28  ;;  %v3321_v22 = vld [vmem:[#allocation15 + $0x4e0] sm:$0xff]  ;;  %v5211_v17 = vpack.c.bf16 %v3322_v25, %v3318_v34  ;;  %v5467_v39 = vpack.c.bf16 %v3324_v54, %v3320_v24  ;;  %v3323_v46 = vld [vmem:[#allocation15 + $0x4f0] sm:$0xff]  ;;  %v3326_v8 = vld [vmem:[#allocation15 + $0x508] sm:$0xff] }
 0x562   : > { %v3330_v28 = vld [vmem:[#allocation15 + $0x528] sm:$0xff]  ;;  %v3351_v34 = vld [vmem:[#allocation15 + $0x5d0] sm:$0xff] }
 0x563   : > { %v3109_v55 = vcombine.low %v2987_v60, %v3024_v43  ;;  %v3110_v33 = vcombine.low %v3061_v21, %v3098_v63  ;;  %v3328_v60 = vld [vmem:[#allocation15 + $0x518] sm:$0xff]  ;;  %v5213_v43 = vpack.c.bf16 %v3321_v22, %v3317_v13  ;;  %v5469_v63 = vpack.c.bf16 %v3323_v46, %v3319_v1  ;;  %v3355_v25 = vld [vmem:[#allocation15 + $0x5f0] sm:$0xff]  ;;  %v3358_v24 = vld [vmem:[#allocation15 + $0x608] sm:$0xff] }
 0x564   : > { %v3332_v21 = vld [vmem:[#allocation15 + $0x538] sm:$0xff]  ;;  %v3362_v54 = vld [vmem:[#allocation15 + $0x628] sm:$0xff]  ;;  %v5485_v22 = vpack.c.bf16 %v3355_v25, %v3351_v34 }
 0x565   : > { %v3131_v56 = vrot.slane %v3109_v55, %v7655_v6  ;;  %v3138_v61 = vrot.slane %v3110_v33, %v7655_v6  ;;  %v3325_v55 = vld [vmem:[#allocation15 + $0x500] sm:$0xff]  ;;  %v5231_v1 = vpack.c.bf16 %v3362_v54, %v3358_v24  ;;  %v3391_v24 = vld [vmem:[#allocation15 + $0x710] sm:$0xff] }
 0x566   : > { %v3329_v33 = vld [vmem:[#allocation15 + $0x520] sm:$0xff]  ;;  %v3395_v54 = vld [vmem:[#allocation15 + $0x730] sm:$0xff] }
 0x567   : > { %v3140_v38 = vcombine.low %v3131_v56, %v3138_v61  ;;  %v5215_v56 = vpack.c.bf16 %v3330_v28, %v3326_v8  ;;  %v5471_v61 = vpack.c.bf16 %v3332_v21, %v3328_v60  ;;  %v5217_v19 = vpack.c.bf16 %v3329_v33, %v3325_v55  ;;  %v3359_v8 = vld [vmem:[#allocation15 + $0x610] sm:$0xff]  ;;  %v3366_v60 = vld [vmem:[#allocation15 + $0x648] sm:$0xff] }
 0x568   : > { %v3363_v28 = vld [vmem:[#allocation15 + $0x630] sm:$0xff]  ;;  %v3370_v21 = vld [vmem:[#allocation15 + $0x668] sm:$0xff] }
 0x569   : > { %v3154_v26 = vrot.slane %v3140_v38, %v7655_v6  ;;  %v3327_v38 = vld [vmem:[#allocation15 + $0x510] sm:$0xff]  ;;  %v5489_v33 = vpack.c.bf16 %v3363_v28, %v3359_v8 }
 0x56b   : > { %v3155_v5 = vcombine.low %v3147_v53, %v3154_v26  ;;  %v3331_v53 = vld [vmem:[#allocation15 + $0x530] sm:$0xff]  ;;  %v3334_v26 = vld [vmem:[#allocation15 + $0x548] sm:$0xff] }
 0x56c   : > { %v5473_v27 = vpack.c.bf16 %v3331_v53, %v3327_v38  ;;  %v5235_v38 = vpack.c.bf16 %v3370_v21, %v3366_v60  ;;  %v3399_v60 = vld [vmem:[#allocation15 + $0x750] sm:$0xff] }
 0x56d   : > { %v7672_v36 = vadd.f32 %v3163_v52, %v3155_v5  ;;  %v3338_v52 = vld [vmem:[#allocation15 + $0x568] sm:$0xff]  ;;  %v3336_v5 = vld [vmem:[#allocation15 + $0x558] sm:$0xff]  ;;  %v3403_v21 = vld [vmem:[#allocation15 + $0x770] sm:$0xff] }
 0x56e   : > { %v5219_v10 = vpack.c.bf16 %v3338_v52, %v3334_v26  ;;  %v5475_v12 = vpack.c.bf16 %v3340_v2, %v3336_v5  ;;  %v3367_v26 = vld [vmem:[#allocation15 + $0x650] sm:$0xff]  ;;  %v3374_v5 = vld [vmem:[#allocation15 + $0x688] sm:$0xff] }
 0x56f   : > { %v3686_v20 = vrot.slane %v7672_v36, %v7177_v45  ;;  %v3682_v6 = vrot.slane %v7672_v36, %v7184_v48  ;;  %v3694_v23 = vrot.slane %v7672_v36, %v3693_v7  ;;  %v3371_v52 = vld [vmem:[#allocation15 + $0x670] sm:$0xff]  ;;  %v3378_v2 = vld [vmem:[#allocation15 + $0x6a8] sm:$0xff] }
 0x570   : > { %v5493_v16 = vpack.c.bf16 %v3371_v52, %v3367_v26 }
 0x571   : > { %3804 = vmatprep.mubr.f32.mxu1 %v3686_v20  ;;  %4088 = vmatprep.mubr.f32.mxu0 %v3686_v20  ;;  %v3339_v20 = vld [vmem:[#allocation15 + $0x570] sm:$0xff] }
 0x572   : > { %3805 = vmatmul.mubr.f32.vlgmr.msra.gmra.mrb[128].mxu1 %v3682_v6  ;;  %4089 = vmatmul.mubr.f32.vlgmr.msra.gmra.mrb[160].mxu0 %v3682_v6  ;;  %v3342_v6 = vld [vmem:[#allocation15 + $0x588] sm:$0xff]  ;;  %v5477_v11 = vpack.c.bf16 %v3339_v20, %v3335_v30  ;;  %v5239_v30 = vpack.c.bf16 %v3378_v2, %v3374_v5  ;;  %v3407_v5 = vld [vmem:[#allocation15 + $0x790] sm:$0xff] }
 0x573   : > { %5202 = vmatpush1.bf16.msra.mxu1 %v5201_v50  ;;  %5458 = vmatpush1.bf16.msra.mxu0 %v5457_v18  ;;  %v3346_v50 = vld [vmem:[#allocation15 + $0x5a8] sm:$0xff]  ;;  %v3344_v18 = vld [vmem:[#allocation15 + $0x598] sm:$0xff]  ;;  %v3411_v2 = vld [vmem:[#allocation15 + $0x7b0] sm:$0xff] }
 0x574   : > { %3875 = vmatprep.mubr.f32.mxu1 %v3694_v23  ;;  %4159 = vmatprep.mubr.f32.mxu0 %v3694_v23  ;;  %v3354_v23 = vld [vmem:[#allocation15 + $0x5e8] sm:$0xff] }
 0x575   : > { %5204 = vmatprep.subr.bf16.mxu1 %v5203_v62  ;;  %5460 = vmatprep.subr.bf16.mxu0 %v5459_v57  ;;  %v5223_v62 = vpack.c.bf16 %v3346_v50, %v3342_v6  ;;  %v5479_v57 = vpack.c.bf16 %v3348_v49, %v3344_v18  ;;  %v5227_v31 = vpack.c.bf16 %v3354_v23, %v3350_v3  ;;  %v3375_v6 = vld [vmem:[#allocation15 + $0x690] sm:$0xff]  ;;  %v3382_v18 = vld [vmem:[#allocation15 + $0x6c8] sm:$0xff] }
 0x576   : > { %v3379_v50 = vld [vmem:[#allocation15 + $0x6b0] sm:$0xff]  ;;  %v3386_v49 = vld [vmem:[#allocation15 + $0x6e8] sm:$0xff] }
 0x577   : > { %5206 = vmatpush1.bf16.msra.mxu1 %v5205_v42  ;;  %5462 = vmatpush1.bf16.msra.mxu0 %v5461_v9  ;;  %v3352_v42 = vld [vmem:[#allocation15 + $0x5d8] sm:$0xff]  ;;  %v5497_v14 = vpack.c.bf16 %v3379_v50, %v3375_v6  ;;  %v5243_v4 = vpack.c.bf16 %v3386_v49, %v3382_v18  ;;  %v3383_v3 = vld [vmem:[#allocation15 + $0x6d0] sm:$0xff] }
 0x578   : > { %5208 = vmatprep.subr.bf16.mxu1 %v5207_v35  ;;  %5464 = vmatprep.subr.bf16.mxu0 %v5463_v0  ;;  %v3356_v9 = vld [vmem:[#allocation15 + $0x5f8] sm:$0xff]  ;;  %v3349_v35 = vld [vmem:[#allocation15 + $0x5c0] sm:$0xff]  ;;  %v3387_v23 = vld [vmem:[#allocation15 + $0x6f0] sm:$0xff] }
 0x579   : > { %v3353_v0 = vld [vmem:[#allocation15 + $0x5e0] sm:$0xff]  ;;  %v5483_v44 = vpack.c.bf16 %v3356_v9, %v3352_v42  ;;  %v3390_v42 = vld [vmem:[#allocation15 + $0x708] sm:$0xff]  ;;  %v3415_v18 = vld [vmem:[#allocation15 + $0x7d0] sm:$0xff] }
 0x57a   : > { %v5229_v13 = vpack.c.bf16 %v3353_v0, %v3349_v35  ;;  %v3394_v9 = vld [vmem:[#allocation15 + $0x728] sm:$0xff]  ;;  %v5501_v0 = vpack.c.bf16 %v3387_v23, %v3383_v3  ;;  %v3419_v49 = vld [vmem:[#allocation15 + $0x7f0] sm:$0xff]  ;;  %v3421_v3 = vld [vmem:[#allocation15 + $0x800] sm:$0xff] }
 0x57b   : > { %5210 = vmatpush1.bf16.msra.mxu1 %v5209_v40  ;;  %5466 = vmatpush1.bf16.msra.mxu0 %v5465_v15  ;;  %v3360_v40 = vld [vmem:[#allocation15 + $0x618] sm:$0xff]  ;;  %v5247_v34 = vpack.c.bf16 %v3394_v9, %v3390_v42  ;;  %v3425_v23 = vld [vmem:[#allocation15 + $0x820] sm:$0xff]  ;;  %v3701_v42 = vsub.s32 5, %v7167_v41  ;;  %v3423_v9 = vld [vmem:[#allocation15 + $0x810] sm:$0xff] }
 0x57c   : > { %5212 = vmatprep.subr.bf16.mxu1 %v5211_v17  ;;  %5468 = vmatprep.subr.bf16.mxu0 %v5467_v39  ;;  %v3364_v15 = vld [vmem:[#allocation15 + $0x638] sm:$0xff]  ;;  %v3357_v17 = vld [vmem:[#allocation15 + $0x600] sm:$0xff] }
 0x57d   : > { %v3361_v39 = vld [vmem:[#allocation15 + $0x620] sm:$0xff]  ;;  %v5487_v46 = vpack.c.bf16 %v3364_v15, %v3360_v40  ;;  %v3398_v40 = vld [vmem:[#allocation15 + $0x748] sm:$0xff] }
 0x57e   : > { %v5233_v55 = vpack.c.bf16 %v3361_v39, %v3357_v17  ;;  %v3402_v15 = vld [vmem:[#allocation15 + $0x768] sm:$0xff]  ;;  %v5505_v39 = vpack.c.bf16 %v3395_v54, %v3391_v24  ;;  %v3429_v24 = vld [vmem:[#allocation15 + $0x840] sm:$0xff] }
 0x57f   : > { %5214 = vmatpush1.bf16.msra.mxu1 %v5213_v43  ;;  %5470 = vmatpush1.bf16.msra.mxu0 %v5469_v63  ;;  %v3368_v43 = vld [vmem:[#allocation15 + $0x658] sm:$0xff]  ;;  %v5251_v8 = vpack.c.bf16 %v3402_v15, %v3398_v40  ;;  %v3433_v54 = vld [vmem:[#allocation15 + $0x860] sm:$0xff]  ;;  %v3431_v40 = vld [vmem:[#allocation15 + $0x850] sm:$0xff]  ;;  %v3702_v15 = vrot.slane %v7672_v36, %v3701_v42 }
 0x580   : > { %5216 = vmatprep.subr.bf16.mxu1 %v5215_v56  ;;  %5472 = vmatprep.subr.bf16.mxu0 %v5471_v61  ;;  %v3372_v63 = vld [vmem:[#allocation15 + $0x678] sm:$0xff]  ;;  %v3365_v56 = vld [vmem:[#allocation15 + $0x640] sm:$0xff] }
 0x581   : > { %v3369_v61 = vld [vmem:[#allocation15 + $0x660] sm:$0xff]  ;;  %v5491_v53 = vpack.c.bf16 %v3372_v63, %v3368_v43  ;;  %v3406_v43 = vld [vmem:[#allocation15 + $0x788] sm:$0xff] }
 0x582   : > { %v5237_v37 = vpack.c.bf16 %v3369_v61, %v3365_v56  ;;  %v3410_v63 = vld [vmem:[#allocation15 + $0x7a8] sm:$0xff]  ;;  %v5509_v61 = vpack.c.bf16 %v3403_v21, %v3399_v60 }
 0x583   : > { %5218 = vmatpush1.bf16.msra.mxu1 %v5217_v19  ;;  %5474 = vmatpush1.bf16.msra.mxu0 %v5473_v27  ;;  %v3376_v19 = vld [vmem:[#allocation15 + $0x698] sm:$0xff]  ;;  %v5255_v26 = vpack.c.bf16 %v3410_v63, %v3406_v43  ;;  %v3437_v43 = vld [vmem:[#allocation15 + $0x880] sm:$0xff] }
 0x584   : > { %5220 = vmatprep.subr.bf16.mxu1 %v5219_v10  ;;  %5476 = vmatprep.subr.bf16.mxu0 %v5475_v12  ;;  %v3380_v27 = vld [vmem:[#allocation15 + $0x6b8] sm:$0xff]  ;;  %v3373_v10 = vld [vmem:[#allocation15 + $0x680] sm:$0xff] }
 0x585   : > { %v3377_v12 = vld [vmem:[#allocation15 + $0x6a0] sm:$0xff]  ;;  %v5495_v20 = vpack.c.bf16 %v3380_v27, %v3376_v19  ;;  %v3414_v19 = vld [vmem:[#allocation15 + $0x7c8] sm:$0xff] }
 0x586   : > { %v5241_v29 = vpack.c.bf16 %v3377_v12, %v3373_v10  ;;  %v3418_v27 = vld [vmem:[#allocation15 + $0x7e8] sm:$0xff]  ;;  %v5513_v12 = vpack.c.bf16 %v3411_v2, %v3407_v5  ;;  %v3441_v63 = vld [vmem:[#allocation15 + $0x8a0] sm:$0xff] }
 0x587   : > { %5222 = vmatpush1.bf16.msra.mxu1 %v5221_v59  ;;  %5478 = vmatpush1.bf16.msra.mxu0 %v5477_v11  ;;  %v3384_v59 = vld [vmem:[#allocation15 + $0x6d8] sm:$0xff]  ;;  %v5259_v6 = vpack.c.bf16 %v3418_v27, %v3414_v19  ;;  %v3445_v19 = vld [vmem:[#allocation15 + $0x8c0] sm:$0xff] }
 0x588   : > { %5224 = vmatprep.subr.bf16.mxu1 %v5223_v62  ;;  %5480 = vmatprep.subr.bf16.mxu0 %v5479_v57  ;;  %v3388_v11 = vld [vmem:[#allocation15 + $0x6f8] sm:$0xff]  ;;  %v3381_v62 = vld [vmem:[#allocation15 + $0x6c0] sm:$0xff] }
 0x589   : > { %v3385_v57 = vld [vmem:[#allocation15 + $0x6e0] sm:$0xff]  ;;  %v5499_v58 = vpack.c.bf16 %v3388_v11, %v3384_v59  ;;  %v3422_v59 = vld [vmem:[#allocation15 + $0x808] sm:$0xff] }
 0x58a   : > { %v5245_v35 = vpack.c.bf16 %v3385_v57, %v3381_v62  ;;  %v3426_v11 = vld [vmem:[#allocation15 + $0x828] sm:$0xff]  ;;  %v5517_v57 = vpack.c.bf16 %v3419_v49, %v3415_v18  ;;  %v3449_v27 = vld [vmem:[#allocation15 + $0x8e0] sm:$0xff] }
 0x58b   : > { %5226 = vmatpush1.bf16.msra.mxu1 %v5225_v51  ;;  %5482 = vmatpush1.bf16.msra.mxu0 %v5481_v32  ;;  %v3392_v51 = vld [vmem:[#allocation15 + $0x718] sm:$0xff] }
 0x58c   : > { %5228 = vmatprep.subr.bf16.mxu1 %v5227_v31  ;;  %5484 = vmatprep.subr.bf16.mxu0 %v5483_v44  ;;  %v3396_v32 = vld [vmem:[#allocation15 + $0x738] sm:$0xff]  ;;  %v3389_v31 = vld [vmem:[#allocation15 + $0x700] sm:$0xff] }
 0x58d   : > { %v3393_v44 = vld [vmem:[#allocation15 + $0x720] sm:$0xff]  ;;  %v5503_v25 = vpack.c.bf16 %v3396_v32, %v3392_v51  ;;  %v3427_v51 = vld [vmem:[#allocation15 + $0x830] sm:$0xff]  ;;  %v3430_v32 = vld [vmem:[#allocation15 + $0x848] sm:$0xff] }
 0x58e   : > { %v5249_v17 = vpack.c.bf16 %v3393_v44, %v3389_v31  ;;  %v3436_v31 = vld [vmem:[#allocation15 + $0x878] sm:$0xff]  ;;  %v5265_v44 = vpack.c.bf16 %v3425_v23, %v3421_v3 }
 0x58f   : > { %5230 = vmatpush1.bf16.msra.mxu1 %v5229_v13  ;;  %5486 = vmatpush1.bf16.msra.mxu0 %v5485_v22  ;;  %v3400_v13 = vld [vmem:[#allocation15 + $0x758] sm:$0xff] }
 0x590   : > { %5232 = vmatprep.subr.bf16.mxu1 %v5231_v1  ;;  %5488 = vmatprep.subr.bf16.mxu0 %v5487_v46  ;;  %v3404_v22 = vld [vmem:[#allocation15 + $0x778] sm:$0xff]  ;;  %v3397_v1 = vld [vmem:[#allocation15 + $0x740] sm:$0xff] }
 0x591   : > { %v3401_v46 = vld [vmem:[#allocation15 + $0x760] sm:$0xff]  ;;  %v5507_v28 = vpack.c.bf16 %v3404_v22, %v3400_v13  ;;  %v3468_v3 = vld [vmem:[#allocation15 + $0x978] sm:$0xff] }
 0x592   : > { %v5253_v56 = vpack.c.bf16 %v3401_v46, %v3397_v1  ;;  %v3442_v1 = vld [vmem:[#allocation15 + $0x8a8] sm:$0xff]  ;;  %v3440_v46 = vld [vmem:[#allocation15 + $0x898] sm:$0xff] }
 0x593   : > { %5234 = vmatpush1.bf16.msra.mxu1 %v5233_v55  ;;  %5490 = vmatpush1.bf16.msra.mxu0 %v5489_v33  ;;  %v3408_v55 = vld [vmem:[#allocation15 + $0x798] sm:$0xff] }
 0x594   : > { %5236 = vmatprep.subr.bf16.mxu1 %v5235_v38  ;;  %5492 = vmatprep.subr.bf16.mxu0 %v5491_v53  ;;  %v3412_v33 = vld [vmem:[#allocation15 + $0x7b8] sm:$0xff]  ;;  %v3405_v38 = vld [vmem:[#allocation15 + $0x780] sm:$0xff] }
 0x595   : > { %v3409_v53 = vld [vmem:[#allocation15 + $0x7a0] sm:$0xff]  ;;  %v5511_v52 = vpack.c.bf16 %v3412_v33, %v3408_v55  ;;  %v3439_v55 = vld [vmem:[#allocation15 + $0x890] sm:$0xff] }
 0x596   : > { %v5257_v10 = vpack.c.bf16 %v3409_v53, %v3405_v38  ;;  %v3450_v38 = vld [vmem:[#allocation15 + $0x8e8] sm:$0xff]  ;;  %v3448_v53 = vld [vmem:[#allocation15 + $0x8d8] sm:$0xff] }
 0x597   : > { %5238 = vmatpush1.bf16.msra.mxu1 %v5237_v37  ;;  %5494 = vmatpush1.bf16.msra.mxu0 %v5493_v16  ;;  %v3416_v37 = vld [vmem:[#allocation15 + $0x7d8] sm:$0xff] }
 0x598   : > { %5240 = vmatprep.subr.bf16.mxu1 %v5239_v30  ;;  %5496 = vmatprep.subr.bf16.mxu0 %v5495_v20  ;;  %v3420_v16 = vld [vmem:[#allocation15 + $0x7f8] sm:$0xff]  ;;  %v3413_v30 = vld [vmem:[#allocation15 + $0x7c0] sm:$0xff] }
 0x599   : > { %v3417_v20 = vld [vmem:[#allocation15 + $0x7e0] sm:$0xff]  ;;  %v5515_v50 = vpack.c.bf16 %v3420_v16, %v3416_v37  ;;  %v3447_v37 = vld [vmem:[#allocation15 + $0x8d0] sm:$0xff] }
 0x59a   : > { %v5261_v62 = vpack.c.bf16 %v3417_v20, %v3413_v30  ;;  %v3458_v30 = vld [vmem:[#allocation15 + $0x928] sm:$0xff]  ;;  %v3456_v20 = vld [vmem:[#allocation15 + $0x918] sm:$0xff] }
 0x59b   : > { %5242 = vmatpush1.bf16.msra.mxu1 %v5241_v29  ;;  %5498 = vmatpush1.bf16.msra.mxu0 %v5497_v14  ;;  %v3424_v29 = vld [vmem:[#allocation15 + $0x818] sm:$0xff] }
 0x59c   : > { %5244 = vmatprep.subr.bf16.mxu1 %v5243_v4  ;;  %5500 = vmatprep.subr.bf16.mxu0 %v5499_v58  ;;  %v3428_v14 = vld [vmem:[#allocation15 + $0x838] sm:$0xff]  ;;  %v5263_v4 = vpack.c.bf16 %v3426_v11, %v3422_v59  ;;  %v3453_v59 = vld [vmem:[#allocation15 + $0x900] sm:$0xff] }
 0x59d   : > { %v5519_v58 = vpack.c.bf16 %v3428_v14, %v3424_v29  ;;  %v3457_v11 = vld [vmem:[#allocation15 + $0x920] sm:$0xff]  ;;  %v3455_v29 = vld [vmem:[#allocation15 + $0x910] sm:$0xff] }
 0x59e   : > { %v5281_v23 = vpack.c.bf16 %v3457_v11, %v3453_v59 }
 0x59f   : > { %5246 = vmatpush1.bf16.msra.mxu1 %v5245_v35  ;;  %5502 = vmatpush1.bf16.msra.mxu0 %v5501_v0  ;;  %v3434_v35 = vld [vmem:[#allocation15 + $0x868] sm:$0xff]  ;;  %v3432_v0 = vld [vmem:[#allocation15 + $0x858] sm:$0xff] }
 0x5a0   : > { %5248 = vmatprep.subr.bf16.mxu1 %v5247_v34  ;;  %5504 = vmatprep.subr.bf16.mxu0 %v5503_v25  ;;  %v3690_v34 = vrot.slane %v7672_v36, %v7181_v47  ;;  %v5521_v25 = vpack.c.bf16 %v3427_v51, %v3423_v9  ;;  %v5267_v13 = vpack.c.bf16 %v3434_v35, %v3430_v32  ;;  %v3461_v51 = vld [vmem:[#allocation15 + $0x940] sm:$0xff]  ;;  %v3463_v35 = vld [vmem:[#allocation15 + $0x950] sm:$0xff] }
 0x5a1   : > { %v5523_v22 = vpack.c.bf16 %v3436_v31, %v3432_v0  ;;  %v3465_v32 = vld [vmem:[#allocation15 + $0x960] sm:$0xff]  ;;  %v3467_v31 = vld [vmem:[#allocation15 + $0x970] sm:$0xff] }
 0x5a3   : > { %5250 = vmatpush1.bf16.msra.mxu1 %v5249_v17  ;;  %5506 = vmatpush1.bf16.msra.mxu0 %v5505_v39  ;;  %v3435_v17 = vld [vmem:[#allocation15 + $0x870] sm:$0xff]  ;;  %v3438_v39 = vld [vmem:[#allocation15 + $0x888] sm:$0xff] }
 0x5a4   : > { %5252 = vmatprep.subr.bf16.mxu1 %v5251_v8  ;;  %5508 = vmatprep.subr.bf16.mxu0 %v5507_v28  ;;  %v3444_v8 = vld [vmem:[#allocation15 + $0x8b8] sm:$0xff]  ;;  %v5269_v28 = vpack.c.bf16 %v3433_v54, %v3429_v24  ;;  %v5525_v60 = vpack.c.bf16 %v3435_v17, %v3431_v40  ;;  %v5271_v21 = vpack.c.bf16 %v3442_v1, %v3438_v39  ;;  %v3471_v17 = vld [vmem:[#allocation15 + $0x990] sm:$0xff] }
 0x5a5   : > { %v5527_v33 = vpack.c.bf16 %v3444_v8, %v3440_v46  ;;  %v3476_v24 = vld [vmem:[#allocation15 + $0x9b8] sm:$0xff]  ;;  %v5285_v54 = vpack.c.bf16 %v3465_v32, %v3461_v51  ;;  %v5541_v40 = vpack.c.bf16 %v3467_v31, %v3463_v35  ;;  %v3475_v1 = vld [vmem:[#allocation15 + $0x9b0] sm:$0xff]  ;;  %v3478_v46 = vld [vmem:[#allocation15 + $0x9c8] sm:$0xff] }
 0x5a6   : > { %v3482_v8 = vld [vmem:[#allocation15 + $0x9e8] sm:$0xff]  ;;  %v3501_v35 = vld [vmem:[#allocation15 + $0xa80] sm:$0xff]  ;;  %v3503_v31 = vld [vmem:[#allocation15 + $0xa90] sm:$0xff] }
 0x5a7   : > { %5254 = vmatpush1.bf16.msra.mxu1 %v5253_v56  ;;  %5510 = vmatpush1.bf16.msra.mxu0 %v5509_v61  ;;  %v3443_v56 = vld [vmem:[#allocation15 + $0x8b0] sm:$0xff]  ;;  %v3446_v61 = vld [vmem:[#allocation15 + $0x8c8] sm:$0xff] }
 0x5a8   : > { %5256 = vmatprep.subr.bf16.mxu1 %v5255_v26  ;;  %5512 = vmatprep.subr.bf16.mxu0 %v5511_v52  ;;  %v3452_v26 = vld [vmem:[#allocation15 + $0x8f8] sm:$0xff]  ;;  %v5273_v52 = vpack.c.bf16 %v3441_v63, %v3437_v43  ;;  %v5529_v5 = vpack.c.bf16 %v3443_v56, %v3439_v55  ;;  %v5275_v2 = vpack.c.bf16 %v3450_v38, %v3446_v61  ;;  %v3477_v55 = vld [vmem:[#allocation15 + $0x9c0] sm:$0xff]  ;;  %v3479_v56 = vld [vmem:[#allocation15 + $0x9d0] sm:$0xff] }
 0x5a9   : > { %v5531_v16 = vpack.c.bf16 %v3452_v26, %v3448_v53  ;;  %v5545_v43 = vpack.c.bf16 %v3475_v1, %v3471_v17  ;;  %v5291_v63 = vpack.c.bf16 %v3482_v8, %v3478_v46  ;;  %v3483_v38 = vld [vmem:[#allocation15 + $0x9f0] sm:$0xff]  ;;  %v3486_v53 = vld [vmem:[#allocation15 + $0xa08] sm:$0xff]  ;;  %v3509_v17 = vld [vmem:[#allocation15 + $0xac0] sm:$0xff] }
 0x5aa   : > { %v3490_v26 = vld [vmem:[#allocation15 + $0xa28] sm:$0xff]  ;;  %v3511_v1 = vld [vmem:[#allocation15 + $0xad0] sm:$0xff] }
 0x5ab   : > { %5258 = vmatpush1.bf16.msra.mxu1 %v5257_v10  ;;  %5514 = vmatpush1.bf16.msra.mxu0 %v5513_v12  ;;  %v3451_v10 = vld [vmem:[#allocation15 + $0x8f0] sm:$0xff]  ;;  %v3454_v12 = vld [vmem:[#allocation15 + $0x908] sm:$0xff] }
 0x5ac   : > { %5260 = vmatprep.subr.bf16.mxu1 %v5259_v6  ;;  %5516 = vmatprep.subr.bf16.mxu0 %v5515_v50  ;;  %v3460_v6 = vld [vmem:[#allocation15 + $0x938] sm:$0xff]  ;;  %v5277_v50 = vpack.c.bf16 %v3449_v27, %v3445_v19  ;;  %v5533_v18 = vpack.c.bf16 %v3451_v10, %v3447_v37  ;;  %v5279_v49 = vpack.c.bf16 %v3458_v30, %v3454_v12  ;;  %v3485_v37 = vld [vmem:[#allocation15 + $0xa00] sm:$0xff]  ;;  %v3487_v10 = vld [vmem:[#allocation15 + $0xa10] sm:$0xff] }
 0x5ad   : > { %v5535_v14 = vpack.c.bf16 %v3460_v6, %v3456_v20  ;;  %v5549_v19 = vpack.c.bf16 %v3483_v38, %v3479_v56  ;;  %v5295_v27 = vpack.c.bf16 %v3490_v26, %v3486_v53  ;;  %v3491_v30 = vld [vmem:[#allocation15 + $0xa30] sm:$0xff]  ;;  %v3494_v20 = vld [vmem:[#allocation15 + $0xa48] sm:$0xff]  ;;  %v3517_v56 = vld [vmem:[#allocation15 + $0xb00] sm:$0xff] }
 0x5ae   : > { %v3498_v6 = vld [vmem:[#allocation15 + $0xa68] sm:$0xff]  ;;  %v5553_v59 = vpack.c.bf16 %v3491_v30, %v3487_v10  ;;  %v3515_v8 = vld [vmem:[#allocation15 + $0xaf0] sm:$0xff]  ;;  %v3525_v10 = vld [vmem:[#allocation15 + $0xb40] sm:$0xff] }
 0x5af   : > { %5262 = vmatpush1.bf16.msra.mxu1 %v5261_v62  ;;  %5518 = vmatpush1.bf16.msra.mxu0 %v5517_v57  ;;  %v3459_v62 = vld [vmem:[#allocation15 + $0x930] sm:$0xff]  ;;  %v3462_v57 = vld [vmem:[#allocation15 + $0x948] sm:$0xff]  ;;  %v5299_v11 = vpack.c.bf16 %v3498_v6, %v3494_v20 }
 0x5b0   : > { %5264 = vmatprep.subr.bf16.mxu1 %v5263_v4  ;;  %5520 = vmatprep.subr.bf16.mxu0 %v5519_v58  ;;  %v3466_v4 = vld [vmem:[#allocation15 + $0x968] sm:$0xff]  ;;  %v3464_v58 = vld [vmem:[#allocation15 + $0x958] sm:$0xff]  ;;  %v5537_v42 = vpack.c.bf16 %v3459_v62, %v3455_v29  ;;  %v3493_v29 = vld [vmem:[#allocation15 + $0xa40] sm:$0xff] }
 0x5b1   : > { %v5283_v9 = vpack.c.bf16 %v3466_v4, %v3462_v57  ;;  %v5539_v0 = vpack.c.bf16 %v3468_v3, %v3464_v58  ;;  %v3495_v62 = vld [vmem:[#allocation15 + $0xa50] sm:$0xff]  ;;  %v3502_v58 = vld [vmem:[#allocation15 + $0xa88] sm:$0xff] }
 0x5b2   : > { %3876 = vmatmul.mubr.f32.vlgmr.msra.gmra.mrb[128].mxu1 %v3690_v34  ;;  %4160 = vmatmul.mubr.f32.vlgmr.msra.gmra.mrb[160].mxu0 %v3690_v34  ;;  %v3474_v34 = vld [vmem:[#allocation15 + $0x9a8] sm:$0xff]  ;;  %v3499_v4 = vld [vmem:[#allocation15 + $0xa70] sm:$0xff] }
 0x5b3   : > { %5266 = vmatpush1.bf16.msra.mxu1 %v5265_v44  ;;  %3946 = vmatprep.mubr.f32.mxu1 %v3702_v15  ;;  %v3470_v44 = vld [vmem:[#allocation15 + $0x988] sm:$0xff]  ;;  %v5557_v51 = vpack.c.bf16 %v3499_v4, %v3495_v62  ;;  %v3519_v38 = vld [vmem:[#allocation15 + $0xb10] sm:$0xff]  ;;  %v3533_v62 = vld [vmem:[#allocation15 + $0xb80] sm:$0xff] }
 0x5b4   : > { %5522 = vmatpush1.bf16.msra.mxu0 %v5521_v25  ;;  %4230 = vmatprep.mubr.f32.mxu0 %v3702_v15  ;;  %v3472_v25 = vld [vmem:[#allocation15 + $0x998] sm:$0xff]  ;;  %v5287_v15 = vpack.c.bf16 %v3474_v34, %v3470_v44  ;;  %v3506_v3 = vld [vmem:[#allocation15 + $0xaa8] sm:$0xff]  ;;  %v3507_v34 = vld [vmem:[#allocation15 + $0xab0] sm:$0xff] }
 0x5b5   : > { %5268 = vmatprep.subr.bf16.mxu1 %v5267_v13  ;;  %5524 = vmatprep.subr.bf16.mxu0 %v5523_v22  ;;  %v3469_v13 = vld [vmem:[#allocation15 + $0x980] sm:$0xff]  ;;  %v5543_v39 = vpack.c.bf16 %v3476_v24, %v3472_v25  ;;  %v5303_v32 = vpack.c.bf16 %v3506_v3, %v3502_v58  ;;  %v3510_v25 = vld [vmem:[#allocation15 + $0xac8] sm:$0xff]  ;;  %v3523_v26 = vld [vmem:[#allocation15 + $0xb30] sm:$0xff] }
 0x5b6   : > { %v3473_v22 = vld [vmem:[#allocation15 + $0x9a0] sm:$0xff]  ;;  %v3514_v24 = vld [vmem:[#allocation15 + $0xae8] sm:$0xff]  ;;  %v3527_v30 = vld [vmem:[#allocation15 + $0xb50] sm:$0xff] }
 0x5b7   : > { %5270 = vmatpush1.bf16.msra.mxu1 %v5269_v28  ;;  %v3480_v28 = vld [vmem:[#allocation15 + $0x9d8] sm:$0xff]  ;;  %v3531_v6 = vld [vmem:[#allocation15 + $0xb70] sm:$0xff] }
 0x5b8   : > { %5526 = vmatpush1.bf16.msra.mxu0 %v5525_v60  ;;  %5272 = vmatprep.subr.bf16.mxu1 %v5271_v21  ;;  %v3484_v60 = vld [vmem:[#allocation15 + $0x9f8] sm:$0xff]  ;;  %v5289_v21 = vpack.c.bf16 %v3473_v22, %v3469_v13  ;;  %v5561_v13 = vpack.c.bf16 %v3507_v34, %v3503_v31  ;;  %v5307_v22 = vpack.c.bf16 %v3514_v24, %v3510_v25  ;;  %v3535_v4 = vld [vmem:[#allocation15 + $0xb90] sm:$0xff]  ;;  %v3541_v31 = vld [vmem:[#allocation15 + $0xbc0] sm:$0xff] }
 0x5b9   : > { %5528 = vmatprep.subr.bf16.mxu0 %v5527_v33  ;;  %v3481_v33 = vld [vmem:[#allocation15 + $0x9e0] sm:$0xff]  ;;  %v5547_v61 = vpack.c.bf16 %v3484_v60, %v3480_v28  ;;  %v3518_v28 = vld [vmem:[#allocation15 + $0xb08] sm:$0xff]  ;;  %v3539_v3 = vld [vmem:[#allocation15 + $0xbb0] sm:$0xff] }
 0x5ba   : > { %v3522_v60 = vld [vmem:[#allocation15 + $0xb28] sm:$0xff]  ;;  %v3543_v34 = vld [vmem:[#allocation15 + $0xbd0] sm:$0xff] }
 0x5bb   : > { %5274 = vmatpush1.bf16.msra.mxu1 %v5273_v52  ;;  %v3488_v52 = vld [vmem:[#allocation15 + $0xa18] sm:$0xff]  ;;  %v3547_v24 = vld [vmem:[#allocation15 + $0xbf0] sm:$0xff] }
 0x5bc   : > { %5530 = vmatpush1.bf16.msra.mxu0 %v5529_v5  ;;  %5276 = vmatprep.subr.bf16.mxu1 %v5275_v2  ;;  %v3492_v5 = vld [vmem:[#allocation15 + $0xa38] sm:$0xff]  ;;  %v5293_v2 = vpack.c.bf16 %v3481_v33, %v3477_v55  ;;  %v5565_v55 = vpack.c.bf16 %v3515_v8, %v3511_v1  ;;  %v5311_v33 = vpack.c.bf16 %v3522_v60, %v3518_v28  ;;  %v3553_v8 = vld [vmem:[#allocation15 + $0xc20] sm:$0xff]  ;;  %v3551_v60 = vld [vmem:[#allocation15 + $0xc10] sm:$0xff] }
 0x5bd   : > { %5532 = vmatprep.subr.bf16.mxu0 %v5531_v16  ;;  %v3489_v16 = vld [vmem:[#allocation15 + $0xa20] sm:$0xff]  ;;  %v5551_v12 = vpack.c.bf16 %v3492_v5, %v3488_v52  ;;  %v3526_v52 = vld [vmem:[#allocation15 + $0xb48] sm:$0xff] }
 0x5be   : > { %v3530_v5 = vld [vmem:[#allocation15 + $0xb68] sm:$0xff] }
 0x5bf   : > { %5278 = vmatpush1.bf16.msra.mxu1 %v5277_v50  ;;  %v3496_v50 = vld [vmem:[#allocation15 + $0xa58] sm:$0xff] }
 0x5c0   : > { %5534 = vmatpush1.bf16.msra.mxu0 %v5533_v18  ;;  %5280 = vmatprep.subr.bf16.mxu1 %v5279_v49  ;;  %v3500_v18 = vld [vmem:[#allocation15 + $0xa78] sm:$0xff]  ;;  %v5297_v49 = vpack.c.bf16 %v3489_v16, %v3485_v37  ;;  %v5569_v37 = vpack.c.bf16 %v3523_v26, %v3519_v38  ;;  %v5315_v16 = vpack.c.bf16 %v3530_v5, %v3526_v52  ;;  %v3557_v26 = vld [vmem:[#allocation15 + $0xc40] sm:$0xff]  ;;  %v3559_v5 = vld [vmem:[#allocation15 + $0xc50] sm:$0xff] }
 0x5c1   : > { %5536 = vmatprep.subr.bf16.mxu0 %v5535_v14  ;;  %v3497_v14 = vld [vmem:[#allocation15 + $0xa60] sm:$0xff]  ;;  %v5555_v57 = vpack.c.bf16 %v3500_v18, %v3496_v50  ;;  %v3534_v50 = vld [vmem:[#allocation15 + $0xb88] sm:$0xff] }
 0x5c2   : > { %v3538_v18 = vld [vmem:[#allocation15 + $0xba8] sm:$0xff]  ;;  %v3561_v52 = vld [vmem:[#allocation15 + $0xc60] sm:$0xff] }
 0x5c3   : > { %5282 = vmatpush1.bf16.msra.mxu1 %v5281_v23  ;;  %v3504_v23 = vld [vmem:[#allocation15 + $0xa98] sm:$0xff] }
 0x5c4   : > { %5538 = vmatpush1.bf16.msra.mxu0 %v5537_v42  ;;  %5284 = vmatprep.subr.bf16.mxu1 %v5283_v9  ;;  %v3508_v42 = vld [vmem:[#allocation15 + $0xab8] sm:$0xff]  ;;  %v5301_v9 = vpack.c.bf16 %v3497_v14, %v3493_v29  ;;  %v5573_v29 = vpack.c.bf16 %v3531_v6, %v3527_v30  ;;  %v5319_v14 = vpack.c.bf16 %v3538_v18, %v3534_v50  ;;  %v3565_v18 = vld [vmem:[#allocation15 + $0xc80] sm:$0xff] }
 0x5c5   : > { %5540 = vmatprep.subr.bf16.mxu0 %v5539_v0  ;;  %v3505_v0 = vld [vmem:[#allocation15 + $0xaa0] sm:$0xff]  ;;  %v5559_v44 = vpack.c.bf16 %v3508_v42, %v3504_v23  ;;  %v3542_v23 = vld [vmem:[#allocation15 + $0xbc8] sm:$0xff]  ;;  %v3572_v30 = vld [vmem:[#allocation15 + $0xcb8] sm:$0xff] }
 0x5c6   : > { %v3546_v42 = vld [vmem:[#allocation15 + $0xbe8] sm:$0xff] }
 0x5c7   : > { %5286 = vmatpush1.bf16.msra.mxu1 %v5285_v54  ;;  %v3512_v54 = vld [vmem:[#allocation15 + $0xad8] sm:$0xff] }
 0x5c8   : > { %5542 = vmatpush1.bf16.msra.mxu0 %v5541_v40  ;;  %5288 = vmatprep.subr.bf16.mxu1 %v5287_v15  ;;  %v3516_v40 = vld [vmem:[#allocation15 + $0xaf8] sm:$0xff]  ;;  %v5305_v15 = vpack.c.bf16 %v3505_v0, %v3501_v35  ;;  %v5577_v35 = vpack.c.bf16 %v3539_v3, %v3535_v4  ;;  %v5323_v0 = vpack.c.bf16 %v3546_v42, %v3542_v23  ;;  %v3573_v42 = vld [vmem:[#allocation15 + $0xcc0] sm:$0xff] }
 0x5c9   : > { %5544 = vmatprep.subr.bf16.mxu0 %v5543_v39  ;;  %v3513_v39 = vld [vmem:[#allocation15 + $0xae0] sm:$0xff]  ;;  %v5563_v46 = vpack.c.bf16 %v3516_v40, %v3512_v54  ;;  %v3550_v54 = vld [vmem:[#allocation15 + $0xc08] sm:$0xff]  ;;  %v3580_v4 = vld [vmem:[#allocation15 + $0xcf8] sm:$0xff] }
 0x5ca   : > { %v3554_v40 = vld [vmem:[#allocation15 + $0xc28] sm:$0xff] }
 0x5cb   : > { %5290 = vmatpush1.bf16.msra.mxu1 %v5289_v21  ;;  %v3520_v21 = vld [vmem:[#allocation15 + $0xb18] sm:$0xff]  ;;  %v5327_v1 = vpack.c.bf16 %v3554_v40, %v3550_v54  ;;  %v3581_v40 = vld [vmem:[#allocation15 + $0xd00] sm:$0xff] }
 0x5cc   : > { %5546 = vmatpush1.bf16.msra.mxu0 %v5545_v43  ;;  %5292 = vmatprep.subr.bf16.mxu1 %v5291_v63  ;;  %v3524_v43 = vld [vmem:[#allocation15 + $0xb38] sm:$0xff]  ;;  %v5309_v63 = vpack.c.bf16 %v3513_v39, %v3509_v17  ;;  %v5581_v17 = vpack.c.bf16 %v3547_v24, %v3543_v34  ;;  %v3697_v39 = vsub.s32 4, %v7167_v41 }
 0x5cd   : > { %5548 = vmatprep.subr.bf16.mxu0 %v5547_v61  ;;  %v3521_v61 = vld [vmem:[#allocation15 + $0xb20] sm:$0xff]  ;;  %v5567_v53 = vpack.c.bf16 %v3524_v43, %v3520_v21  ;;  %v3555_v21 = vld [vmem:[#allocation15 + $0xc30] sm:$0xff]  ;;  %v3709_v43 = vsub.s32 7, %v7167_v41  ;;  %v3588_v34 = vld [vmem:[#allocation15 + $0xd38] sm:$0xff] }
 0x5ce   : > { %v3698_v38 = vrot.slane %v7672_v36, %v3697_v39  ;;  %v3590_v39 = vld [vmem:[#allocation15 + $0xd48] sm:$0xff] }
 0x5cf   : > { %5294 = vmatpush1.bf16.msra.mxu1 %v5293_v2  ;;  %v3528_v2 = vld [vmem:[#allocation15 + $0xb58] sm:$0xff] }
 0x5d0   : > { %5550 = vmatpush1.bf16.msra.mxu0 %v5549_v19  ;;  %5296 = vmatprep.subr.bf16.mxu1 %v5295_v27  ;;  %v3532_v19 = vld [vmem:[#allocation15 + $0xb78] sm:$0xff]  ;;  %v5313_v27 = vpack.c.bf16 %v3521_v61, %v3517_v56 }
 0x5d1   : > { %5552 = vmatprep.subr.bf16.mxu0 %v5551_v12  ;;  %v3529_v12 = vld [vmem:[#allocation15 + $0xb60] sm:$0xff]  ;;  %v5571_v20 = vpack.c.bf16 %v3532_v19, %v3528_v2  ;;  %v3560_v56 = vld [vmem:[#allocation15 + $0xc58] sm:$0xff]  ;;  %v3563_v19 = vld [vmem:[#allocation15 + $0xc70] sm:$0xff] }
 0x5d2   : > { %v3564_v61 = vld [vmem:[#allocation15 + $0xc78] sm:$0xff]  ;;  %v5589_v6 = vpack.c.bf16 %v3563_v19, %v3559_v5  ;;  %v3597_v19 = vld [vmem:[#allocation15 + $0xd80] sm:$0xff] }
 0x5d3   : > { %5298 = vmatpush1.bf16.msra.mxu1 %v5297_v49  ;;  %v3536_v49 = vld [vmem:[#allocation15 + $0xb98] sm:$0xff] }
 0x5d4   : > { %5554 = vmatpush1.bf16.msra.mxu0 %v5553_v59  ;;  %5300 = vmatprep.subr.bf16.mxu1 %v5299_v11  ;;  %v3540_v59 = vld [vmem:[#allocation15 + $0xbb8] sm:$0xff]  ;;  %v5317_v11 = vpack.c.bf16 %v3529_v12, %v3525_v10  ;;  %v5587_v10 = vpack.c.bf16 %v3564_v61, %v3560_v56  ;;  %v3595_v56 = vld [vmem:[#allocation15 + $0xd70] sm:$0xff]  ;;  %v3598_v61 = vld [vmem:[#allocation15 + $0xd88] sm:$0xff] }
 0x5d5   : > { %5556 = vmatprep.subr.bf16.mxu0 %v5555_v57  ;;  %v3537_v57 = vld [vmem:[#allocation15 + $0xba0] sm:$0xff]  ;;  %v5575_v58 = vpack.c.bf16 %v3540_v59, %v3536_v49  ;;  %v3568_v12 = vld [vmem:[#allocation15 + $0xc98] sm:$0xff]  ;;  %v3567_v59 = vld [vmem:[#allocation15 + $0xc90] sm:$0xff] }
 0x5d6   : > { %v3569_v49 = vld [vmem:[#allocation15 + $0xca0] sm:$0xff] }
 0x5d7   : > { %5302 = vmatpush1.bf16.msra.mxu1 %v5301_v9  ;;  %v3544_v9 = vld [vmem:[#allocation15 + $0xbd8] sm:$0xff] }
 0x5d8   : > { %5558 = vmatpush1.bf16.msra.mxu0 %v5557_v51  ;;  %5304 = vmatprep.subr.bf16.mxu1 %v5303_v32  ;;  %v3548_v51 = vld [vmem:[#allocation15 + $0xbf8] sm:$0xff]  ;;  %v5321_v32 = vpack.c.bf16 %v3537_v57, %v3533_v62  ;;  %v3578_v62 = vld [vmem:[#allocation15 + $0xce8] sm:$0xff] }
 0x5d9   : > { %5560 = vmatprep.subr.bf16.mxu0 %v5559_v44  ;;  %v3545_v44 = vld [vmem:[#allocation15 + $0xbe0] sm:$0xff]  ;;  %v5579_v25 = vpack.c.bf16 %v3548_v51, %v3544_v9  ;;  %v3576_v57 = vld [vmem:[#allocation15 + $0xcd8] sm:$0xff]  ;;  %v3575_v51 = vld [vmem:[#allocation15 + $0xcd0] sm:$0xff] }
 0x5da   : > { %v3577_v9 = vld [vmem:[#allocation15 + $0xce0] sm:$0xff] }
 0x5db   : > { %5306 = vmatpush1.bf16.msra.mxu1 %v5305_v15  ;;  %v3552_v15 = vld [vmem:[#allocation15 + $0xc18] sm:$0xff] }
 0x5dc   : > { %5562 = vmatpush1.bf16.msra.mxu0 %v5561_v13  ;;  %5308 = vmatprep.subr.bf16.mxu1 %v5307_v22  ;;  %v3556_v13 = vld [vmem:[#allocation15 + $0xc38] sm:$0xff]  ;;  %v5325_v22 = vpack.c.bf16 %v3545_v44, %v3541_v31  ;;  %v3586_v31 = vld [vmem:[#allocation15 + $0xd28] sm:$0xff] }
 0x5dd   : > { %5564 = vmatprep.subr.bf16.mxu0 %v5563_v46  ;;  %v3549_v46 = vld [vmem:[#allocation15 + $0xc00] sm:$0xff]  ;;  %v5583_v28 = vpack.c.bf16 %v3556_v13, %v3552_v15  ;;  %v3584_v44 = vld [vmem:[#allocation15 + $0xd18] sm:$0xff]  ;;  %v3583_v13 = vld [vmem:[#allocation15 + $0xd10] sm:$0xff] }
 0x5de   : > { %v3585_v15 = vld [vmem:[#allocation15 + $0xd20] sm:$0xff] }
 0x5df   : > { %5310 = vmatpush1.bf16.msra.mxu1 %v5309_v63  ;;  %v3558_v63 = vld [vmem:[#allocation15 + $0xc48] sm:$0xff] }
 0x5e0   : > { %5566 = vmatpush1.bf16.msra.mxu0 %v5565_v55  ;;  %5312 = vmatprep.subr.bf16.mxu1 %v5311_v33  ;;  %v3562_v55 = vld [vmem:[#allocation15 + $0xc68] sm:$0xff]  ;;  %v5329_v33 = vpack.c.bf16 %v3553_v8, %v3549_v46  ;;  %v3592_v46 = vld [vmem:[#allocation15 + $0xd58] sm:$0xff] }
 0x5e1   : > { %5568 = vmatprep.subr.bf16.mxu0 %v5567_v53  ;;  %v5585_v53 = vpack.c.bf16 %v3555_v21, %v3551_v60  ;;  %v5331_v2 = vpack.c.bf16 %v3562_v55, %v3558_v63  ;;  %v3596_v8 = vld [vmem:[#allocation15 + $0xd78] sm:$0xff]  ;;  %v3593_v63 = vld [vmem:[#allocation15 + $0xd60] sm:$0xff]  ;;  %v3591_v55 = vld [vmem:[#allocation15 + $0xd50] sm:$0xff] }
 0x5e2   : > { %v5605_v5 = vpack.c.bf16 %v3595_v56, %v3591_v55  ;;  %v3629_v55 = vld [vmem:[#allocation15 + $0xe80] sm:$0xff]  ;;  %v3631_v56 = vld [vmem:[#allocation15 + $0xe90] sm:$0xff] }
 0x5e3   : > { %5314 = vmatpush1.bf16.msra.mxu1 %v5313_v27  ;;  %v3566_v27 = vld [vmem:[#allocation15 + $0xc88] sm:$0xff] }
 0x5e4   : > { %5570 = vmatpush1.bf16.msra.mxu0 %v5569_v37  ;;  %5316 = vmatprep.subr.bf16.mxu1 %v5315_v16  ;;  %v3570_v37 = vld [vmem:[#allocation15 + $0xca8] sm:$0xff]  ;;  %v3710_v16 = vrot.slane %v7672_v36, %v3709_v43  ;;  %v3589_v43 = vld [vmem:[#allocation15 + $0xd40] sm:$0xff] }
 0x5e5   : > { %5572 = vmatprep.subr.bf16.mxu0 %v5571_v20  ;;  %v5333_v20 = vpack.c.bf16 %v3561_v52, %v3557_v26  ;;  %v5335_v50 = vpack.c.bf16 %v3570_v37, %v3566_v27  ;;  %v3604_v26 = vld [vmem:[#allocation15 + $0xdb8] sm:$0xff]  ;;  %v5349_v52 = vpack.c.bf16 %v3593_v63, %v3589_v43  ;;  %v3601_v27 = vld [vmem:[#allocation15 + $0xda0] sm:$0xff]  ;;  %v3599_v37 = vld [vmem:[#allocation15 + $0xd90] sm:$0xff] }
 0x5e7   : > { %5318 = vmatpush1.bf16.msra.mxu1 %v5317_v11  ;;  %v5591_v11 = vpack.c.bf16 %v3572_v30, %v3568_v12  ;;  %v3606_v12 = vld [vmem:[#allocation15 + $0xdc8] sm:$0xff] }
 0x5e8   : > { %5574 = vmatpush1.bf16.msra.mxu0 %v5573_v29  ;;  %5320 = vmatprep.subr.bf16.mxu1 %v5319_v14  ;;  %v3571_v29 = vld [vmem:[#allocation15 + $0xcb0] sm:$0xff]  ;;  %v3574_v14 = vld [vmem:[#allocation15 + $0xcc8] sm:$0xff] }
 0x5e9   : > { %5576 = vmatprep.subr.bf16.mxu0 %v5575_v58  ;;  %v5337_v58 = vpack.c.bf16 %v3569_v49, %v3565_v18  ;;  %v5593_v3 = vpack.c.bf16 %v3571_v29, %v3567_v59  ;;  %v5339_v23 = vpack.c.bf16 %v3578_v62, %v3574_v14  ;;  %v3610_v30 = vld [vmem:[#allocation15 + $0xde8] sm:$0xff]  ;;  %v3605_v59 = vld [vmem:[#allocation15 + $0xdc0] sm:$0xff]  ;;  %v3607_v29 = vld [vmem:[#allocation15 + $0xdd0] sm:$0xff] }
 0x5ea   : > { %v5355_v49 = vpack.c.bf16 %v3610_v30, %v3606_v12  ;;  %v3611_v62 = vld [vmem:[#allocation15 + $0xdf0] sm:$0xff] }
 0x5eb   : > { %5322 = vmatpush1.bf16.msra.mxu1 %v5321_v32  ;;  %v5595_v32 = vpack.c.bf16 %v3580_v4, %v3576_v57  ;;  %v3614_v57 = vld [vmem:[#allocation15 + $0xe08] sm:$0xff]  ;;  %v3643_v30 = vld [vmem:[#allocation15 + $0xef0] sm:$0xff] }
 0x5ec   : > { %5578 = vmatpush1.bf16.msra.mxu0 %v5577_v35  ;;  %5324 = vmatprep.subr.bf16.mxu1 %v5323_v0  ;;  %v3579_v35 = vld [vmem:[#allocation15 + $0xcf0] sm:$0xff]  ;;  %v3582_v0 = vld [vmem:[#allocation15 + $0xd08] sm:$0xff] }
 0x5ed   : > { %5580 = vmatprep.subr.bf16.mxu0 %v5579_v25  ;;  %v5341_v25 = vpack.c.bf16 %v3577_v9, %v3573_v42  ;;  %v5597_v24 = vpack.c.bf16 %v3579_v35, %v3575_v51  ;;  %v5343_v54 = vpack.c.bf16 %v3586_v31, %v3582_v0  ;;  %v3618_v4 = vld [vmem:[#allocation15 + $0xe28] sm:$0xff]  ;;  %v5613_v42 = vpack.c.bf16 %v3611_v62, %v3607_v29  ;;  %v3613_v51 = vld [vmem:[#allocation15 + $0xe00] sm:$0xff]  ;;  %v3615_v35 = vld [vmem:[#allocation15 + $0xe10] sm:$0xff] }
 0x5ee   : > { %v5359_v9 = vpack.c.bf16 %v3618_v4, %v3614_v57  ;;  %v3619_v31 = vld [vmem:[#allocation15 + $0xe30] sm:$0xff]  ;;  %v3645_v29 = vld [vmem:[#allocation15 + $0xf00] sm:$0xff] }
 0x5ef   : > { %5326 = vmatpush1.bf16.msra.mxu1 %v5325_v22  ;;  %v5599_v22 = vpack.c.bf16 %v3588_v34, %v3584_v44  ;;  %v3622_v44 = vld [vmem:[#allocation15 + $0xe48] sm:$0xff]  ;;  %v3647_v62 = vld [vmem:[#allocation15 + $0xf10] sm:$0xff] }
 0x5f0   : > { %5582 = vmatpush1.bf16.msra.mxu0 %v5581_v17  ;;  %5328 = vmatprep.subr.bf16.mxu1 %v5327_v1  ;;  %v3587_v17 = vld [vmem:[#allocation15 + $0xd30] sm:$0xff]  ;;  %v3594_v1 = vld [vmem:[#allocation15 + $0xd68] sm:$0xff] }
 0x5f1   : > { %5584 = vmatprep.subr.bf16.mxu0 %v5583_v28  ;;  %v5345_v28 = vpack.c.bf16 %v3585_v15, %v3581_v40  ;;  %v5601_v60 = vpack.c.bf16 %v3587_v17, %v3583_v13  ;;  %v5347_v21 = vpack.c.bf16 %v3594_v1, %v3590_v39  ;;  %v3626_v34 = vld [vmem:[#allocation15 + $0xe68] sm:$0xff]  ;;  %v5617_v40 = vpack.c.bf16 %v3619_v31, %v3615_v35  ;;  %v3621_v13 = vld [vmem:[#allocation15 + $0xe40] sm:$0xff]  ;;  %v3623_v17 = vld [vmem:[#allocation15 + $0xe50] sm:$0xff] }
 0x5f2   : > { %3947 = vmatmul.mubr.f32.vlgmr.msra.gmra.mrb[128].mxu1 %v3698_v38  ;;  %v5363_v15 = vpack.c.bf16 %v3626_v34, %v3622_v44  ;;  %v3627_v1 = vld [vmem:[#allocation15 + $0xe70] sm:$0xff]  ;;  %v3653_v35 = vld [vmem:[#allocation15 + $0xf40] sm:$0xff] }
 0x5f3   : > { %4231 = vmatmul.mubr.f32.vlgmr.msra.gmra.mrb[160].mxu0 %v3698_v38  ;;  %5330 = vmatpush1.bf16.msra.mxu1 %v5329_v33  ;;  %v5603_v33 = vpack.c.bf16 %v3596_v8, %v3592_v46  ;;  %v3602_v38 = vld [vmem:[#allocation15 + $0xda8] sm:$0xff]  ;;  %v5621_v43 = vpack.c.bf16 %v3627_v1, %v3623_v17  ;;  %v3651_v4 = vld [vmem:[#allocation15 + $0xf30] sm:$0xff]  ;;  %v3661_v17 = vld [vmem:[#allocation15 + $0xf80] sm:$0xff] }
 0x5f4   : > { %4017 = vmatprep.mubr.f32.mxu1 %v3710_v16  ;;  %5586 = vmatpush1.bf16.msra.mxu0 %v5585_v53  ;;  %v3600_v53 = vld [vmem:[#allocation15 + $0xd98] sm:$0xff]  ;;  %v3630_v46 = vld [vmem:[#allocation15 + $0xe88] sm:$0xff]  ;;  %v3655_v31 = vld [vmem:[#allocation15 + $0xf50] sm:$0xff] }
 0x5f5   : > { %4301 = vmatprep.mubr.f32.mxu0 %v3710_v16  ;;  %5332 = vmatprep.subr.bf16.mxu1 %v5331_v2  ;;  %v5351_v2 = vpack.c.bf16 %v3602_v38, %v3598_v61  ;;  %v5607_v16 = vpack.c.bf16 %v3604_v26, %v3600_v53  ;;  %v3634_v8 = vld [vmem:[#allocation15 + $0xea8] sm:$0xff]  ;;  %v3635_v38 = vld [vmem:[#allocation15 + $0xeb0] sm:$0xff] }
 0x5f6   : > { %5588 = vmatprep.subr.bf16.mxu0 %v5587_v10  ;;  %v3603_v10 = vld [vmem:[#allocation15 + $0xdb0] sm:$0xff]  ;;  %v5367_v63 = vpack.c.bf16 %v3634_v8, %v3630_v46  ;;  %v3638_v53 = vld [vmem:[#allocation15 + $0xec8] sm:$0xff] }
 0x5f7   : > { %5334 = vmatpush1.bf16.msra.mxu1 %v5333_v20  ;;  %v3608_v20 = vld [vmem:[#allocation15 + $0xdd8] sm:$0xff]  ;;  %v5609_v18 = vpack.c.bf16 %v3603_v10, %v3599_v37  ;;  %v3642_v26 = vld [vmem:[#allocation15 + $0xee8] sm:$0xff]  ;;  %v3637_v37 = vld [vmem:[#allocation15 + $0xec0] sm:$0xff] }
 0x5f8   : > { %5590 = vmatpush1.bf16.msra.mxu0 %v5589_v6  ;;  %5336 = vmatprep.subr.bf16.mxu1 %v5335_v50  ;;  %v3612_v6 = vld [vmem:[#allocation15 + $0xdf8] sm:$0xff]  ;;  %v5353_v50 = vpack.c.bf16 %v3601_v27, %v3597_v19  ;;  %v5625_v19 = vpack.c.bf16 %v3635_v38, %v3631_v56  ;;  %v5371_v27 = vpack.c.bf16 %v3642_v26, %v3638_v53  ;;  %v3639_v10 = vld [vmem:[#allocation15 + $0xed0] sm:$0xff]  ;;  %v3669_v56 = vld [vmem:[#allocation15 + $0xfc0] sm:$0xff] }
 0x5f9   : > { %5592 = vmatprep.subr.bf16.mxu0 %v5591_v11  ;;  %v3609_v11 = vld [vmem:[#allocation15 + $0xde0] sm:$0xff]  ;;  %v5611_v14 = vpack.c.bf16 %v3612_v6, %v3608_v20  ;;  %v3646_v20 = vld [vmem:[#allocation15 + $0xf08] sm:$0xff]  ;;  %v3659_v34 = vld [vmem:[#allocation15 + $0xf70] sm:$0xff] }
 0x5fa   : > { %v3650_v6 = vld [vmem:[#allocation15 + $0xf28] sm:$0xff]  ;;  %v3663_v1 = vld [vmem:[#allocation15 + $0xf90] sm:$0xff] }
 0x5fb   : > { %5338 = vmatpush1.bf16.msra.mxu1 %v5337_v58  ;;  %v3616_v58 = vld [vmem:[#allocation15 + $0xe18] sm:$0xff]  ;;  %v3667_v8 = vld [vmem:[#allocation15 + $0xfb0] sm:$0xff] }
 0x5fc   : > { %5594 = vmatpush1.bf16.msra.mxu0 %v5593_v3  ;;  %5340 = vmatprep.subr.bf16.mxu1 %v5339_v23  ;;  %v3620_v3 = vld [vmem:[#allocation15 + $0xe38] sm:$0xff]  ;;  %v5357_v23 = vpack.c.bf16 %v3609_v11, %v3605_v59  ;;  %v5629_v59 = vpack.c.bf16 %v3643_v30, %v3639_v10  ;;  %v5375_v11 = vpack.c.bf16 %v3650_v6, %v3646_v20  ;;  %v3671_v38 = vld [vmem:[#allocation15 + $0xfd0] sm:$0xff] }
 0x5fd   : > { %5596 = vmatprep.subr.bf16.mxu0 %v5595_v32  ;;  %v3617_v32 = vld [vmem:[#allocation15 + $0xe20] sm:$0xff]  ;;  %v5615_v0 = vpack.c.bf16 %v3620_v3, %v3616_v58  ;;  %v3654_v58 = vld [vmem:[#allocation15 + $0xf48] sm:$0xff]  ;;  %v3675_v26 = vld [vmem:[#allocation15 + $0xff0] sm:$0xff] }
 0x5fe   : > { %v3658_v3 = vld [vmem:[#allocation15 + $0xf68] sm:$0xff]  ;;  %v4314_v10 = vld [vmem:[#allocation18 + $0x10] sm:$0xff]  ;;  %v4319_v30 = vld [vmem:[#allocation18 + $0x38] sm:$0xff] }
 0x5ff   : > { %5342 = vmatpush1.bf16.msra.mxu1 %v5341_v25  ;;  %v3624_v25 = vld [vmem:[#allocation15 + $0xe58] sm:$0xff] }
 0x600   : > { %5598 = vmatpush1.bf16.msra.mxu0 %v5597_v24  ;;  %5344 = vmatprep.subr.bf16.mxu1 %v5343_v54  ;;  %v3628_v24 = vld [vmem:[#allocation15 + $0xe78] sm:$0xff]  ;;  %v5361_v54 = vpack.c.bf16 %v3617_v32, %v3613_v51  ;;  %v5633_v51 = vpack.c.bf16 %v3651_v4, %v3647_v62  ;;  %v5379_v32 = vpack.c.bf16 %v3658_v3, %v3654_v58  ;;  %v4320_v62 = vld [vmem:[#allocation18 + $0x40] sm:$0xff]  ;;  %v4325_v4 = vld [vmem:[#allocation18 + $0x68] sm:$0xff] }
 0x601   : > { %5600 = vmatprep.subr.bf16.mxu0 %v5599_v22  ;;  %v3625_v22 = vld [vmem:[#allocation15 + $0xe60] sm:$0xff]  ;;  %v5619_v39 = vpack.c.bf16 %v3628_v24, %v3624_v25  ;;  %v3662_v25 = vld [vmem:[#allocation15 + $0xf88] sm:$0xff] }
 0x602   : > { %v3666_v24 = vld [vmem:[#allocation15 + $0xfa8] sm:$0xff]  ;;  %v4327_v58 = vld [vmem:[#allocation18 + $0x78] sm:$0xff] }
 0x603   : > { %5346 = vmatpush1.bf16.msra.mxu1 %v5345_v28  ;;  %v3632_v28 = vld [vmem:[#allocation15 + $0xe98] sm:$0xff] }
 0x604   : > { %5602 = vmatpush1.bf16.msra.mxu0 %v5601_v60  ;;  %5348 = vmatprep.subr.bf16.mxu1 %v5347_v21  ;;  %v3636_v60 = vld [vmem:[#allocation15 + $0xeb8] sm:$0xff]  ;;  %v5365_v21 = vpack.c.bf16 %v3625_v22, %v3621_v13  ;;  %v5637_v13 = vpack.c.bf16 %v3659_v34, %v3655_v31  ;;  %v5383_v22 = vpack.c.bf16 %v3666_v24, %v3662_v25 }
 0x605   : > { %5604 = vmatprep.subr.bf16.mxu0 %v5603_v33  ;;  %v3633_v33 = vld [vmem:[#allocation15 + $0xea0] sm:$0xff]  ;;  %v5623_v61 = vpack.c.bf16 %v3636_v60, %v3632_v28  ;;  %v3670_v28 = vld [vmem:[#allocation15 + $0xfc8] sm:$0xff]  ;;  %v4330_v31 = vld [vmem:[#allocation18 + $0x90] sm:$0xff] }
 0x606   : > { %v3674_v60 = vld [vmem:[#allocation15 + $0xfe8] sm:$0xff]  ;;  %v4335_v34 = vld [vmem:[#allocation18 + $0xb8] sm:$0xff] }
 0x607   : > { %5350 = vmatpush1.bf16.msra.mxu1 %v5349_v52  ;;  %v3640_v52 = vld [vmem:[#allocation15 + $0xed8] sm:$0xff] }
 0x608   : > { %5606 = vmatpush1.bf16.msra.mxu0 %v5605_v5  ;;  %5352 = vmatprep.subr.bf16.mxu1 %v5351_v2  ;;  %v3644_v5 = vld [vmem:[#allocation15 + $0xef8] sm:$0xff]  ;;  %v5369_v2 = vpack.c.bf16 %v3633_v33, %v3629_v55  ;;  %v5641_v55 = vpack.c.bf16 %v3667_v8, %v3663_v1  ;;  %v5387_v33 = vpack.c.bf16 %v3674_v60, %v3670_v28 }
 0x609   : > { %5608 = vmatprep.subr.bf16.mxu0 %v5607_v16  ;;  %v3641_v16 = vld [vmem:[#allocation15 + $0xee0] sm:$0xff]  ;;  %v5627_v12 = vpack.c.bf16 %v3644_v5, %v3640_v52  ;;  %v4313_v52 = vld [vmem:[#allocation18 + $0x8] sm:$0xff]  ;;  %v4338_v1 = vld [vmem:[#allocation18 + $0xd0] sm:$0xff] }
 0x60a   : > { %v4315_v5 = vld [vmem:[#allocation18 + $0x18] sm:$0xff] }
 0x60b   : > { %5354 = vmatpush1.bf16.msra.mxu1 %v5353_v50  ;;  %v3648_v50 = vld [vmem:[#allocation15 + $0xf18] sm:$0xff] }
 0x60c   : > { %5610 = vmatpush1.bf16.msra.mxu0 %v5609_v18  ;;  %5356 = vmatprep.subr.bf16.mxu1 %v5355_v49  ;;  %v3652_v18 = vld [vmem:[#allocation15 + $0xf38] sm:$0xff]  ;;  %v5373_v49 = vpack.c.bf16 %v3641_v16, %v3637_v37  ;;  %v5647_v37 = vpack.c.bf16 %v4315_v5, %v4313_v52  ;;  %v4312_v16 = vld [vmem:[#allocation18] sm:$0xff] }
 0x60d   : > { %5612 = vmatprep.subr.bf16.mxu0 %v5611_v14  ;;  %v3649_v14 = vld [vmem:[#allocation15 + $0xf20] sm:$0xff]  ;;  %v5631_v57 = vpack.c.bf16 %v3652_v18, %v3648_v50  ;;  %v5649_v20 = vpack.c.bf16 %v4314_v10, %v4312_v16 }
 0x60e   : > { %v4316_v18 = vld [vmem:[#allocation18 + $0x20] sm:$0xff]  ;;  %v4343_v8 = vld [vmem:[#allocation18 + $0xf8] sm:$0xff] }
 0x60f   : > { %5358 = vmatpush1.bf16.msra.mxu1 %v5357_v23  ;;  %v3656_v23 = vld [vmem:[#allocation15 + $0xf58] sm:$0xff] }
 0x610   : > { %5614 = vmatpush1.bf16.msra.mxu0 %v5613_v42  ;;  %5360 = vmatprep.subr.bf16.mxu1 %v5359_v9  ;;  %v3660_v42 = vld [vmem:[#allocation15 + $0xf78] sm:$0xff]  ;;  %v5377_v9 = vpack.c.bf16 %v3649_v14, %v3645_v29 }
 0x611   : > { %5616 = vmatprep.subr.bf16.mxu0 %v5615_v0  ;;  %v3657_v0 = vld [vmem:[#allocation15 + $0xf60] sm:$0xff]  ;;  %v5635_v44 = vpack.c.bf16 %v3660_v42, %v3656_v23  ;;  %v4326_v42 = vld [vmem:[#allocation18 + $0x70] sm:$0xff] }
 0x612   : > { %v4324_v23 = vld [vmem:[#allocation18 + $0x60] sm:$0xff] }
 0x613   : > { %5362 = vmatpush1.bf16.msra.mxu1 %v5361_v54  ;;  %v3664_v54 = vld [vmem:[#allocation15 + $0xf98] sm:$0xff] }
 0x614   : > { %5618 = vmatpush1.bf16.msra.mxu0 %v5617_v40  ;;  %5364 = vmatprep.subr.bf16.mxu1 %v5363_v15  ;;  %v3668_v40 = vld [vmem:[#allocation15 + $0xfb8] sm:$0xff]  ;;  %v5381_v15 = vpack.c.bf16 %v3657_v0, %v3653_v35  ;;  %v4328_v0 = vld [vmem:[#allocation18 + $0x80] sm:$0xff] }
 0x615   : > { %5620 = vmatprep.subr.bf16.mxu0 %v5619_v39  ;;  %v3665_v39 = vld [vmem:[#allocation15 + $0xfa0] sm:$0xff]  ;;  %v5639_v46 = vpack.c.bf16 %v3668_v40, %v3664_v54  ;;  %v5665_v25 = vpack.c.bf16 %v4330_v31, %v4328_v0  ;;  %v4334_v40 = vld [vmem:[#allocation18 + $0xb0] sm:$0xff] }
 0x616   : > { %v4332_v54 = vld [vmem:[#allocation18 + $0xa0] sm:$0xff] }
 0x617   : > { %5366 = vmatpush1.bf16.msra.mxu1 %v5365_v21  ;;  %v3672_v21 = vld [vmem:[#allocation15 + $0xfd8] sm:$0xff]  ;;  %v4368_v31 = vld [vmem:[#allocation18 + $0x1c0] sm:$0xff] }
 0x618   : > { %5622 = vmatpush1.bf16.msra.mxu0 %v5621_v43  ;;  %5368 = vmatprep.subr.bf16.mxu1 %v5367_v63  ;;  %v3676_v43 = vld [vmem:[#allocation15 + $0xff8] sm:$0xff]  ;;  %v5385_v63 = vpack.c.bf16 %v3665_v39, %v3661_v17  ;;  %v4336_v39 = vld [vmem:[#allocation18 + $0xc0] sm:$0xff] }
 0x619   : > { %5624 = vmatprep.subr.bf16.mxu0 %v5623_v61  ;;  %v3673_v61 = vld [vmem:[#allocation15 + $0xfe0] sm:$0xff]  ;;  %v5643_v53 = vpack.c.bf16 %v3676_v43, %v3672_v21  ;;  %v5673_v28 = vpack.c.bf16 %v4338_v1, %v4336_v39  ;;  %v4342_v43 = vld [vmem:[#allocation18 + $0xf0] sm:$0xff] }
 0x61a   : > { %v4340_v21 = vld [vmem:[#allocation18 + $0xe0] sm:$0xff] }
 0x61b   : > { %5370 = vmatpush1.bf16.msra.mxu1 %v5369_v2  ;;  %v5389_v2 = vpack.c.bf16 %v3673_v61, %v3669_v56  ;;  %v4344_v61 = vld [vmem:[#allocation18 + $0x100] sm:$0xff] }
 0x61c   : > { %5626 = vmatpush1.bf16.msra.mxu0 %v5625_v19  ;;  %5372 = vmatprep.subr.bf16.mxu1 %v5371_v27  ;;  %v5645_v19 = vpack.c.bf16 %v3675_v26, %v3671_v38  ;;  %v3705_v27 = vsub.s32 6, %v7167_v41  ;;  %v4346_v38 = vld [vmem:[#allocation18 + $0x110] sm:$0xff]  ;;  %v4351_v26 = vld [vmem:[#allocation18 + $0x138] sm:$0xff]  ;;  %v4612_v1 = vld [vmem:[#allocation21 + $0x80] sm:$0xff] }
 0x61d   : > { %5628 = vmatprep.subr.bf16.mxu0 %v5627_v12  ;;  %v4317_v12 = vld [vmem:[#allocation18 + $0x28] sm:$0xff]  ;;  %v5681_v52 = vpack.c.bf16 %v4346_v38, %v4344_v61  ;;  %v4382_v41 = vld [vmem:[#allocation18 + $0x230] sm:$0xff] }
 0x61e   : > { %v3706_v6 = vrot.slane %v7672_v36, %v3705_v27  ;;  %v5651_v50 = vpack.c.bf16 %v4319_v30, %v4317_v12  ;;  %v5659_v36 = vpack.c.bf16 %v4327_v58, %v4325_v4  ;;  %v4353_v27 = vld [vmem:[#allocation18 + $0x148] sm:$0xff]  ;;  %v4352_v12 = vld [vmem:[#allocation18 + $0x140] sm:$0xff]  ;;  %v4354_v30 = vld [vmem:[#allocation18 + $0x150] sm:$0xff] }
 0x61f   : > { %5374 = vmatpush1.bf16.msra.mxu1 %v5373_v49  ;;  %v4318_v49 = vld [vmem:[#allocation18 + $0x30] sm:$0xff]  ;;  %v4365_v58 = vld [vmem:[#allocation18 + $0x1a8] sm:$0xff] }
 0x620   : > { %5630 = vmatpush1.bf16.msra.mxu0 %v5629_v59  ;;  %5376 = vmatprep.subr.bf16.mxu1 %v5375_v11  ;;  %v4321_v59 = vld [vmem:[#allocation18 + $0x48] sm:$0xff]  ;;  %v4323_v11 = vld [vmem:[#allocation18 + $0x58] sm:$0xff]  ;;  %v5653_v29 = vpack.c.bf16 %v4318_v49, %v4316_v18  ;;  %v4356_v49 = vld [vmem:[#allocation18 + $0x160] sm:$0xff] }
 0x621   : > { %5632 = vmatprep.subr.bf16.mxu0 %v5631_v57  ;;  %v5655_v14 = vpack.c.bf16 %v4323_v11, %v4321_v59  ;;  %v4322_v57 = vld [vmem:[#allocation18 + $0x50] sm:$0xff]  ;;  %v4361_v11 = vld [vmem:[#allocation18 + $0x188] sm:$0xff] }
 0x622   : > { %v5657_v3 = vpack.c.bf16 %v4322_v57, %v4320_v62  ;;  %v4358_v59 = vld [vmem:[#allocation18 + $0x170] sm:$0xff]  ;;  %v4360_v57 = vld [vmem:[#allocation18 + $0x180] sm:$0xff] }
 0x623   : > { %5378 = vmatpush1.bf16.msra.mxu1 %v5377_v9  ;;  %v4329_v9 = vld [vmem:[#allocation18 + $0x88] sm:$0xff]  ;;  %v4362_v4 = vld [vmem:[#allocation18 + $0x190] sm:$0xff] }
 0x624   : > { %5634 = vmatpush1.bf16.msra.mxu0 %v5633_v51  ;;  %5380 = vmatprep.subr.bf16.mxu1 %v5379_v32  ;;  %v4331_v51 = vld [vmem:[#allocation18 + $0x98] sm:$0xff]  ;;  %v5661_v32 = vpack.c.bf16 %v4326_v42, %v4324_v23  ;;  %v4364_v42 = vld [vmem:[#allocation18 + $0x1a0] sm:$0xff]  ;;  %v4617_v38 = vld [vmem:[#allocation21 + $0xa8] sm:$0xff] }
 0x625   : > { %5636 = vmatprep.subr.bf16.mxu0 %v5635_v44  ;;  %v5663_v35 = vpack.c.bf16 %v4331_v51, %v4329_v9  ;;  %v4333_v44 = vld [vmem:[#allocation18 + $0xa8] sm:$0xff]  ;;  %v4366_v9 = vld [vmem:[#allocation18 + $0x1b0] sm:$0xff] }
 0x626   : > { %v5667_v24 = vpack.c.bf16 %v4335_v34, %v4333_v44  ;;  %v4369_v51 = vld [vmem:[#allocation18 + $0x1c8] sm:$0xff]  ;;  %v4370_v44 = vld [vmem:[#allocation18 + $0x1d0] sm:$0xff] }
 0x627   : > { %5382 = vmatpush1.bf16.msra.mxu1 %v5381_v15  ;;  %v4337_v15 = vld [vmem:[#allocation18 + $0xc8] sm:$0xff]  ;;  %v5705_v34 = vpack.c.bf16 %v4370_v44, %v4368_v31  ;;  %v4376_v31 = vld [vmem:[#allocation18 + $0x200] sm:$0xff]  ;;  %v4378_v44 = vld [vmem:[#allocation18 + $0x210] sm:$0xff] }
 0x628   : > { %5638 = vmatpush1.bf16.msra.mxu0 %v5637_v13  ;;  %5384 = vmatprep.subr.bf16.mxu1 %v5383_v22  ;;  %v4339_v13 = vld [vmem:[#allocation18 + $0xd8] sm:$0xff]  ;;  %v5669_v22 = vpack.c.bf16 %v4334_v40, %v4332_v54  ;;  %v4372_v40 = vld [vmem:[#allocation18 + $0x1e0] sm:$0xff] }
 0x629   : > { %5640 = vmatprep.subr.bf16.mxu0 %v5639_v46  ;;  %v5671_v17 = vpack.c.bf16 %v4339_v13, %v4337_v15  ;;  %v4341_v46 = vld [vmem:[#allocation18 + $0xe8] sm:$0xff]  ;;  %v4374_v15 = vld [vmem:[#allocation18 + $0x1f0] sm:$0xff] }
 0x62a   : > { %v5675_v60 = vpack.c.bf16 %v4343_v8, %v4341_v46  ;;  %v5709_v13 = vpack.c.bf16 %v4374_v15, %v4372_v40  ;;  %v4613_v46 = vld [vmem:[#allocation21 + $0x88] sm:$0xff]  ;;  %v4596_v8 = vld [vmem:[#allocation21] sm:$0xff] }
 0x62b   : > { %5386 = vmatpush1.bf16.msra.mxu1 %v5385_v63  ;;  %v4345_v63 = vld [vmem:[#allocation18 + $0x108] sm:$0xff] }
 0x62c   : > { %5642 = vmatpush1.bf16.msra.mxu0 %v5641_v55  ;;  %5388 = vmatprep.subr.bf16.mxu1 %v5387_v33  ;;  %v4347_v55 = vld [vmem:[#allocation18 + $0x118] sm:$0xff]  ;;  %v5677_v33 = vpack.c.bf16 %v4342_v43, %v4340_v21  ;;  %v4616_v61 = vld [vmem:[#allocation21 + $0xa0] sm:$0xff] }
 0x62d   : > { %5644 = vmatprep.subr.bf16.mxu0 %v5643_v53  ;;  %v5679_v56 = vpack.c.bf16 %v4347_v55, %v4345_v63  ;;  %v4349_v53 = vld [vmem:[#allocation18 + $0x128] sm:$0xff]  ;;  %v4614_v21 = vld [vmem:[#allocation21 + $0x90] sm:$0xff]  ;;  %v4615_v43 = vld [vmem:[#allocation21 + $0x98] sm:$0xff] }
 0x62e   : > { %v5683_v5 = vpack.c.bf16 %v4351_v26, %v4349_v53  ;;  %v5779_v55 = vpack.c.bf16 %v4615_v43, %v4614_v21  ;;  %v5783_v26 = vpack.c.bf16 %v4617_v38, %v4616_v61  ;;  %v4386_v21 = vld [vmem:[#allocation18 + $0x250] sm:$0xff]  ;;  %v4389_v43 = vld [vmem:[#allocation18 + $0x268] sm:$0xff] }
 0x62f   : > { %5390 = vmatpush1.bf16.msra.mxu1 %v5389_v2  ;;  %v4348_v2 = vld [vmem:[#allocation18 + $0x120] sm:$0xff]  ;;  %v4390_v61 = vld [vmem:[#allocation18 + $0x270] sm:$0xff]  ;;  %v4393_v38 = vld [vmem:[#allocation18 + $0x288] sm:$0xff] }
 0x630   : > { %5646 = vmatpush1.bf16.msra.mxu0 %v5645_v19  ;;  %5648 = vmatprep.subr.bf16.mxu1 %v5647_v37  ;;  %v4350_v19 = vld [vmem:[#allocation18 + $0x130] sm:$0xff]  ;;  %v4355_v37 = vld [vmem:[#allocation18 + $0x158] sm:$0xff] }
 0x631   : > { %v5685_v16 = vpack.c.bf16 %v4350_v19, %v4348_v2  ;;  %v5687_v10 = vpack.c.bf16 %v4355_v37, %v4353_v27  ;;  %v4618_v2 = vld [vmem:[#allocation21 + $0xb0] sm:$0xff]  ;;  %v4619_v19 = vld [vmem:[#allocation21 + $0xb8] sm:$0xff] }
 0x632   : > { %4018 = vmatmul.mubr.f32.vlgmr.msra.gmra.mrb[128].mxu1 %v3706_v6  ;;  %v5787_v37 = vpack.c.bf16 %v4619_v19, %v4618_v2  ;;  %v4394_v2 = vld [vmem:[#allocation18 + $0x290] sm:$0xff]  ;;  %v4397_v19 = vld [vmem:[#allocation18 + $0x2a8] sm:$0xff] }
 0x633   : > { %4302 = vmatmul.mubr.f32.vlgmr.msra.gmra.mrb[160].mxu0 %v3706_v6  ;;  %5650 = vmatpush1.bf16.msra.mxu1 %v5649_v20  ;;  %v4357_v20 = vld [vmem:[#allocation18 + $0x168] sm:$0xff]  ;;  %v4359_v6 = vld [vmem:[#allocation18 + $0x178] sm:$0xff] }
 0x634   : > { %5652 = vmatprep.subr.bf16.mxu1 %v5651_v50  ;;  %v5689_v50 = vpack.c.bf16 %v4354_v30, %v4352_v12  ;;  %v5691_v18 = vpack.c.bf16 %v4359_v6, %v4357_v20  ;;  %v4620_v12 = vld [vmem:[#allocation21 + $0xc0] sm:$0xff]  ;;  %v4621_v30 = vld [vmem:[#allocation21 + $0xc8] sm:$0xff] }
 0x635   : > { %v5791_v6 = vpack.c.bf16 %v4621_v30, %v4620_v12  ;;  %v4398_v12 = vld [vmem:[#allocation18 + $0x2b0] sm:$0xff]  ;;  %v4401_v30 = vld [vmem:[#allocation18 + $0x2c8] sm:$0xff] }
 0x637   : > { %5654 = vmatpush1.bf16.msra.mxu1 %v5653_v29  ;;  %v4363_v29 = vld [vmem:[#allocation18 + $0x198] sm:$0xff] }
 0x638   : > { %5656 = vmatprep.subr.bf16.mxu1 %v5655_v14  ;;  %v5693_v14 = vpack.c.bf16 %v4358_v59, %v4356_v49  ;;  %v5695_v62 = vpack.c.bf16 %v4363_v29, %v4361_v11  ;;  %v4622_v49 = vld [vmem:[#allocation21 + $0xd0] sm:$0xff]  ;;  %v4623_v59 = vld [vmem:[#allocation21 + $0xd8] sm:$0xff] }
 0x639   : > { %v5795_v29 = vpack.c.bf16 %v4623_v59, %v4622_v49  ;;  %v4402_v49 = vld [vmem:[#allocation18 + $0x2d0] sm:$0xff]  ;;  %v4405_v59 = vld [vmem:[#allocation18 + $0x2e8] sm:$0xff] }
 0x63b   : > { %5658 = vmatpush1.bf16.msra.mxu1 %v5657_v3  ;;  %v4367_v3 = vld [vmem:[#allocation18 + $0x1b8] sm:$0xff] }
 0x63c   : > { %5660 = vmatprep.subr.bf16.mxu1 %v5659_v36  ;;  %v5697_v36 = vpack.c.bf16 %v4362_v4, %v4360_v57  ;;  %v5699_v23 = vpack.c.bf16 %v4367_v3, %v4365_v58  ;;  %v4624_v57 = vld [vmem:[#allocation21 + $0xe0] sm:$0xff]  ;;  %v4625_v4 = vld [vmem:[#allocation21 + $0xe8] sm:$0xff] }
 0x63d   : > { %v5799_v3 = vpack.c.bf16 %v4625_v4, %v4624_v57  ;;  %v4406_v57 = vld [vmem:[#allocation18 + $0x2f0] sm:$0xff]  ;;  %v4409_v4 = vld [vmem:[#allocation18 + $0x308] sm:$0xff] }
 0x63f   : > { %5662 = vmatpush1.bf16.msra.mxu1 %v5661_v32  ;;  %v4371_v32 = vld [vmem:[#allocation18 + $0x1d8] sm:$0xff] }
 0x640   : > { %5664 = vmatprep.subr.bf16.mxu1 %v5663_v35  ;;  %v5701_v35 = vpack.c.bf16 %v4366_v9, %v4364_v42  ;;  %v5703_v0 = vpack.c.bf16 %v4371_v32, %v4369_v51 }
 0x643   : > { %5666 = vmatpush1.bf16.msra.mxu1 %v5665_v25  ;;  %v4373_v25 = vld [vmem:[#allocation18 + $0x1e8] sm:$0xff] }
 0x644   : > { %5668 = vmatprep.subr.bf16.mxu1 %v5667_v24  ;;  %v4375_v24 = vld [vmem:[#allocation18 + $0x1f8] sm:$0xff] }
 0x645   : > { %v5707_v54 = vpack.c.bf16 %v4375_v24, %v4373_v25  ;;  %v4381_v24 = vld [vmem:[#allocation18 + $0x228] sm:$0xff] }
 0x647   : > { %5670 = vmatpush1.bf16.msra.mxu1 %v5669_v22  ;;  %v4377_v22 = vld [vmem:[#allocation18 + $0x208] sm:$0xff] }
 0x648   : > { %5672 = vmatprep.subr.bf16.mxu1 %v5671_v17  ;;  %v4379_v17 = vld [vmem:[#allocation18 + $0x218] sm:$0xff] }
 0x649   : > { %v5711_v39 = vpack.c.bf16 %v4379_v17, %v4377_v22 }
 0x64b   : > { %5674 = vmatpush1.bf16.msra.mxu1 %v5673_v28  ;;  %v5775_v28 = vpack.c.bf16 %v4613_v46, %v4612_v1  ;;  %v4387_v46 = vld [vmem:[#allocation18 + $0x258] sm:$0xff] }
 0x64c   : > { %5676 = vmatprep.subr.bf16.mxu1 %v5675_v60  ;;  %v4597_v60 = vld [vmem:[#allocation21 + $0x8] sm:$0xff] }
 0x64d   : > { %v5777_v63 = vpack.c.bf16 %v4597_v60, %v4596_v8  ;;  %5776 = vmatprep.subr.bf16.mxu0 %v5775_v28  ;;  %v4384_v60 = vld [vmem:[#allocation18 + $0x240] sm:$0xff] }
 0x64f   : > { %5678 = vmatpush1.bf16.msra.mxu1 %v5677_v33  ;;  %v4598_v33 = vld [vmem:[#allocation21 + $0x10] sm:$0xff]  ;;  %5778 = vmatpush3.bf16.msra.mxu0 %v5777_v63 }
 0x650   : > { %5680 = vmatprep.subr.bf16.mxu1 %v5679_v56  ;;  %v4599_v56 = vld [vmem:[#allocation21 + $0x18] sm:$0xff]  ;;  %5780 = vmatprep.subr.bf16.mxu0 %v5779_v55  ;;  %v5721_v55 = vpack.c.bf16 %v4386_v21, %v4384_v60 }
 0x651   : > { %v5781_v53 = vpack.c.bf16 %v4599_v56, %v4598_v33  ;;  %v4391_v63 = vld [vmem:[#allocation18 + $0x278] sm:$0xff]  ;;  %v4388_v56 = vld [vmem:[#allocation18 + $0x260] sm:$0xff] }
 0x652   : > { %v5723_v33 = vpack.c.bf16 %v4391_v63, %v4389_v43  ;;  %v4424_v21 = vld [vmem:[#allocation18 + $0x380] sm:$0xff]  ;;  %v4426_v43 = vld [vmem:[#allocation18 + $0x390] sm:$0xff]  ;;  %v4429_v63 = vld [vmem:[#allocation18 + $0x3a8] sm:$0xff] }
 0x653   : > { %5682 = vmatpush1.bf16.msra.mxu1 %v5681_v52  ;;  %v4600_v52 = vld [vmem:[#allocation21 + $0x20] sm:$0xff]  ;;  %5782 = vmatpush3.bf16.msra.mxu0 %v5781_v53  ;;  %v4395_v53 = vld [vmem:[#allocation18 + $0x298] sm:$0xff] }
 0x654   : > { %5684 = vmatprep.subr.bf16.mxu1 %v5683_v5  ;;  %v4601_v5 = vld [vmem:[#allocation21 + $0x28] sm:$0xff]  ;;  %5784 = vmatprep.subr.bf16.mxu0 %v5783_v26  ;;  %v5725_v26 = vpack.c.bf16 %v4390_v61, %v4388_v56  ;;  %v4428_v61 = vld [vmem:[#allocation18 + $0x3a0] sm:$0xff] }
 0x655   : > { %v5785_v27 = vpack.c.bf16 %v4601_v5, %v4600_v52  ;;  %v5727_v52 = vpack.c.bf16 %v4395_v53, %v4393_v38  ;;  %v4392_v5 = vld [vmem:[#allocation18 + $0x280] sm:$0xff]  ;;  %v4430_v38 = vld [vmem:[#allocation18 + $0x3b0] sm:$0xff]  ;;  %v4433_v53 = vld [vmem:[#allocation18 + $0x3c8] sm:$0xff] }
 0x657   : > { %5686 = vmatpush1.bf16.msra.mxu1 %v5685_v16  ;;  %v4602_v16 = vld [vmem:[#allocation21 + $0x30] sm:$0xff]  ;;  %5786 = vmatpush3.bf16.msra.mxu0 %v5785_v27 }
 0x658   : > { %5688 = vmatprep.subr.bf16.mxu1 %v5687_v10  ;;  %v4603_v10 = vld [vmem:[#allocation21 + $0x38] sm:$0xff]  ;;  %5788 = vmatprep.subr.bf16.mxu0 %v5787_v37  ;;  %v5729_v37 = vpack.c.bf16 %v4394_v2, %v4392_v5 }
 0x659   : > { %v5789_v20 = vpack.c.bf16 %v4603_v10, %v4602_v16  ;;  %v4399_v27 = vld [vmem:[#allocation18 + $0x2b8] sm:$0xff]  ;;  %v4396_v10 = vld [vmem:[#allocation18 + $0x2a0] sm:$0xff] }
 0x65a   : > { %v5731_v16 = vpack.c.bf16 %v4399_v27, %v4397_v19  ;;  %v4432_v2 = vld [vmem:[#allocation18 + $0x3c0] sm:$0xff]  ;;  %v4434_v19 = vld [vmem:[#allocation18 + $0x3d0] sm:$0xff]  ;;  %v4437_v27 = vld [vmem:[#allocation18 + $0x3e8] sm:$0xff] }
 0x65b   : > { %5690 = vmatpush1.bf16.msra.mxu1 %v5689_v50  ;;  %v4604_v50 = vld [vmem:[#allocation21 + $0x40] sm:$0xff]  ;;  %5790 = vmatpush3.bf16.msra.mxu0 %v5789_v20  ;;  %v4403_v20 = vld [vmem:[#allocation18 + $0x2d8] sm:$0xff] }
 0x65c   : > { %5692 = vmatprep.subr.bf16.mxu1 %v5691_v18  ;;  %v4605_v18 = vld [vmem:[#allocation21 + $0x48] sm:$0xff]  ;;  %5792 = vmatprep.subr.bf16.mxu0 %v5791_v6  ;;  %v5733_v6 = vpack.c.bf16 %v4398_v12, %v4396_v10 }
 0x65d   : > { %v5793_v11 = vpack.c.bf16 %v4605_v18, %v4604_v50  ;;  %v5735_v50 = vpack.c.bf16 %v4403_v20, %v4401_v30  ;;  %v4400_v18 = vld [vmem:[#allocation18 + $0x2c0] sm:$0xff]  ;;  %v4438_v20 = vld [vmem:[#allocation18 + $0x3f0] sm:$0xff] }
 0x65e   : > { %v4436_v30 = vld [vmem:[#allocation18 + $0x3e0] sm:$0xff] }
 0x65f   : > { %5694 = vmatpush1.bf16.msra.mxu1 %v5693_v14  ;;  %v4606_v14 = vld [vmem:[#allocation21 + $0x50] sm:$0xff]  ;;  %5794 = vmatpush3.bf16.msra.mxu0 %v5793_v11 }
 0x660   : > { %5696 = vmatprep.subr.bf16.mxu1 %v5695_v62  ;;  %v4607_v62 = vld [vmem:[#allocation21 + $0x58] sm:$0xff]  ;;  %5796 = vmatprep.subr.bf16.mxu0 %v5795_v29  ;;  %v5737_v29 = vpack.c.bf16 %v4402_v49, %v4400_v18  ;;  %v4608_v49 = vld [vmem:[#allocation21 + $0x60] sm:$0xff] }
 0x661   : > { %v5797_v58 = vpack.c.bf16 %v4607_v62, %v4606_v14  ;;  %v4407_v11 = vld [vmem:[#allocation18 + $0x2f8] sm:$0xff]  ;;  %v4404_v62 = vld [vmem:[#allocation18 + $0x2e0] sm:$0xff] }
 0x662   : > { %v5739_v14 = vpack.c.bf16 %v4407_v11, %v4405_v59  ;;  %v4609_v59 = vld [vmem:[#allocation21 + $0x68] sm:$0xff] }
 0x663   : > { %5698 = vmatpush1.bf16.msra.mxu1 %v5697_v36  ;;  %5798 = vmatpush3.bf16.msra.mxu0 %v5797_v58  ;;  %v7692_v36 = vld [vmem:[#allocation17] sm:$0xf]  ;;  %v5801_v11 = vpack.c.bf16 %v4609_v59, %v4608_v49 }
 0x664   : > { %5700 = vmatprep.subr.bf16.mxu1 %v5699_v23  ;;  %5800 = vmatprep.subr.bf16.mxu0 %v5799_v3  ;;  %v3723_v23 = vrot.slane %v7692_v36, %v7184_v48  ;;  %v3727_v42 = vrot.slane %v7692_v36, %v7177_v45  ;;  %v3735_v9 = vrot.slane %v7692_v36, %v3693_v7  ;;  %v4385_v7 = vld [vmem:[#allocation18 + $0x248] sm:$0xff]  ;;  %v4411_v58 = vld [vmem:[#allocation18 + $0x318] sm:$0xff] }
 0x665   : > { %v5719_v28 = vpack.c.bf16 %v4387_v46, %v4385_v7  ;;  %v5741_v3 = vpack.c.bf16 %v4406_v57, %v4404_v62  ;;  %v4422_v7 = vld [vmem:[#allocation18 + $0x370] sm:$0xff]  ;;  %v4425_v46 = vld [vmem:[#allocation18 + $0x388] sm:$0xff]  ;;  %v3731_v10 = vrot.slane %v7692_v36, %v7181_v47  ;;  %v4611_v36 = vld [vmem:[#allocation21 + $0x78] sm:$0xff] }
 0x666   : > { %v4610_v47 = vld [vmem:[#allocation21 + $0x70] sm:$0xff] }
 0x667   : > { %5702 = vmatpush1.bf16.msra.mxu1 %v5701_v35  ;;  %5802 = vmatpush3.bf16.msra.mxu0 %v5801_v11  ;;  %v5805_v57 = vpack.c.bf16 %v4611_v36, %v4610_v47 }
 0x668   : > { %5704 = vmatprep.subr.bf16.mxu1 %v5703_v0 }
 0x66b   : > { %5706 = vmatpush1.bf16.msra.mxu1 %v5705_v34 }
 0x66c   : > { %5708 = vmatprep.subr.bf16.mxu1 %v5707_v54  ;;  %v4383_v54 = vld [vmem:[#allocation18 + $0x238] sm:$0xff] }
 0x66d   : > { %v5715_v17 = vpack.c.bf16 %v4383_v54, %v4381_v24  ;;  %v4419_v24 = vld [vmem:[#allocation18 + $0x358] sm:$0xff] }
 0x66f   : > { %5710 = vmatpush1.bf16.msra.mxu1 %v5709_v13  ;;  %v5713_v13 = vpack.c.bf16 %v4378_v44, %v4376_v31  ;;  %v4412_v44 = vld [vmem:[#allocation18 + $0x320] sm:$0xff] }
 0x670   : > { %5712 = vmatprep.subr.bf16.mxu1 %v5711_v39  ;;  %v4380_v39 = vld [vmem:[#allocation18 + $0x220] sm:$0xff] }
 0x671   : > { %v5717_v8 = vpack.c.bf16 %v4382_v41, %v4380_v39 }
 0x705   : > { %v4019_v51 = vpop.f32.mrb[128].mxu1 }
 0x706   : > { %v5807_v32 = vadd.f32 %v4019_v51, %v3723_v23  ;;  %v7701_v35 = vpop.f32.mrb[160].mxu0  ;;  %v4021_v0 = vpop.f32.mrb[129].mxu1  ;;  %v5743_v23 = vpack.c.bf16 %v4411_v58, %v4409_v4  ;;  %v4413_v51 = vld [vmem:[#allocation18 + $0x328] sm:$0xff]  ;;  %v4440_v4 = vld [vmem:[#allocation20] sm:$0x3] }
 0x707   : > { %v5808_v34 = vadd.f32 %v4021_v0, %v3727_v42  ;;  %v4305_v25 = vpop.f32.mrb[161].mxu0  ;;  %v4408_v42 = vld [vmem:[#allocation18 + $0x300] sm:$0xff]  ;;  %v4445_v58 = vrot.slane %v4440_v4, %v7184_v48 }
 0x708   : > { %v5810_v40 = vadd.f32 %v4305_v25, %v3735_v9  ;;  %v4308_v22 = vmax.f32 %v5807_v32, 0.0  ;;  %v4410_v9 = vld [vmem:[#allocation18 + $0x310] sm:$0xff]  ;;  %v4415_v32 = vld [vmem:[#allocation18 + $0x338] sm:$0xff]  ;;  %v4417_v25 = vld [vmem:[#allocation18 + $0x348] sm:$0xff] }
 0x709   : > { %v4309_v15 = vmax.f32 %v5808_v34, 0.0  ;;  %v5745_v0 = vpack.c.bf16 %v4410_v9, %v4408_v42  ;;  %v5747_v31 = vpack.c.bf16 %v4415_v32, %v4413_v51  ;;  %v4414_v34 = vld [vmem:[#allocation18 + $0x330] sm:$0xff] }
 0x70a   : > { %v4311_v1 = vmax.f32 %v5810_v40, 0.0  ;;  %v5749_v54 = vpack.c.bf16 %v4414_v34, %v4412_v44  ;;  %v5751_v40 = vpack.c.bf16 %v4419_v24, %v4417_v25 }
 0x70b   : > { %4516 = vmatprep.mubr.f32.mxu1 %v4309_v15  ;;  %v4416_v15 = vld [vmem:[#allocation18 + $0x340] sm:$0xff] }
 0x70c   : > { %4517 = vmatmul.mubr.f32.vlgmr.msra.gmra.mrb[130].mxu1 %v4308_v22  ;;  %v4421_v22 = vld [vmem:[#allocation18 + $0x368] sm:$0xff] }
 0x70d   : > { %5714 = vmatpush1.bf16.msra.mxu1 %v5713_v13  ;;  %4587 = vmatprep.mubr.f32.mxu1 %v4311_v1  ;;  %v4418_v13 = vld [vmem:[#allocation18 + $0x350] sm:$0xff]  ;;  %v4420_v1 = vld [vmem:[#allocation18 + $0x360] sm:$0xff] }
 0x70e   : > { %5716 = vmatprep.subr.bf16.mxu1 %v5715_v17  ;;  %v4423_v17 = vld [vmem:[#allocation18 + $0x378] sm:$0xff]  ;;  %v5753_v39 = vpack.c.bf16 %v4418_v13, %v4416_v15 }
 0x70f   : > { %v5755_v41 = vpack.c.bf16 %v4423_v17, %v4421_v22 }
 0x711   : > { %5718 = vmatpush1.bf16.msra.mxu1 %v5717_v8  ;;  %v4427_v8 = vld [vmem:[#allocation18 + $0x398] sm:$0xff] }
 0x712   : > { %5720 = vmatprep.subr.bf16.mxu1 %v5719_v28  ;;  %v5757_v28 = vpack.c.bf16 %v4422_v7, %v4420_v1  ;;  %v5759_v60 = vpack.c.bf16 %v4427_v8, %v4425_v46 }
 0x715   : > { %5722 = vmatpush1.bf16.msra.mxu1 %v5721_v55  ;;  %v4431_v55 = vld [vmem:[#allocation18 + $0x3b8] sm:$0xff] }
 0x716   : > { %5724 = vmatprep.subr.bf16.mxu1 %v5723_v33  ;;  %v5761_v33 = vpack.c.bf16 %v4426_v43, %v4424_v21  ;;  %v5763_v56 = vpack.c.bf16 %v4431_v55, %v4429_v63 }
 0x719   : > { %5726 = vmatpush1.bf16.msra.mxu1 %v5725_v26  ;;  %v4435_v26 = vld [vmem:[#allocation18 + $0x3d8] sm:$0xff] }
 0x71a   : > { %5728 = vmatprep.subr.bf16.mxu1 %v5727_v52  ;;  %v5765_v52 = vpack.c.bf16 %v4430_v38, %v4428_v61  ;;  %v5767_v5 = vpack.c.bf16 %v4435_v26, %v4433_v53 }
 0x71d   : > { %5730 = vmatpush1.bf16.msra.mxu1 %v5729_v37  ;;  %v4439_v37 = vld [vmem:[#allocation18 + $0x3f8] sm:$0xff] }
 0x71e   : > { %5732 = vmatprep.subr.bf16.mxu1 %v5731_v16  ;;  %v5769_v16 = vpack.c.bf16 %v4434_v19, %v4432_v2  ;;  %v5771_v12 = vpack.c.bf16 %v4439_v37, %v4437_v27 }
 0x721   : > { %5734 = vmatpush1.bf16.msra.mxu1 %v5733_v6  ;;  %v5773_v6 = vpack.c.bf16 %v4438_v20, %v4436_v30 }
 0x722   : > { %5736 = vmatprep.subr.bf16.mxu1 %v5735_v50  ;;  %v5809_v50 = vadd.f32 %v7701_v35, %v3731_v10  ;;  %v4449_v35 = vrot.slane %v4440_v4, %v7177_v45 }
 0x724   : > { %v4310_v18 = vmax.f32 %v5809_v50, 0.0 }
 0x725   : > { %5738 = vmatpush1.bf16.msra.mxu1 %v5737_v29  ;;  %v4626_v29 = vld [vmem:[#allocation21 + $0xf0] sm:$0xff] }
 0x726   : > { %5740 = vmatprep.subr.bf16.mxu1 %v5739_v14  ;;  %v4627_v14 = vld [vmem:[#allocation21 + $0xf8] sm:$0xff] }
 0x727   : > { %v5803_v62 = vpack.c.bf16 %v4627_v14, %v4626_v29 }
 0x729   : > { %5742 = vmatpush1.bf16.msra.mxu1 %v5741_v3  ;;  %5804 = vmatprep.subr.bf16.mxu0 %v5803_v62 }
 0x72a   : > { %5744 = vmatprep.subr.bf16.mxu1 %v5743_v23  ;;  %5806 = vmatpush3.bf16.msra.mxu0 %v5805_v57 }
 0x72d   : > { %5746 = vmatpush1.bf16.msra.mxu1 %v5745_v0 }
 0x72e   : > { %5748 = vmatprep.subr.bf16.mxu1 %v5747_v31  ;;  %v4628_v31 = vld [vmem:[#allocation23] sm:$0x1] }
 0x731   : > { %5750 = vmatpush1.bf16.msra.mxu1 %v5749_v54 }
 0x732   : > { %5752 = vmatprep.subr.bf16.mxu1 %v5751_v40 }
 0x735   : > { %5754 = vmatpush1.bf16.msra.mxu1 %v5753_v39 }
 0x736   : > { %5756 = vmatprep.subr.bf16.mxu1 %v5755_v41 }
 0x739   : > { %5758 = vmatpush1.bf16.msra.mxu1 %v5757_v28 }
 0x73a   : > { %5760 = vmatprep.subr.bf16.mxu1 %v5759_v60 }
 0x73d   : > { %5762 = vmatpush1.bf16.msra.mxu1 %v5761_v33 }
 0x73e   : > { %5764 = vmatprep.subr.bf16.mxu1 %v5763_v56 }
 0x741   : > { %5766 = vmatpush1.bf16.msra.mxu1 %v5765_v52 }
 0x742   : > { %5768 = vmatprep.subr.bf16.mxu1 %v5767_v5 }
 0x745   : > { %5770 = vmatpush1.bf16.msra.mxu1 %v5769_v16 }
 0x746   : > { %5772 = vmatprep.subr.bf16.mxu1 %v5771_v12 }
 0x749   : > { %5774 = vmatpush1.bf16.msra.mxu1 %v5773_v6 }
 0x74c   : > { %4588 = vmatmul.mubr.f32.vlgmr.msra.gmra.mrb[130].mxu1 %v4310_v18 }
 0x81f   : > { %v4589_v3 = vpop.f32.mrb[130].mxu1 }
 0x820   : > { %v5811_v23 = vadd.f32 %v4589_v3, %v4445_v58  ;;  %v4591_v42 = vpop.f32.mrb[131].mxu1 }
 0x821   : > { %v5812_v9 = vadd.f32 %v4591_v42, %v4449_v35 }
 0x822   : > { %v4594_v32 = vmax.f32 %v5811_v23, 0.0 }
 0x823   : > { %v4595_v51 = vmax.f32 %v5812_v9, 0.0 }
 0x825   : > { %4693 = vmatprep.mubr.f32.mxu0 %v4595_v51 }
 0x826   : > { %4694 = vmatmul.mubr.f32.vlgmr.msra.gmra.mrb[162].mxu0 %v4594_v32 }
 0x8f9   : > { %v5092_v0 = vpop.f32.mrb[162].mxu0 }
 0x8fa   : > { %v5093_v44 = vpop.f32.mrb[163].mxu0 }
 0x8fb   : > { %v5094_v34 = vadd.f32 %v5093_v44, %v5092_v0 }
 0x8fd   : > { %v4696_v25 = vadd.f32 %v5094_v34, %v4628_v31 }
 0x8ff   : > { %v4700_v24 = vsel %vm4699_vm1, %v4696_v25, -inf }
 0x900   : > { %4701 = vmax.xlane.f32.xlu1 %v4700_v24 }
 0x98d   : > { %v4702_v48 = vpop.xlane.xlu1 %4701 }
 0x98e   : > { %v4703_v45 = vsub.f32 %v4696_v25, %v4702_v48 }
 0x990   : > { %v4704_v54 = vmul.f32 1.442695, %v4703_v45 }
 0x992   : > { %6073 = vpow2.f32 %v4704_v54 }
 0x99c   : > { %v6074_v40 = vpop.eup %6073 }
 0x99d   : > { %v4706_v15 = vsel %vm4699_vm1, %v6074_v40, 0.0 }
 0x99e   : > { %4707 = vadd.xlane.f32.xlu0 %v4706_v15 }
 0xa2b   : > { %v4708_v13 = vpop.xlane.xlu0 %4707 }
 0xa2c   : > { %6075 = vlog2.f32 %v4708_v13 }
 0xa36   : > { %v6076_v22 = vpop.eup %6075 }
 0xa37   : > { %v4710_v17 = vmul.f32 0.6931472, %v6076_v22 }
 0xa39   : > { %v4711_v39 = vsub.f32 %v4703_v45, %v4710_v17 }
 0xa3b   : > { %4712 = vst [vmem:[%s633_s15] sm:$0x1] %v4711_v39 }
 0xa3c   : > { %6456 = shalt.err (!%p6453_p8)
}
 0xa3d   : > { %s6457_s25 = scalar_lea.hbm %s7713_s3, 16  ;;  %s6461_s21 = scalar_lea.hbm %s7821_s16, 32 }
 0xa3e   : > { %p6458_p9 = scmp.ne.s32.totalorder %s7713_s3, %s6457_s25  ;;  %p6462_p3 = scmp.lt.u32.totalorder %s7713_s3, %s7821_s16 }
 0xa3f   : > { %p6463_p7 = scmp.lt.u32.totalorder %s6461_s21, %s6457_s25  ;;  %p6465_p11 = scmp.lt.u32.totalorder %s6457_s25, %s7713_s3 }
 0xa40   : > { %p6459_p4 = pnand %p6458_p9, %p7822_p0 }
 0xa41   : > { %p6464_p12 = por %p6463_p7, %p6462_p3 }
 0xa42   : > { %p6460_p6 = pneg %p6459_p4 }
 0xa43   : > { %p6466_p5 = por %p6465_p11, %p6464_p12 }
 0xa45   : > { %p6467_p1 = pnand %p6466_p5, %p6460_p6 }
 0xa47   : > { %6470 = shalt.err (!%p6467_p1)
}
 0xa48   : > { %5877 = dma.vmem_to_hbm [thread:$0]  (%p7822_p0), %s7715_s0, 16, %s7713_s3, %s4714_s22  }
 0xa49 PF: > { %s7823_s23 = sld [smem:[#allocation33_spill]]  ;;  %p7824_p10 = scmp.ne.s32.totalorder %s7811_s17, 0 }
 0xa4a   : > { %p7825_p13 = scmp.ge.s32.totalorder %s6549_s30, 2 }
 0xa4c   : > { %p5921_p2 = pnand %p7825_p13, %p7824_p10 }
 0xa4f   : > { %s4738_s26 = sand.u32 1, %s7823_s23  }
 0xa50   : > { %s4739_s14 = scalar_lea.sflag [#allocation5], %s4738_s26 }
 0xa51   : > { %6524 = dma.done.wait (!%p5921_p2), %s4739_s14, 16  }
 0xa52   : > { %6526 = vsyncadd (!%p5921_p2), %s4739_s14, 4294967280  ;;  %s35_s30 = sadd.s32 1, %s6549_s30   ;;  %s7826_s25 = sld [smem:[#allocation34_spill]] }
 0xa53   : > { %p32_p8 = scmp.ge.s32.totalorder %s35_s30, 4   ;;  %s7827_s26 = smov %s6537_s27 }
 0xa54   : > { %s7828_s27 = smov %s6986_s24  ;;  %s7829_s28 = smov %s6545_s29 }
 0xa55   : > { %s7830_s29 = smov %s7832_s20  ;;  %34 = sbr.rel (!%p32_p8) target bundleno = 17 (0x11), region = 173 }
 0xa5c   :  { %4743 = vsyncpa [#allocation4], 1 }
 0xa5d   :  { %4745 = vsyncpa [#allocation4 + $0x1], 1 }
 0xa5e   :  { %4746 = vsyncpa [#allocation7], 1 }
 0xa5f   :  { %4747 = vsyncpa [#allocation10], 1 }
 0xa60   :  { %4748 = vsyncpa [#allocation13], 1 }
 0xa61   :  { %4749 = vsyncpa [#allocation16], 1 }
 0xa62   :  { %4750 = vsyncpa [#allocation19], 1 }
 0xa63   :  { %4751 = vsyncpa [#allocation22], 1 }
 0xa64   :  { %4752 = vsyncpa [#allocation5], 1 }
 0xa65   :  { %4754 = vsyncpa [#allocation5 + $0x1], 1 }

</bundles_post_ra>
